<compile_context>
chip_gen: v7x
topology: tpu7x:2x2x1
jax: 0.10.0
libtpu: 0.0.40
codegen_flags: <defaults>
</compile_context>

<pallas_src>
import math
import functools

import jax
import jax.numpy as jnp
from jax import lax
from jax.experimental import pallas as pl
from jax.experimental.pallas import tpu as pltpu


def _cross_attention_kernel(
    H, DK, Bt, N, D,
    rgb_ref, ir_ref,
    ln0_g_ref, ln0_b_ref, ln1_g_ref, ln1_b_ref,
    wqkv_vis_ref, bqkv_vis_ref, wqkv_ir_ref, bqkv_ir_ref,
    wo_vis_ref, bo_vis_ref, wo_ir_ref, bo_ir_ref,
    out_vis_ref, out_ir_ref,
):
    R = Bt * N                      # rows per stream in this grid step
    rgb = rgb_ref[...]              # (Bt, N, D) f32
    ir = ir_ref[...]                # (Bt, N, D) f32

    def layernorm(x, g_ref, b_ref):
        mu = jnp.mean(x, axis=-1, keepdims=True)
        xc = x - mu
        var = jnp.mean(xc * xc, axis=-1, keepdims=True)
        return xc * lax.rsqrt(var + 1e-5) * g_ref[...] + b_ref[...]

    # LayerNorm in f32, fold (Bt, N) -> rows, cast to bf16 for the MXU.
    rgb_n = layernorm(rgb, ln0_g_ref, ln0_b_ref).reshape(R, D).astype(jnp.bfloat16)
    ir_n = layernorm(ir, ln1_g_ref, ln1_b_ref).reshape(R, D).astype(jnp.bfloat16)

    def fused_qkv(x, w_ref, b_ref):
        # One (R, D) @ (D, 3D) matmul per stream (f32 accumulation); the Q slab
        # of the weights is already pre-scaled by 1/sqrt(DK) in the wrapper.
        y = jnp.dot(x, w_ref[...], preferred_element_type=jnp.float32) + b_ref[...]
        y = y.astype(jnp.bfloat16)
        return y[:, 0:D], y[:, D:2 * D], y[:, 2 * D:3 * D]

    q_vis, k_vis, v_vis = fused_qkv(rgb_n, wqkv_vis_ref, bqkv_vis_ref)
    q_ir, k_ir, v_ir = fused_qkv(ir_n, wqkv_ir_ref, bqkv_ir_ref)

    # Fuse both cross-attention streams along the leading (row) axis:
    #   stream 0: (q_ir, k_vis, v_vis) -> out_vis
    #   stream 1: (q_vis, k_ir, v_ir ) -> out_ir
    q_all = jnp.concatenate([q_ir, q_vis], axis=0)   # (2R, D)
    k_all = jnp.concatenate([k_vis, k_ir], axis=0)   # (2R, D)
    v_all = jnp.concatenate([v_vis, v_ir], axis=0)   # (2R, D)

    def split_heads(x):
        # (2R, D) -> (H * 2 * Bt, N, DK); batch index ordered (head, stream, b).
        # Only 128-aligned-row reshapes + leading-axis stacks (no 4-D lane/sublane
        # transposes, which Mosaic does not reliably lower).
        parts = [x[:, hi * DK:(hi + 1) * DK].reshape(2 * Bt, N, DK) for hi in range(H)]
        return jnp.stack(parts, axis=0).reshape(H * 2 * Bt, N, DK)

    qh = split_heads(q_all)
    kh = split_heads(k_all)
    vh = split_heads(v_all)

    # Single batched attention over all heads and both streams: one MXU push
    # sequence per einsum instead of 2*H isolated push/pop sequences.
    s = jnp.einsum('bnd,bmd->bnm', qh, kh, preferred_element_type=jnp.float32)
    s = s - jnp.max(s, axis=-1, keepdims=True)
    p = jnp.exp(s)
    p = p * pl.reciprocal(jnp.sum(p, axis=-1, keepdims=True), approx=True)
    # TODO(synk): attn_drop / resid_drop are identity here (inference / eval mode).
    o = jnp.einsum('bnm,bmd->bnd', p.astype(jnp.bfloat16), vh,
                   preferred_element_type=jnp.float32)      # (H*2*Bt, N, DK) f32
    o = o.astype(jnp.bfloat16).reshape(H, 2, R, DK)          # (head, stream, rows, DK)

    # Output projection without any head-slab scratch or lane concatenation:
    #   out = bias + sum_h  o_h @ Wo[h*DK:(h+1)*DK, :]
    # Each head's contribution accumulates in f32 vregs (no masked vst stores).
    out_vis = bo_vis_ref[...]        # (1, D) f32 -> broadcasts on first add
    out_ir = bo_ir_ref[...]
    for hi in range(H):              # static unrolled, H is small
        out_vis = out_vis + jnp.dot(o[hi, 0], wo_vis_ref[hi],
                                    preferred_element_type=jnp.float32)
        out_ir = out_ir + jnp.dot(o[hi, 1], wo_ir_ref[hi],
                                  preferred_element_type=jnp.float32)

    out_vis_ref[...] = out_vis.reshape(Bt, N, D).astype(out_vis_ref.dtype)
    out_ir_ref[...] = out_ir.reshape(Bt, N, D).astype(out_ir_ref.dtype)


def _num_tensorcores():
    """2 for v7x (two TensorCores per chip), else 1 (v5e / v6e single TC)."""
    try:
        kind = jax.devices()[0].device_kind.lower()
    except Exception:
        return 1
    return 2 if ("v7" in kind or "tpu7" in kind) else 1


def _pick_batch_tile(B, N, target_rows=512):
    """Biggest batch tile that divides B, with one grid step per TensorCore
    (grid of 1 on v5e/v6e, 2 on v7x) and ~target_rows rows per step max to
    bound VMEM / the N x N score tensor when B is large."""
    n_tc = _num_tensorcores()
    bt = max(1, B // n_tc) if n_tc > 1 else B
    cap = max(1, target_rows // max(N, 1))
    bt = max(1, min(bt, cap, B))
    while B % bt:
        bt -= 1
    return bt


def fuse_params(params, h):
    """One-time weight prep (hoisted out of the per-call path):
    fold 1/sqrt(d_k) into the Q projection, fuse [Wq|Wk|Wv] per stream into a
    (D, 3D) weight, cast matmul weights to bf16, reshape Wo to (h, d_k, D)."""
    (ln0_g, ln0_b, ln1_g, ln1_b,
     wq_vis, bq_vis, wk_vis, bk_vis,
     wq_ir, bq_ir, wk_ir, bk_ir,
     wv_vis, bv_vis, wv_ir, bv_ir,
     wo_vis, bo_vis, wo_ir, bo_ir) = params

    D = wq_vis.shape[0]
    assert D % h == 0
    dk = D // h
    scale = 1.0 / math.sqrt(dk)

    wqkv_vis = jnp.concatenate([wq_vis * scale, wk_vis, wv_vis], axis=1).astype(jnp.bfloat16)
    bqkv_vis = jnp.concatenate([bq_vis * scale, bk_vis, bv_vis], axis=1).astype(jnp.float32)
    wqkv_ir = jnp.concatenate([wq_ir * scale, wk_ir, wv_ir], axis=1).astype(jnp.bfloat16)
    bqkv_ir = jnp.concatenate([bq_ir * scale, bk_ir, bv_ir], axis=1).astype(jnp.float32)
    woh_vis = wo_vis.astype(jnp.bfloat16).reshape(h, dk, D)
    woh_ir = wo_ir.astype(jnp.bfloat16).reshape(h, dk, D)

    return (ln0_g, ln0_b, ln1_g, ln1_b,
            wqkv_vis, bqkv_vis, wqkv_ir, bqkv_ir,
            woh_vis, bo_vis, woh_ir, bo_ir)


@functools.partial(jax.jit, static_argnames=("h", "batch_tile"))
def cross_attention(rgb, ir, fused_params, h, batch_tile=None):
    """rgb, ir: (B, N, D) float32. fused_params: output of fuse_params().
    Returns [out_vis, out_ir], each (B, N, D)."""
    B, N, D = rgb.shape
    assert D % h == 0
    dk = D // h
    Bt = batch_tile if batch_tile is not None else _pick_batch_tile(B, N)
    assert B % Bt == 0

    (ln0_g, ln0_b, ln1_g, ln1_b,
     wqkv_vis, bqkv_vis, wqkv_ir, bqkv_ir,
     woh_vis, bo_vis, woh_ir, bo_ir) = fused_params

    kernel = functools.partial(_cross_attention_kernel, h, dk, Bt, N, D)

    # TODO(synk): when scaling D/N on v7x (64 MiB VMEM), mark these grid-constant
    # weight specs pipeline_mode=pl.Buffered(1) to drop their double buffers.
    seq_spec = pl.BlockSpec((Bt, N, D), lambda b: (b, 0, 0))
    ln_spec = pl.BlockSpec((1, D), lambda b: (0, 0))
    wqkv_spec = pl.BlockSpec((D, 3 * D), lambda b: (0, 0))
    bqkv_spec = pl.BlockSpec((1, 3 * D), lambda b: (0, 0))
    wo_spec = pl.BlockSpec((h, dk, D), lambda b: (0, 0, 0))
    bo_spec = pl.BlockSpec((1, D), lambda b: (0, 0))

    in_specs = [seq_spec, seq_spec,
                ln_spec, ln_spec, ln_spec, ln_spec,
                wqkv_spec, bqkv_spec, wqkv_spec, bqkv_spec,
                wo_spec, bo_spec, wo_spec, bo_spec]

    out_specs = (
        pl.BlockSpec((Bt, N, D), lambda b: (b, 0, 0)),
        pl.BlockSpec((Bt, N, D), lambda b: (b, 0, 0)),
    )
    out_shape = (
        jax.ShapeDtypeStruct((B, N, D), jnp.float32),
        jax.ShapeDtypeStruct((B, N, D), jnp.float32),
    )

    fn = pl.pallas_call(
        kernel,
        grid_spec=pltpu.PrefetchScalarGridSpec(
            num_scalar_prefetch=0,
            grid=(B // Bt,),
            in_specs=in_specs,
            out_specs=out_specs,
        ),
        out_shape=out_shape,
        compiler_params=pltpu.CompilerParams(
            dimension_semantics=("parallel",),
        ),
    )

    out_vis, out_ir = fn(
        rgb, ir,
        ln0_g, ln0_b, ln1_g, ln1_b,
        wqkv_vis, bqkv_vis, wqkv_ir, bqkv_ir,
        woh_vis, bo_vis, woh_ir, bo_ir,
    )
    return [out_vis, out_ir]


def init_params(key, d_model):
    """Deterministic params matching CrossAttention.init_weights:
    Linear weights ~ N(0, 0.001), Linear biases = 0, LayerNorm gamma=1, beta=0."""
    D = d_model
    keys = jax.random.split(key, 8)
    ln0_g = jnp.ones((1, D), jnp.float32)
    ln0_b = jnp.zeros((1, D), jnp.float32)
    ln1_g = jnp.ones((1, D), jnp.float32)
    ln1_b = jnp.zeros((1, D), jnp.float32)

    def lin(k):
        w = (0.001 * jax.random.normal(k, (D, D))).astype(jnp.float32)  # (in, out)
        b = jnp.zeros((1, D), jnp.float32)
        return w, b

    wq_vis, bq_vis = lin(keys[0])  # qkv_proj[0] applied to rgb
    wk_vis, bk_vis = lin(keys[1])  # qkv_proj[1] applied to rgb
    wq_ir, bq_ir = lin(keys[2])    # qkv_proj[2] applied to ir
    wk_ir, bk_ir = lin(keys[3])    # qkv_proj[3] applied to ir
    wv_vis, bv_vis = lin(keys[4])  # v_proj[0]
    wv_ir, bv_ir = lin(keys[5])    # v_proj[1]
    wo_vis, bo_vis = lin(keys[6])  # out_proj[0]
    wo_ir, bo_ir = lin(keys[7])    # out_proj[1]

    return (ln0_g, ln0_b, ln1_g, ln1_b,
            wq_vis, bq_vis, wk_vis, bk_vis,
            wq_ir, bq_ir, wk_ir, bk_ir,
            wv_vis, bv_vis, wv_ir, bv_ir,
            wo_vis, bo_vis, wo_ir, bo_ir)


if __name__ == "__main__":
    # Small but TPU-friendly shapes: d_model=128 keeps inputs/outputs lane-dense
    # and the projection contraction 128-aligned.
    B, N, d_model, h = 4, 16, 128, 4

    root = jax.random.PRNGKey(0)
    k_rgb, k_ir, k_params = jax.random.split(root, 3)
    rgb = jax.random.normal(k_rgb, (B, N, d_model), dtype=jnp.float32)
    ir = jax.random.normal(k_ir, (B, N, d_model), dtype=jnp.float32)

    params = init_params(k_params, d_model)
    fused = fuse_params(params, h)          # one-time weight prep (hoisted)

    out_vis, out_ir = cross_attention(rgb, ir, fused, h=h)
    jax.block_until_ready(out_vis)
    jax.block_until_ready(out_ir)

    assert out_vis.shape == (B, N, d_model)
    assert out_ir.shape == (B, N, d_model)
    print("KERNEL_OK")
</pallas_src>

<mosaic_0001>
module attributes {stable_mosaic.version = 11 : i64} {
  func.func @_cross_attention_kernel(%arg0: i32, %arg1: memref<4x16x128xf32, #tpu.memory_space<vmem>>, %arg2: memref<4x16x128xf32, #tpu.memory_space<vmem>>, %arg3: memref<1x128xf32, #tpu.memory_space<vmem>>, %arg4: memref<1x128xf32, #tpu.memory_space<vmem>>, %arg5: memref<1x128xf32, #tpu.memory_space<vmem>>, %arg6: memref<1x128xf32, #tpu.memory_space<vmem>>, %arg7: memref<128x384xbf16, #tpu.memory_space<vmem>>, %arg8: memref<1x384xf32, #tpu.memory_space<vmem>>, %arg9: memref<128x384xbf16, #tpu.memory_space<vmem>>, %arg10: memref<1x384xf32, #tpu.memory_space<vmem>>, %arg11: memref<4x32x128xbf16, #tpu.memory_space<vmem>>, %arg12: memref<1x128xf32, #tpu.memory_space<vmem>>, %arg13: memref<4x32x128xbf16, #tpu.memory_space<vmem>>, %arg14: memref<1x128xf32, #tpu.memory_space<vmem>>, %arg15: memref<4x16x128xf32, #tpu.memory_space<vmem>>, %arg16: memref<4x16x128xf32, #tpu.memory_space<vmem>>) attributes {dimension_semantics = [#tpu.dimension_semantics<parallel>], iteration_bounds = array<i64: 1>, scalar_prefetch = 0 : i64, scratch_operands = 0 : i64, tpu.core_type = #tpu.core_type<tc>, window_params = [{transform_indices = @transform_0, window_bounds = array<i64: 4, 16, 128>}, {transform_indices = @transform_1, window_bounds = array<i64: 4, 16, 128>}, {pipeline_mode = #tpu.pipeline_mode<synchronous>, transform_indices = @transform_2, window_bounds = array<i64: 1, 128>}, {pipeline_mode = #tpu.pipeline_mode<synchronous>, transform_indices = @transform_3, window_bounds = array<i64: 1, 128>}, {pipeline_mode = #tpu.pipeline_mode<synchronous>, transform_indices = @transform_4, window_bounds = array<i64: 1, 128>}, {pipeline_mode = #tpu.pipeline_mode<synchronous>, transform_indices = @transform_5, window_bounds = array<i64: 1, 128>}, {pipeline_mode = #tpu.pipeline_mode<synchronous>, transform_indices = @transform_6, window_bounds = array<i64: 128, 384>}, {pipeline_mode = #tpu.pipeline_mode<synchronous>, transform_indices = @transform_7, window_bounds = array<i64: 1, 384>}, {pipeline_mode = #tpu.pipeline_mode<synchronous>, transform_indices = @transform_8, window_bounds = array<i64: 128, 384>}, {pipeline_mode = #tpu.pipeline_mode<synchronous>, transform_indices = @transform_9, window_bounds = array<i64: 1, 384>}, {pipeline_mode = #tpu.pipeline_mode<synchronous>, transform_indices = @transform_10, window_bounds = array<i64: 4, 32, 128>}, {pipeline_mode = #tpu.pipeline_mode<synchronous>, transform_indices = @transform_11, window_bounds = array<i64: 1, 128>}, {pipeline_mode = #tpu.pipeline_mode<synchronous>, transform_indices = @transform_12, window_bounds = array<i64: 4, 32, 128>}, {pipeline_mode = #tpu.pipeline_mode<synchronous>, transform_indices = @transform_13, window_bounds = array<i64: 1, 128>}, {transform_indices = @transform_14, window_bounds = array<i64: 4, 16, 128>}, {transform_indices = @transform_15, window_bounds = array<i64: 4, 16, 128>}]} {
    %c0 = arith.constant 0 : index
    %c0_0 = arith.constant 0 : index
    %c0_1 = arith.constant 0 : index
    %0 = vector.load %arg1[%c0, %c0_0, %c0_1] : memref<4x16x128xf32, #tpu.memory_space<vmem>>, vector<4x16x128xf32>
    %c0_2 = arith.constant 0 : index
    %c0_3 = arith.constant 0 : index
    %c0_4 = arith.constant 0 : index
    %1 = vector.load %arg2[%c0_2, %c0_3, %c0_4] : memref<4x16x128xf32, #tpu.memory_space<vmem>>, vector<4x16x128xf32>
    %cst = arith.constant dense<0.000000e+00> : vector<4x16xf32>
    %2 = vector.multi_reduction <add>, %0, %cst [2] : vector<4x16x128xf32> to vector<4x16xf32>
    %3 = vector.shape_cast %2 : vector<4x16xf32> to vector<4x16x1xf32>
    %cst_5 = arith.constant 1.280000e+02 : f32
    %4 = vector.broadcast %cst_5 : f32 to vector<4x16x1xf32>
    %5 = arith.divf %3, %4 : vector<4x16x1xf32>
    %6 = vector.broadcast %5 : vector<4x16x1xf32> to vector<4x16x128xf32>
    %7 = arith.subf %0, %6 : vector<4x16x128xf32>
    %8 = arith.mulf %7, %7 : vector<4x16x128xf32>
    %cst_6 = arith.constant dense<0.000000e+00> : vector<4x16xf32>
    %9 = vector.multi_reduction <add>, %8, %cst_6 [2] : vector<4x16x128xf32> to vector<4x16xf32>
    %10 = vector.shape_cast %9 : vector<4x16xf32> to vector<4x16x1xf32>
    %cst_7 = arith.constant 1.280000e+02 : f32
    %11 = vector.broadcast %cst_7 : f32 to vector<4x16x1xf32>
    %12 = arith.divf %10, %11 : vector<4x16x1xf32>
    %cst_8 = arith.constant 9.99999974E-6 : f32
    %13 = vector.broadcast %cst_8 : f32 to vector<4x16x1xf32>
    %14 = arith.addf %12, %13 : vector<4x16x1xf32>
    %15 = math.rsqrt %14 : vector<4x16x1xf32>
    %16 = vector.broadcast %15 : vector<4x16x1xf32> to vector<4x16x128xf32>
    %17 = arith.mulf %7, %16 : vector<4x16x128xf32>
    %c0_9 = arith.constant 0 : index
    %c0_10 = arith.constant 0 : index
    %18 = vector.load %arg3[%c0_9, %c0_10] : memref<1x128xf32, #tpu.memory_space<vmem>>, vector<1x128xf32>
    %19 = vector.shape_cast %18 : vector<1x128xf32> to vector<1x1x128xf32>
    %20 = vector.broadcast %19 : vector<1x1x128xf32> to vector<4x16x128xf32>
    %21 = arith.mulf %17, %20 : vector<4x16x128xf32>
    %c0_11 = arith.constant 0 : index
    %c0_12 = arith.constant 0 : index
    %22 = vector.load %arg4[%c0_11, %c0_12] : memref<1x128xf32, #tpu.memory_space<vmem>>, vector<1x128xf32>
    %23 = vector.shape_cast %22 : vector<1x128xf32> to vector<1x1x128xf32>
    %24 = vector.broadcast %23 : vector<1x1x128xf32> to vector<4x16x128xf32>
    %25 = arith.addf %21, %24 : vector<4x16x128xf32>
    %26 = vector.shape_cast %25 : vector<4x16x128xf32> to vector<64x128xf32>
    %27 = arith.truncf %26 : vector<64x128xf32> to vector<64x128xbf16>
    %cst_13 = arith.constant dense<0.000000e+00> : vector<4x16xf32>
    %28 = vector.multi_reduction <add>, %1, %cst_13 [2] : vector<4x16x128xf32> to vector<4x16xf32>
    %29 = vector.shape_cast %28 : vector<4x16xf32> to vector<4x16x1xf32>
    %cst_14 = arith.constant 1.280000e+02 : f32
    %30 = vector.broadcast %cst_14 : f32 to vector<4x16x1xf32>
    %31 = arith.divf %29, %30 : vector<4x16x1xf32>
    %32 = vector.broadcast %31 : vector<4x16x1xf32> to vector<4x16x128xf32>
    %33 = arith.subf %1, %32 : vector<4x16x128xf32>
    %34 = arith.mulf %33, %33 : vector<4x16x128xf32>
    %cst_15 = arith.constant dense<0.000000e+00> : vector<4x16xf32>
    %35 = vector.multi_reduction <add>, %34, %cst_15 [2] : vector<4x16x128xf32> to vector<4x16xf32>
    %36 = vector.shape_cast %35 : vector<4x16xf32> to vector<4x16x1xf32>
    %cst_16 = arith.constant 1.280000e+02 : f32
    %37 = vector.broadcast %cst_16 : f32 to vector<4x16x1xf32>
    %38 = arith.divf %36, %37 : vector<4x16x1xf32>
    %cst_17 = arith.constant 9.99999974E-6 : f32
    %39 = vector.broadcast %cst_17 : f32 to vector<4x16x1xf32>
    %40 = arith.addf %38, %39 : vector<4x16x1xf32>
    %41 = math.rsqrt %40 : vector<4x16x1xf32>
    %42 = vector.broadcast %41 : vector<4x16x1xf32> to vector<4x16x128xf32>
    %43 = arith.mulf %33, %42 : vector<4x16x128xf32>
    %c0_18 = arith.constant 0 : index
    %c0_19 = arith.constant 0 : index
    %44 = vector.load %arg5[%c0_18, %c0_19] : memref<1x128xf32, #tpu.memory_space<vmem>>, vector<1x128xf32>
    %45 = vector.shape_cast %44 : vector<1x128xf32> to vector<1x1x128xf32>
    %46 = vector.broadcast %45 : vector<1x1x128xf32> to vector<4x16x128xf32>
    %47 = arith.mulf %43, %46 : vector<4x16x128xf32>
    %c0_20 = arith.constant 0 : index
    %c0_21 = arith.constant 0 : index
    %48 = vector.load %arg6[%c0_20, %c0_21] : memref<1x128xf32, #tpu.memory_space<vmem>>, vector<1x128xf32>
    %49 = vector.shape_cast %48 : vector<1x128xf32> to vector<1x1x128xf32>
    %50 = vector.broadcast %49 : vector<1x1x128xf32> to vector<4x16x128xf32>
    %51 = arith.addf %47, %50 : vector<4x16x128xf32>
    %52 = vector.shape_cast %51 : vector<4x16x128xf32> to vector<64x128xf32>
    %53 = arith.truncf %52 : vector<64x128xf32> to vector<64x128xbf16>
    %c0_22 = arith.constant 0 : index
    %c0_23 = arith.constant 0 : index
    %54 = vector.load %arg7[%c0_22, %c0_23] : memref<128x384xbf16, #tpu.memory_space<vmem>>, vector<128x384xbf16>
    %cst_24 = arith.constant dense<0.000000e+00> : vector<64x384xf32>
    %55 = tpu.matmul %27, %54, %cst_24 {dimension_numbers = #tpu.dot_dimension_numbers<[1], [0], [0], [1], [0, 0, 1, 1], [], []>} : vector<64x128xbf16>, vector<128x384xbf16>, vector<64x384xf32> -> vector<64x384xf32>
    %c0_25 = arith.constant 0 : index
    %c0_26 = arith.constant 0 : index
    %56 = vector.load %arg8[%c0_25, %c0_26] : memref<1x384xf32, #tpu.memory_space<vmem>>, vector<1x384xf32>
    %57 = vector.broadcast %56 : vector<1x384xf32> to vector<64x384xf32>
    %58 = arith.addf %55, %57 : vector<64x384xf32>
    %59 = arith.truncf %58 : vector<64x384xf32> to vector<64x384xbf16>
    %60 = vector.extract_strided_slice %59 {offsets = [0, 0], sizes = [64, 128], strides = [1, 1]} : vector<64x384xbf16> to vector<64x128xbf16>
    %61 = vector.extract_strided_slice %59 {offsets = [0, 128], sizes = [64, 128], strides = [1, 1]} : vector<64x384xbf16> to vector<64x128xbf16>
    %62 = vector.extract_strided_slice %59 {offsets = [0, 256], sizes = [64, 128], strides = [1, 1]} : vector<64x384xbf16> to vector<64x128xbf16>
    %c0_27 = arith.constant 0 : index
    %c0_28 = arith.constant 0 : index
    %63 = vector.load %arg9[%c0_27, %c0_28] : memref<128x384xbf16, #tpu.memory_space<vmem>>, vector<128x384xbf16>
    %cst_29 = arith.constant dense<0.000000e+00> : vector<64x384xf32>
    %64 = tpu.matmul %53, %63, %cst_29 {dimension_numbers = #tpu.dot_dimension_numbers<[1], [0], [0], [1], [0, 0, 1, 1], [], []>} : vector<64x128xbf16>, vector<128x384xbf16>, vector<64x384xf32> -> vector<64x384xf32>
    %c0_30 = arith.constant 0 : index
    %c0_31 = arith.constant 0 : index
    %65 = vector.load %arg10[%c0_30, %c0_31] : memref<1x384xf32, #tpu.memory_space<vmem>>, vector<1x384xf32>
    %66 = vector.broadcast %65 : vector<1x384xf32> to vector<64x384xf32>
    %67 = arith.addf %64, %66 : vector<64x384xf32>
    %68 = arith.truncf %67 : vector<64x384xf32> to vector<64x384xbf16>
    %69 = vector.extract_strided_slice %68 {offsets = [0, 0], sizes = [64, 128], strides = [1, 1]} : vector<64x384xbf16> to vector<64x128xbf16>
    %70 = vector.extract_strided_slice %68 {offsets = [0, 128], sizes = [64, 128], strides = [1, 1]} : vector<64x384xbf16> to vector<64x128xbf16>
    %71 = vector.extract_strided_slice %68 {offsets = [0, 256], sizes = [64, 128], strides = [1, 1]} : vector<64x384xbf16> to vector<64x128xbf16>
    %72 = tpu.concatenate %69, %60 in 0 : vector<64x128xbf16>, vector<64x128xbf16> -> vector<128x128xbf16>
    %73 = tpu.concatenate %61, %70 in 0 : vector<64x128xbf16>, vector<64x128xbf16> -> vector<128x128xbf16>
    %74 = tpu.concatenate %62, %71 in 0 : vector<64x128xbf16>, vector<64x128xbf16> -> vector<128x128xbf16>
    %75 = vector.extract_strided_slice %72 {offsets = [0, 0], sizes = [128, 32], strides = [1, 1]} : vector<128x128xbf16> to vector<128x32xbf16>
    %76 = vector.shape_cast %75 : vector<128x32xbf16> to vector<8x16x32xbf16>
    %77 = vector.extract_strided_slice %72 {offsets = [0, 32], sizes = [128, 32], strides = [1, 1]} : vector<128x128xbf16> to vector<128x32xbf16>
    %78 = vector.shape_cast %77 : vector<128x32xbf16> to vector<8x16x32xbf16>
    %79 = vector.extract_strided_slice %72 {offsets = [0, 64], sizes = [128, 32], strides = [1, 1]} : vector<128x128xbf16> to vector<128x32xbf16>
    %80 = vector.shape_cast %79 : vector<128x32xbf16> to vector<8x16x32xbf16>
    %81 = vector.extract_strided_slice %72 {offsets = [0, 96], sizes = [128, 32], strides = [1, 1]} : vector<128x128xbf16> to vector<128x32xbf16>
    %82 = vector.shape_cast %81 : vector<128x32xbf16> to vector<8x16x32xbf16>
    %83 = vector.shape_cast %76 : vector<8x16x32xbf16> to vector<1x8x16x32xbf16>
    %84 = vector.shape_cast %78 : vector<8x16x32xbf16> to vector<1x8x16x32xbf16>
    %85 = vector.shape_cast %80 : vector<8x16x32xbf16> to vector<1x8x16x32xbf16>
    %86 = vector.shape_cast %82 : vector<8x16x32xbf16> to vector<1x8x16x32xbf16>
    %87 = tpu.concatenate %83, %84, %85, %86 in 0 : vector<1x8x16x32xbf16>, vector<1x8x16x32xbf16>, vector<1x8x16x32xbf16>, vector<1x8x16x32xbf16> -> vector<4x8x16x32xbf16>
    %88 = vector.shape_cast %87 : vector<4x8x16x32xbf16> to vector<32x16x32xbf16>
    %89 = vector.extract_strided_slice %73 {offsets = [0, 0], sizes = [128, 32], strides = [1, 1]} : vector<128x128xbf16> to vector<128x32xbf16>
    %90 = vector.shape_cast %89 : vector<128x32xbf16> to vector<8x16x32xbf16>
    %91 = vector.extract_strided_slice %73 {offsets = [0, 32], sizes = [128, 32], strides = [1, 1]} : vector<128x128xbf16> to vector<128x32xbf16>
    %92 = vector.shape_cast %91 : vector<128x32xbf16> to vector<8x16x32xbf16>
    %93 = vector.extract_strided_slice %73 {offsets = [0, 64], sizes = [128, 32], strides = [1, 1]} : vector<128x128xbf16> to vector<128x32xbf16>
    %94 = vector.shape_cast %93 : vector<128x32xbf16> to vector<8x16x32xbf16>
    %95 = vector.extract_strided_slice %73 {offsets = [0, 96], sizes = [128, 32], strides = [1, 1]} : vector<128x128xbf16> to vector<128x32xbf16>
    %96 = vector.shape_cast %95 : vector<128x32xbf16> to vector<8x16x32xbf16>
    %97 = vector.shape_cast %90 : vector<8x16x32xbf16> to vector<1x8x16x32xbf16>
    %98 = vector.shape_cast %92 : vector<8x16x32xbf16> to vector<1x8x16x32xbf16>
    %99 = vector.shape_cast %94 : vector<8x16x32xbf16> to vector<1x8x16x32xbf16>
    %100 = vector.shape_cast %96 : vector<8x16x32xbf16> to vector<1x8x16x32xbf16>
    %101 = tpu.concatenate %97, %98, %99, %100 in 0 : vector<1x8x16x32xbf16>, vector<1x8x16x32xbf16>, vector<1x8x16x32xbf16>, vector<1x8x16x32xbf16> -> vector<4x8x16x32xbf16>
    %102 = vector.shape_cast %101 : vector<4x8x16x32xbf16> to vector<32x16x32xbf16>
    %103 = vector.extract_strided_slice %74 {offsets = [0, 0], sizes = [128, 32], strides = [1, 1]} : vector<128x128xbf16> to vector<128x32xbf16>
    %104 = vector.shape_cast %103 : vector<128x32xbf16> to vector<8x16x32xbf16>
    %105 = vector.extract_strided_slice %74 {offsets = [0, 32], sizes = [128, 32], strides = [1, 1]} : vector<128x128xbf16> to vector<128x32xbf16>
    %106 = vector.shape_cast %105 : vector<128x32xbf16> to vector<8x16x32xbf16>
    %107 = vector.extract_strided_slice %74 {offsets = [0, 64], sizes = [128, 32], strides = [1, 1]} : vector<128x128xbf16> to vector<128x32xbf16>
    %108 = vector.shape_cast %107 : vector<128x32xbf16> to vector<8x16x32xbf16>
    %109 = vector.extract_strided_slice %74 {offsets = [0, 96], sizes = [128, 32], strides = [1, 1]} : vector<128x128xbf16> to vector<128x32xbf16>
    %110 = vector.shape_cast %109 : vector<128x32xbf16> to vector<8x16x32xbf16>
    %111 = vector.shape_cast %104 : vector<8x16x32xbf16> to vector<1x8x16x32xbf16>
    %112 = vector.shape_cast %106 : vector<8x16x32xbf16> to vector<1x8x16x32xbf16>
    %113 = vector.shape_cast %108 : vector<8x16x32xbf16> to vector<1x8x16x32xbf16>
    %114 = vector.shape_cast %110 : vector<8x16x32xbf16> to vector<1x8x16x32xbf16>
    %115 = tpu.concatenate %111, %112, %113, %114 in 0 : vector<1x8x16x32xbf16>, vector<1x8x16x32xbf16>, vector<1x8x16x32xbf16>, vector<1x8x16x32xbf16> -> vector<4x8x16x32xbf16>
    %116 = vector.shape_cast %115 : vector<4x8x16x32xbf16> to vector<32x16x32xbf16>
    "tpu.trace_start"() <{level = 10 : i32, message = "bnd,bmd->bnm"}> : () -> ()
    %cst_32 = arith.constant dense<0.000000e+00> : vector<32x16x16xf32>
    %117 = tpu.matmul %88, %102, %cst_32 {dimension_numbers = #tpu.dot_dimension_numbers<[2], [2], [1], [1], [0, 0, 0, 1, 1, 1], [0], [0]>} : vector<32x16x32xbf16>, vector<32x16x32xbf16>, vector<32x16x16xf32> -> vector<32x16x16xf32>
    "tpu.trace_stop"() : () -> ()
    %cst_33 = arith.constant dense<0xFF800000> : vector<32x16xf32>
    %118 = vector.multi_reduction <maximumf>, %117, %cst_33 [2] : vector<32x16x16xf32> to vector<32x16xf32>
    %119 = vector.shape_cast %118 : vector<32x16xf32> to vector<32x16x1xf32>
    %120 = vector.broadcast %119 : vector<32x16x1xf32> to vector<32x16x16xf32>
    %121 = arith.subf %117, %120 : vector<32x16x16xf32>
    %122 = math.exp %121 : vector<32x16x16xf32>
    %cst_34 = arith.constant dense<0.000000e+00> : vector<32x16xf32>
    %123 = vector.multi_reduction <add>, %122, %cst_34 [2] : vector<32x16x16xf32> to vector<32x16xf32>
    %124 = vector.shape_cast %123 : vector<32x16xf32> to vector<32x16x1xf32>
    %125 = tpu.reciprocal %124 {approx = true} : vector<32x16x1xf32> -> vector<32x16x1xf32>
    %126 = vector.broadcast %125 : vector<32x16x1xf32> to vector<32x16x16xf32>
    %127 = arith.mulf %122, %126 : vector<32x16x16xf32>
    %128 = arith.truncf %127 : vector<32x16x16xf32> to vector<32x16x16xbf16>
    "tpu.trace_start"() <{level = 10 : i32, message = "bnm,bmd->bnd"}> : () -> ()
    %cst_35 = arith.constant dense<0.000000e+00> : vector<32x16x32xf32>
    %129 = tpu.matmul %128, %116, %cst_35 {dimension_numbers = #tpu.dot_dimension_numbers<[2], [1], [1], [2], [0, 0, 0, 1, 1, 2], [0], [0]>} : vector<32x16x16xbf16>, vector<32x16x32xbf16>, vector<32x16x32xf32> -> vector<32x16x32xf32>
    "tpu.trace_stop"() : () -> ()
    %130 = arith.truncf %129 : vector<32x16x32xf32> to vector<32x16x32xbf16>
    %131 = vector.shape_cast %130 : vector<32x16x32xbf16> to vector<4x2x64x32xbf16>
    %c0_36 = arith.constant 0 : index
    %c0_37 = arith.constant 0 : index
    %132 = vector.load %arg12[%c0_36, %c0_37] : memref<1x128xf32, #tpu.memory_space<vmem>>, vector<1x128xf32>
    %c0_38 = arith.constant 0 : index
    %c0_39 = arith.constant 0 : index
    %133 = vector.load %arg14[%c0_38, %c0_39] : memref<1x128xf32, #tpu.memory_space<vmem>>, vector<1x128xf32>
    %134 = vector.extract_strided_slice %131 {offsets = [0, 0, 0, 0], sizes = [1, 1, 64, 32], strides = [1, 1, 1, 1]} : vector<4x2x64x32xbf16> to vector<1x1x64x32xbf16>
    %135 = vector.shape_cast %134 : vector<1x1x64x32xbf16> to vector<64x32xbf16>
    %c0_40 = arith.constant 0 : index
    %c0_41 = arith.constant 0 : index
    %c0_42 = arith.constant 0 : index
    %136 = vector.load %arg11[%c0_40, %c0_41, %c0_42] : memref<4x32x128xbf16, #tpu.memory_space<vmem>>, vector<1x32x128xbf16>
    %137 = vector.shape_cast %136 : vector<1x32x128xbf16> to vector<32x128xbf16>
    %cst_43 = arith.constant dense<0.000000e+00> : vector<64x128xf32>
    %138 = tpu.matmul %135, %137, %cst_43 {dimension_numbers = #tpu.dot_dimension_numbers<[1], [0], [0], [1], [0, 0, 1, 1], [], []>} : vector<64x32xbf16>, vector<32x128xbf16>, vector<64x128xf32> -> vector<64x128xf32>
    %139 = vector.broadcast %132 : vector<1x128xf32> to vector<64x128xf32>
    %140 = arith.addf %139, %138 : vector<64x128xf32>
    %141 = vector.extract_strided_slice %131 {offsets = [0, 1, 0, 0], sizes = [1, 1, 64, 32], strides = [1, 1, 1, 1]} : vector<4x2x64x32xbf16> to vector<1x1x64x32xbf16>
    %142 = vector.shape_cast %141 : vector<1x1x64x32xbf16> to vector<64x32xbf16>
    %c0_44 = arith.constant 0 : index
    %c0_45 = arith.constant 0 : index
    %c0_46 = arith.constant 0 : index
    %143 = vector.load %arg13[%c0_44, %c0_45, %c0_46] : memref<4x32x128xbf16, #tpu.memory_space<vmem>>, vector<1x32x128xbf16>
    %144 = vector.shape_cast %143 : vector<1x32x128xbf16> to vector<32x128xbf16>
    %cst_47 = arith.constant dense<0.000000e+00> : vector<64x128xf32>
    %145 = tpu.matmul %142, %144, %cst_47 {dimension_numbers = #tpu.dot_dimension_numbers<[1], [0], [0], [1], [0, 0, 1, 1], [], []>} : vector<64x32xbf16>, vector<32x128xbf16>, vector<64x128xf32> -> vector<64x128xf32>
    %146 = vector.broadcast %133 : vector<1x128xf32> to vector<64x128xf32>
    %147 = arith.addf %146, %145 : vector<64x128xf32>
    %148 = vector.extract_strided_slice %131 {offsets = [1, 0, 0, 0], sizes = [1, 1, 64, 32], strides = [1, 1, 1, 1]} : vector<4x2x64x32xbf16> to vector<1x1x64x32xbf16>
    %149 = vector.shape_cast %148 : vector<1x1x64x32xbf16> to vector<64x32xbf16>
    %c1 = arith.constant 1 : index
    %c0_48 = arith.constant 0 : index
    %c0_49 = arith.constant 0 : index
    %150 = vector.load %arg11[%c1, %c0_48, %c0_49] : memref<4x32x128xbf16, #tpu.memory_space<vmem>>, vector<1x32x128xbf16>
    %151 = vector.shape_cast %150 : vector<1x32x128xbf16> to vector<32x128xbf16>
    %cst_50 = arith.constant dense<0.000000e+00> : vector<64x128xf32>
    %152 = tpu.matmul %149, %151, %cst_50 {dimension_numbers = #tpu.dot_dimension_numbers<[1], [0], [0], [1], [0, 0, 1, 1], [], []>} : vector<64x32xbf16>, vector<32x128xbf16>, vector<64x128xf32> -> vector<64x128xf32>
    %153 = arith.addf %140, %152 : vector<64x128xf32>
    %154 = vector.extract_strided_slice %131 {offsets = [1, 1, 0, 0], sizes = [1, 1, 64, 32], strides = [1, 1, 1, 1]} : vector<4x2x64x32xbf16> to vector<1x1x64x32xbf16>
    %155 = vector.shape_cast %154 : vector<1x1x64x32xbf16> to vector<64x32xbf16>
    %c1_51 = arith.constant 1 : index
    %c0_52 = arith.constant 0 : index
    %c0_53 = arith.constant 0 : index
    %156 = vector.load %arg13[%c1_51, %c0_52, %c0_53] : memref<4x32x128xbf16, #tpu.memory_space<vmem>>, vector<1x32x128xbf16>
    %157 = vector.shape_cast %156 : vector<1x32x128xbf16> to vector<32x128xbf16>
    %cst_54 = arith.constant dense<0.000000e+00> : vector<64x128xf32>
    %158 = tpu.matmul %155, %157, %cst_54 {dimension_numbers = #tpu.dot_dimension_numbers<[1], [0], [0], [1], [0, 0, 1, 1], [], []>} : vector<64x32xbf16>, vector<32x128xbf16>, vector<64x128xf32> -> vector<64x128xf32>
    %159 = arith.addf %147, %158 : vector<64x128xf32>
    %160 = vector.extract_strided_slice %131 {offsets = [2, 0, 0, 0], sizes = [1, 1, 64, 32], strides = [1, 1, 1, 1]} : vector<4x2x64x32xbf16> to vector<1x1x64x32xbf16>
    %161 = vector.shape_cast %160 : vector<1x1x64x32xbf16> to vector<64x32xbf16>
    %c2 = arith.constant 2 : index
    %c0_55 = arith.constant 0 : index
    %c0_56 = arith.constant 0 : index
    %162 = vector.load %arg11[%c2, %c0_55, %c0_56] : memref<4x32x128xbf16, #tpu.memory_space<vmem>>, vector<1x32x128xbf16>
    %163 = vector.shape_cast %162 : vector<1x32x128xbf16> to vector<32x128xbf16>
    %cst_57 = arith.constant dense<0.000000e+00> : vector<64x128xf32>
    %164 = tpu.matmul %161, %163, %cst_57 {dimension_numbers = #tpu.dot_dimension_numbers<[1], [0], [0], [1], [0, 0, 1, 1], [], []>} : vector<64x32xbf16>, vector<32x128xbf16>, vector<64x128xf32> -> vector<64x128xf32>
    %165 = arith.addf %153, %164 : vector<64x128xf32>
    %166 = vector.extract_strided_slice %131 {offsets = [2, 1, 0, 0], sizes = [1, 1, 64, 32], strides = [1, 1, 1, 1]} : vector<4x2x64x32xbf16> to vector<1x1x64x32xbf16>
    %167 = vector.shape_cast %166 : vector<1x1x64x32xbf16> to vector<64x32xbf16>
    %c2_58 = arith.constant 2 : index
    %c0_59 = arith.constant 0 : index
    %c0_60 = arith.constant 0 : index
    %168 = vector.load %arg13[%c2_58, %c0_59, %c0_60] : memref<4x32x128xbf16, #tpu.memory_space<vmem>>, vector<1x32x128xbf16>
    %169 = vector.shape_cast %168 : vector<1x32x128xbf16> to vector<32x128xbf16>
    %cst_61 = arith.constant dense<0.000000e+00> : vector<64x128xf32>
    %170 = tpu.matmul %167, %169, %cst_61 {dimension_numbers = #tpu.dot_dimension_numbers<[1], [0], [0], [1], [0, 0, 1, 1], [], []>} : vector<64x32xbf16>, vector<32x128xbf16>, vector<64x128xf32> -> vector<64x128xf32>
    %171 = arith.addf %159, %170 : vector<64x128xf32>
    %172 = vector.extract_strided_slice %131 {offsets = [3, 0, 0, 0], sizes = [1, 1, 64, 32], strides = [1, 1, 1, 1]} : vector<4x2x64x32xbf16> to vector<1x1x64x32xbf16>
    %173 = vector.shape_cast %172 : vector<1x1x64x32xbf16> to vector<64x32xbf16>
    %c3 = arith.constant 3 : index
    %c0_62 = arith.constant 0 : index
    %c0_63 = arith.constant 0 : index
    %174 = vector.load %arg11[%c3, %c0_62, %c0_63] : memref<4x32x128xbf16, #tpu.memory_space<vmem>>, vector<1x32x128xbf16>
    %175 = vector.shape_cast %174 : vector<1x32x128xbf16> to vector<32x128xbf16>
    %cst_64 = arith.constant dense<0.000000e+00> : vector<64x128xf32>
    %176 = tpu.matmul %173, %175, %cst_64 {dimension_numbers = #tpu.dot_dimension_numbers<[1], [0], [0], [1], [0, 0, 1, 1], [], []>} : vector<64x32xbf16>, vector<32x128xbf16>, vector<64x128xf32> -> vector<64x128xf32>
    %177 = arith.addf %165, %176 : vector<64x128xf32>
    %178 = vector.extract_strided_slice %131 {offsets = [3, 1, 0, 0], sizes = [1, 1, 64, 32], strides = [1, 1, 1, 1]} : vector<4x2x64x32xbf16> to vector<1x1x64x32xbf16>
    %179 = vector.shape_cast %178 : vector<1x1x64x32xbf16> to vector<64x32xbf16>
    %c3_65 = arith.constant 3 : index
    %c0_66 = arith.constant 0 : index
    %c0_67 = arith.constant 0 : index
    %180 = vector.load %arg13[%c3_65, %c0_66, %c0_67] : memref<4x32x128xbf16, #tpu.memory_space<vmem>>, vector<1x32x128xbf16>
    %181 = vector.shape_cast %180 : vector<1x32x128xbf16> to vector<32x128xbf16>
    %cst_68 = arith.constant dense<0.000000e+00> : vector<64x128xf32>
    %182 = tpu.matmul %179, %181, %cst_68 {dimension_numbers = #tpu.dot_dimension_numbers<[1], [0], [0], [1], [0, 0, 1, 1], [], []>} : vector<64x32xbf16>, vector<32x128xbf16>, vector<64x128xf32> -> vector<64x128xf32>
    %183 = arith.addf %171, %182 : vector<64x128xf32>
    %184 = vector.shape_cast %177 : vector<64x128xf32> to vector<4x16x128xf32>
    %c0_69 = arith.constant 0 : index
    %c0_70 = arith.constant 0 : index
    %c0_71 = arith.constant 0 : index
    %185 = vector.load %arg15[%c0_69, %c0_70, %c0_71] : memref<4x16x128xf32, #tpu.memory_space<vmem>>, vector<4x16x128xf32>
    tpu.vector_store %arg15[%c0_69, %c0_70, %c0_71], %184 {strides = array<i32>} : memref<4x16x128xf32, #tpu.memory_space<vmem>>, vector<4x16x128xf32>,
    %186 = vector.shape_cast %183 : vector<64x128xf32> to vector<4x16x128xf32>
    %c0_72 = arith.constant 0 : index
    %c0_73 = arith.constant 0 : index
    %c0_74 = arith.constant 0 : index
    %187 = vector.load %arg16[%c0_72, %c0_73, %c0_74] : memref<4x16x128xf32, #tpu.memory_space<vmem>>, vector<4x16x128xf32>
    tpu.vector_store %arg16[%c0_72, %c0_73, %c0_74], %186 {strides = array<i32>} : memref<4x16x128xf32, #tpu.memory_space<vmem>>, vector<4x16x128xf32>,
    return
  }
  func.func @transform_0(%arg0: i32) -> (i32, i32, i32) {
    %c0_i32 = arith.constant 0 : i32
    %c0_i32_0 = arith.constant 0 : i32
    %c0_i32_1 = arith.constant 0 : i32
    return %arg0, %c0_i32, %c0_i32_0 : i32, i32, i32
  }
  func.func @transform_1(%arg0: i32) -> (i32, i32, i32) {
    %c0_i32 = arith.constant 0 : i32
    %c0_i32_0 = arith.constant 0 : i32
    %c0_i32_1 = arith.constant 0 : i32
    return %arg0, %c0_i32, %c0_i32_0 : i32, i32, i32
  }
  func.func @transform_2(%arg0: i32) -> (i32, i32) {
    %c0_i32 = arith.constant 0 : i32
    %c0_i32_0 = arith.constant 0 : i32
    %c0_i32_1 = arith.constant 0 : i32
    return %c0_i32, %c0_i32_0 : i32, i32
  }
  func.func @transform_3(%arg0: i32) -> (i32, i32) {
    %c0_i32 = arith.constant 0 : i32
    %c0_i32_0 = arith.constant 0 : i32
    %c0_i32_1 = arith.constant 0 : i32
    return %c0_i32, %c0_i32_0 : i32, i32
  }
  func.func @transform_4(%arg0: i32) -> (i32, i32) {
    %c0_i32 = arith.constant 0 : i32
    %c0_i32_0 = arith.constant 0 : i32
    %c0_i32_1 = arith.constant 0 : i32
    return %c0_i32, %c0_i32_0 : i32, i32
  }
  func.func @transform_5(%arg0: i32) -> (i32, i32) {
    %c0_i32 = arith.constant 0 : i32
    %c0_i32_0 = arith.constant 0 : i32
    %c0_i32_1 = arith.constant 0 : i32
    return %c0_i32, %c0_i32_0 : i32, i32
  }
  func.func @transform_6(%arg0: i32) -> (i32, i32) {
    %c0_i32 = arith.constant 0 : i32
    %c0_i32_0 = arith.constant 0 : i32
    %c0_i32_1 = arith.constant 0 : i32
    return %c0_i32, %c0_i32_0 : i32, i32
  }
  func.func @transform_7(%arg0: i32) -> (i32, i32) {
    %c0_i32 = arith.constant 0 : i32
    %c0_i32_0 = arith.constant 0 : i32
    %c0_i32_1 = arith.constant 0 : i32
    return %c0_i32, %c0_i32_0 : i32, i32
  }
  func.func @transform_8(%arg0: i32) -> (i32, i32) {
    %c0_i32 = arith.constant 0 : i32
    %c0_i32_0 = arith.constant 0 : i32
    %c0_i32_1 = arith.constant 0 : i32
    return %c0_i32, %c0_i32_0 : i32, i32
  }
  func.func @transform_9(%arg0: i32) -> (i32, i32) {
    %c0_i32 = arith.constant 0 : i32
    %c0_i32_0 = arith.constant 0 : i32
    %c0_i32_1 = arith.constant 0 : i32
    return %c0_i32, %c0_i32_0 : i32, i32
  }
  func.func @transform_10(%arg0: i32) -> (i32, i32, i32) {
    %c0_i32 = arith.constant 0 : i32
    %c0_i32_0 = arith.constant 0 : i32
    %c0_i32_1 = arith.constant 0 : i32
    %c0_i32_2 = arith.constant 0 : i32
    return %c0_i32, %c0_i32_0, %c0_i32_1 : i32, i32, i32
  }
  func.func @transform_11(%arg0: i32) -> (i32, i32) {
    %c0_i32 = arith.constant 0 : i32
    %c0_i32_0 = arith.constant 0 : i32
    %c0_i32_1 = arith.constant 0 : i32
    return %c0_i32, %c0_i32_0 : i32, i32
  }
  func.func @transform_12(%arg0: i32) -> (i32, i32, i32) {
    %c0_i32 = arith.constant 0 : i32
    %c0_i32_0 = arith.constant 0 : i32
    %c0_i32_1 = arith.constant 0 : i32
    %c0_i32_2 = arith.constant 0 : i32
    return %c0_i32, %c0_i32_0, %c0_i32_1 : i32, i32, i32
  }
  func.func @transform_13(%arg0: i32) -> (i32, i32) {
    %c0_i32 = arith.constant 0 : i32
    %c0_i32_0 = arith.constant 0 : i32
    %c0_i32_1 = arith.constant 0 : i32
    return %c0_i32, %c0_i32_0 : i32, i32
  }
  func.func @transform_14(%arg0: i32) -> (i32, i32, i32) {
    %c0_i32 = arith.constant 0 : i32
    %c0_i32_0 = arith.constant 0 : i32
    %c0_i32_1 = arith.constant 0 : i32
    return %arg0, %c0_i32, %c0_i32_0 : i32, i32, i32
  }
  func.func @transform_15(%arg0: i32) -> (i32, i32, i32) {
    %c0_i32 = arith.constant 0 : i32
    %c0_i32_0 = arith.constant 0 : i32
    %c0_i32_1 = arith.constant 0 : i32
    return %arg0, %c0_i32, %c0_i32_0 : i32, i32, i32
  }
}

</mosaic_0001>

<bundles_post_ra>
// kernel: cross_attention.1
= control target key start
LH: loop header
LB: loop body
LE: loop exit
PB: predicated region body
PF: predicated region fallthrough
CT: control target
= control target key end

     0   :  { %s9058_s0 = inlined_call_operand.hbm [shape: f32[4,16,128], index: 0, kind: input, shape index: {}]   ;;  %s9059_s1 = inlined_call_operand.hbm [shape: f32[4,16,128], index: 1, kind: input, shape index: {}]   ;;  %s9060_s2 = inlined_call_operand.vmem [shape: f32[1,128], index: 2, kind: input, shape index: {}]   ;;  %s9061_s3 = inlined_call_operand.vmem [shape: f32[1,128], index: 3, kind: input, shape index: {}]   ;;  %s9062_s4 = inlined_call_operand.vmem [shape: f32[1,128], index: 4, kind: input, shape index: {}]   ;;  %s9063_s5 = inlined_call_operand.vmem [shape: f32[1,128], index: 5, kind: input, shape index: {}]   ;;  %s9064_s6 = inlined_call_operand.hbm [shape: bf16[128,384], index: 6, kind: input, shape index: {}]   ;;  %s9065_s7 = inlined_call_operand.vmem [shape: f32[1,384], index: 7, kind: input, shape index: {}]   ;;  %s9066_s8 = inlined_call_operand.hbm [shape: bf16[128,384], index: 8, kind: input, shape index: {}]   ;;  %s9067_s9 = inlined_call_operand.vmem [shape: f32[1,384], index: 9, kind: input, shape index: {}]   ;;  %s9068_s10 = inlined_call_operand.hbm [shape: bf16[4,32,128], index: 10, kind: input, shape index: {}]   ;;  %s9069_s11 = inlined_call_operand.vmem [shape: f32[1,128], index: 11, kind: input, shape index: {}]   ;;  %s9070_s12 = inlined_call_operand.hbm [shape: bf16[4,32,128], index: 12, kind: input, shape index: {}]   ;;  %s9071_s13 = inlined_call_operand.vmem [shape: f32[1,128], index: 13, kind: input, shape index: {}]   ;;  %s9072_s14 = inlined_call_operand.hbm [shape: f32[4,16,128], index: 14, kind: output, shape index: {0}]   ;;  %s9073_s15 = inlined_call_operand.hbm [shape: f32[4,16,128], index: 15, kind: output, shape index: {1}]  }
   0x1   :  { %9099 = sst [smem:[#allocation63_spill]] %s9073_s15 }
   0x2   :  { %21 = vsyncpa [#allocation3], 0 }
   0x3   :  { %22 = vsyncpa [#allocation6], 0 }
   0x4   :  { %23 = vsyncpa [#allocation9], 0 }
   0x5   :  { %24 = vsyncpa [#allocation12], 0 }
   0x6   :  { %25 = vsyncpa [#allocation4], 0 }
   0x7   :  { %26 = vsyncpa [#allocation15], 0  ;;  %s7336_s18 = smov [#allocation5]   ;;  %s7148_s22 = scalar_lea.hbm %s9059_s1, 1024 }
   0x8   :  { %s44_s19 = sshll.u32 %s7336_s18, 4  ;;  %p7149_p0 = scmp.ne.s32.totalorder %s9059_s1, %s7148_s22  ;;  %s45_s19 = int_to_ptr.vmem [resolvable:$true] %s44_s19 }
   0x9   :  { %p7152_p1 = scmp.lt.u32.totalorder %s7148_s22, %s9059_s1 }
   0xb   :  { %p7154_p2 = pnand %p7152_p1, %p7149_p0 }
   0xd   :  { %7157 = shalt.err (!%p7154_p2)
}
   0xe   :  { %s7158_s27 = scalar_lea.vmem %s45_s19, 1024  ;;  %p7163_p4 = scmp.lt.s32.totalorder %s45_s19, %s45_s19 }
   0xf   :  { %p7159_p3 = scmp.ne.s32.totalorder %s45_s19, %s7158_s27  ;;  %p7164_p5 = scmp.lt.s32.totalorder %s7158_s27, %s7158_s27 }
  0x11   :  { %p7165_p6 = por %p7164_p5, %p7163_p4 }
  0x13   :  { %p7166_p7 = pnand %p7165_p6, %p7159_p3 }
  0x15   :  { %7169 = shalt.err (!%p7166_p7)
}
  0x16   :  { %s7337_s28 = smov 128   ;;  %s7338_s29 = smov 8  }
  0x17   :  { %50 = dma.hbm_to_vmem [thread:$0]  %s9059_s1, 1024, %s45_s19, [#allocation6], %s7337_s28, %s7337_s28, %s7338_s29  }
  0x18   :  { %s7339_s17 = smov [#allocation8]   ;;  %s7340_s20 = smov [#allocation2]  }
  0x19   :  { %s78_s18 = sshll.u32 %s7339_s17, 4  ;;  %s32_s21 = sshll.u32 %s7340_s20, 4  ;;  %s79_s18 = int_to_ptr.vmem [resolvable:$true] %s78_s18  ;;  %s33_s21 = int_to_ptr.vmem [resolvable:$true] %s32_s21 }
  0x1a   :  { %s7170_s24 = scalar_lea.hbm %s9066_s8, 3072 }
  0x1b   :  { %p7171_p8 = scmp.ne.s32.totalorder %s9066_s8, %s7170_s24  ;;  %p7174_p9 = scmp.lt.u32.totalorder %s7170_s24, %s9066_s8 }
  0x1d   :  { %p7176_p10 = pnand %p7174_p9, %p7171_p8 }
  0x1f   :  { %7179 = shalt.err (!%p7176_p10)
}
  0x20   :  { %s7180_s1 = scalar_lea.vmem %s79_s18, 3072  ;;  %p7185_p12 = scmp.lt.s32.totalorder %s79_s18, %s79_s18 }
  0x21   :  { %p7181_p11 = scmp.ne.s32.totalorder %s79_s18, %s7180_s1  ;;  %p7186_p13 = scmp.lt.s32.totalorder %s7180_s1, %s7180_s1 }
  0x23   :  { %p7187_p0 = por %p7186_p13, %p7185_p12 }
  0x25   :  { %p7188_p1 = pnand %p7187_p0, %p7181_p11 }
  0x27   :  { %7191 = shalt.err (!%p7188_p1)
}
  0x28   :  { %s7341_s19 = smov 192   ;;  %s7342_s30 = smov 12  }
  0x29   :  { %84 = dma.hbm_to_vmem [thread:$0]  %s9066_s8, 3072, %s79_s18, [#allocation9], %s7341_s19, %s7341_s19, %s7342_s30  }
  0x2a   :  { %s7192_s22 = scalar_lea.hbm %s9058_s0, 1024 }
  0x2b   :  { %p7193_p2 = scmp.ne.s32.totalorder %s9058_s0, %s7192_s22  ;;  %p7196_p3 = scmp.lt.u32.totalorder %s7192_s22, %s9058_s0 }
  0x2d   :  { %p7198_p4 = pnand %p7196_p3, %p7193_p2 }
  0x2f   :  { %7201 = shalt.err (!%p7198_p4)
}
  0x30   :  { %s7202_s27 = scalar_lea.vmem %s33_s21, 1024  ;;  %p7207_p6 = scmp.lt.s32.totalorder %s33_s21, %s33_s21 }
  0x31   :  { %p7203_p5 = scmp.ne.s32.totalorder %s33_s21, %s7202_s27  ;;  %p7208_p7 = scmp.lt.s32.totalorder %s7202_s27, %s7202_s27 }
  0x33   :  { %p7209_p8 = por %p7208_p7, %p7207_p6 }
  0x35   :  { %p7210_p9 = pnand %p7209_p8, %p7203_p5 }
  0x37   :  { %7213 = shalt.err (!%p7210_p9)
}
  0x38   :  { %38 = dma.hbm_to_vmem [thread:$0]  %s9058_s0, 1024, %s33_s21, [#allocation3], %s7337_s28, %s7337_s28, %s7338_s29  }
  0x39   :  { %s7343_s1 = smov [#allocation7]   ;;  %s7344_s17 = smov [#allocation10]  }
  0x3a   :  { %s64_s16 = sshll.u32 %s7343_s1, 4  ;;  %s92_s15 = sshll.u32 %s7344_s17, 4  ;;  %s65_s16 = int_to_ptr.vmem [resolvable:$true] %s64_s16  ;;  %s93_s15 = int_to_ptr.vmem [resolvable:$true] %s92_s15 }
  0x3b   :  { %s7214_s23 = scalar_lea.hbm %s9064_s6, 3072 }
  0x3c   :  { %p7215_p10 = scmp.ne.s32.totalorder %s9064_s6, %s7214_s23  ;;  %p7218_p11 = scmp.lt.u32.totalorder %s7214_s23, %s9064_s6 }
  0x3e   :  { %p7220_p12 = pnand %p7218_p11, %p7215_p10 }
  0x40   :  { %7223 = shalt.err (!%p7220_p12)
}
  0x41   :  { %s7224_s0 = scalar_lea.vmem %s65_s16, 3072  ;;  %p7229_p0 = scmp.lt.s32.totalorder %s65_s16, %s65_s16 }
  0x42   :  { %p7225_p13 = scmp.ne.s32.totalorder %s65_s16, %s7224_s0  ;;  %p7230_p1 = scmp.lt.s32.totalorder %s7224_s0, %s7224_s0 }
  0x44   :  { %p7231_p2 = por %p7230_p1, %p7229_p0 }
  0x46   :  { %p7232_p3 = pnand %p7231_p2, %p7225_p13 }
  0x48   :  { %7235 = shalt.err (!%p7232_p3)
}
  0x49   :  { %70 = dma.hbm_to_vmem [thread:$0]  %s9064_s6, 3072, %s65_s16, [#allocation6], %s7341_s19, %s7341_s19, %s7342_s30  }
  0x4a   :  { %s7236_s17 = scalar_lea.hbm %s9068_s10, 1024 }
  0x4b   :  { %p7237_p4 = scmp.ne.s32.totalorder %s9068_s10, %s7236_s17  ;;  %p7240_p5 = scmp.lt.u32.totalorder %s7236_s17, %s9068_s10 }
  0x4d   :  { %p7242_p6 = pnand %p7240_p5, %p7237_p4 }
  0x4f   :  { %7245 = shalt.err (!%p7242_p6)
}
  0x50   :  { %s7246_s25 = scalar_lea.vmem %s93_s15, 1024  ;;  %p7251_p8 = scmp.lt.s32.totalorder %s93_s15, %s93_s15 }
  0x51   :  { %p7247_p7 = scmp.ne.s32.totalorder %s93_s15, %s7246_s25  ;;  %p7252_p9 = scmp.lt.s32.totalorder %s7246_s25, %s7246_s25 }
  0x53   :  { %p7253_p10 = por %p7252_p9, %p7251_p8 }
  0x55   :  { %p7254_p11 = pnand %p7253_p10, %p7247_p7 }
  0x57   :  { %7257 = shalt.err (!%p7254_p11)
}
  0x58   :  { %s7345_s6 = smov 64   ;;  %s7346_s19 = smov 4  }
  0x59   :  { %98 = dma.hbm_to_vmem [thread:$0]  %s9068_s10, 1024, %s93_s15, [#allocation9], %s7345_s6, %s7345_s6, %s7346_s19  }
  0x5a   :  { %s7347_s26 = smov [#allocation11]   ;;  %s7258_s8 = scalar_lea.hbm %s9070_s12, 1024 }
  0x5b   :  { %s106_s27 = sshll.u32 %s7347_s26, 4  ;;  %p7259_p12 = scmp.ne.s32.totalorder %s9070_s12, %s7258_s8  ;;  %s107_s27 = int_to_ptr.vmem [resolvable:$true] %s106_s27 }
  0x5c   :  { %p7262_p13 = scmp.lt.u32.totalorder %s7258_s8, %s9070_s12 }
  0x5e   :  { %p7264_p0 = pnand %p7262_p13, %p7259_p12 }
  0x60   :  { %7267 = shalt.err (!%p7264_p0)
}
  0x61   :  { %s7268_s22 = scalar_lea.vmem %s107_s27, 1024  ;;  %p7273_p2 = scmp.lt.s32.totalorder %s107_s27, %s107_s27 }
  0x62   :  { %p7269_p1 = scmp.ne.s32.totalorder %s107_s27, %s7268_s22  ;;  %p7274_p3 = scmp.lt.s32.totalorder %s7268_s22, %s7268_s22 }
  0x64   :  { %p7275_p4 = por %p7274_p3, %p7273_p2 }
  0x66   :  { %p7276_p5 = pnand %p7275_p4, %p7269_p1 }
  0x68   :  { %7279 = shalt.err (!%p7276_p5)
}
  0x69   :  { %112 = dma.hbm_to_vmem [thread:$0]  %s9070_s12, 1024, %s107_s27, [#allocation12], %s7345_s6, %s7345_s6, %s7346_s19  }
  0x6a   :  { %7324 = dma.done.wait [#allocation3], 1024  }
  0x6b   :  { %7325 = vsyncadd [#allocation3], 4294966272 }
  0x6c   :  { %7326 = dma.done.wait [#allocation6], 4096  }
  0x6d   :  { %7327 = vsyncadd [#allocation6], 4294963200 }
  0x6e   :  { %7328 = dma.done.wait [#allocation9], 4096  }
  0x6f   :  { %7329 = vsyncadd [#allocation9], 4294963200 }
  0x70   :  { %7330 = dma.done.wait [#allocation12], 1024  }
  0x71   :  { %7331 = vsyncadd [#allocation12], 4294966272  ;;  %v134_v0 = vld [vmem:[#allocation2] sm:$0xff]  ;;  %v136_v1 = vld [vmem:[#allocation2 + $0x10] sm:$0xff]  ;;  %vm7350_vm0 = vmmov 0   ;;  %vm1241_vm1 = vcmask 261120  }
  0x72   :  { %150 = vadd.xlane.f32.xlu0 %v134_v0  ;;  %154 = vadd.xlane.f32.xlu1 %v136_v1  ;;  %v135_v2 = vld [vmem:[#allocation2 + $0x8] sm:$0xff]  ;;  %v137_v3 = vld [vmem:[#allocation2 + $0x18] sm:$0xff]  ;;  %v138_v4 = vld [vmem:[#allocation2 + $0x20] sm:$0xff]  ;;  %vm2746_vm2 = vcmask 130048   ;;  %s7353_s0 = smov [#allocation13]  }
  0x73   :  { %v139_v5 = vld [vmem:[#allocation2 + $0x28] sm:$0xff]  ;;  %v7523_v6 = vld [vmem:[#allocation2 + $0x30] sm:$0xff]  ;;  %v7525_v7 = vld [vmem:[#allocation2 + $0x38] sm:$0xff]  ;;  %s5772_s21 = sshll.u32 %s7353_s0, 4  ;;  %s5773_s21 = int_to_ptr.vmem [resolvable:$true] %s5772_s21 }
  0x74   :  { %v7527_v8 = vld [vmem:[#allocation5] sm:$0xff]  ;;  %v7529_v9 = vld [vmem:[#allocation5 + $0x8] sm:$0xff]  ;;  %v7533_v10 = vld [vmem:[#allocation5 + $0x10] sm:$0xff]  ;;  %s7280_s18 = scalar_lea.vmem %s5773_s21, 1024  ;;  %p7285_p7 = scmp.lt.s32.totalorder %s5773_s21, %s5773_s21 }
  0x75   :  { %v7535_v11 = vld [vmem:[#allocation5 + $0x18] sm:$0xff]  ;;  %v7539_v12 = vld [vmem:[#allocation5 + $0x20] sm:$0xff]  ;;  %v7541_v13 = vld [vmem:[#allocation5 + $0x28] sm:$0xff]  ;;  %p7281_p6 = scmp.ne.s32.totalorder %s5773_s21, %s7280_s18  ;;  %p7286_p8 = scmp.lt.s32.totalorder %s7280_s18, %s7280_s18 }
  0x76   :  { %152 = vadd.xlane.f32.xlu0 %v135_v2  ;;  %156 = vadd.xlane.f32.xlu1 %v137_v3  ;;  %v7545_v14 = vld [vmem:[#allocation5 + $0x30] sm:$0xff]  ;;  %v7547_v15 = vld [vmem:[#allocation5 + $0x38] sm:$0xff]  ;;  %v6782_v17 = vld [vmem:[#allocation7] ss:$12 sps:$4 sm:$0xff]  }
  0x77   :  { %v6780_v16 = vld [vmem:[#allocation7 + $0x4] ss:$12 sps:$4 sm:$0xff]   ;;  %v6783_v18 = vld [vmem:[#allocation7 + $0x1c] ss:$12 sps:$4 sm:$0xff]   ;;  %p7287_p9 = por %p7286_p8, %p7285_p7 }
  0x78   :  { %v6785_v19 = vld [vmem:[#allocation7 + $0x8] ss:$12 sps:$4 sm:$0xff]   ;;  %572 = vmatprep.subr.bf16.mxu0 %v6780_v16  ;;  %v6786_v20 = vld [vmem:[#allocation7 + $0x18] ss:$12 sps:$4 sm:$0xff]  }
  0x79   :  { %573 = vmatpush1.bf16.msra.mxu0 %v6782_v17  ;;  %6169 = vmatprep.subr.bf16.mxu1 %v6785_v19  ;;  %v6793_v17 = vld [vmem:[#allocation7 + $0x38] ss:$12 sps:$4 sm:$0xff]   ;;  %p7288_p10 = pnand %p7287_p9, %p7281_p6 }
  0x7a   :  { %158 = vadd.xlane.f32.xlu0 %v138_v4  ;;  %160 = vadd.xlane.f32.xlu1 %v139_v5 }
  0x7b   :  { %574 = vmatprep.subr.bf16.mxu0 %v6783_v18  ;;  %6170 = vmatpush3.bf16.msra.mxu1 %v6785_v19  ;;  %v6791_v19 = vld [vmem:[#allocation7 + $0x4c] ss:$12 sps:$4 sm:$0xff]  }
  0x7d   :  { %575 = vmatpush1.bf16.msra.mxu0 %v6786_v20 }
  0x7e   :  { %162 = vadd.xlane.f32.xlu0 %v7523_v6  ;;  %164 = vadd.xlane.f32.xlu1 %v7525_v7 }
  0x82   :  { %273 = vadd.xlane.f32.xlu0 %v7527_v8  ;;  %275 = vadd.xlane.f32.xlu1 %v7529_v9 }
  0x86   :  { %277 = vadd.xlane.f32.xlu0 %v7533_v10  ;;  %279 = vadd.xlane.f32.xlu1 %v7535_v11 }
  0x8a   :  { %281 = vadd.xlane.f32.xlu0 %v7539_v12  ;;  %283 = vadd.xlane.f32.xlu1 %v7541_v13 }
  0x8e   :  { %285 = vadd.xlane.f32.xlu0 %v7545_v14  ;;  %287 = vadd.xlane.f32.xlu1 %v7547_v15 }
  0xff   :  { %v151_v21 = vpop.xlane.xlu0 %150  ;;  %v155_v22 = vpop.xlane.xlu1 %154 }
 0x100   :  { %v167_v23 = vmul.f32 0.0078125, %v151_v21  ;;  %v169_v24 = vmul.f32 0.0078125, %v155_v22  ;;  %v6794_v22 = vld [vmem:[#allocation7 + $0x48] ss:$12 sps:$4 sm:$0xff]  }
 0x102   :  { %v7553_v25 = vsub.f32 %v134_v0, %v167_v23  ;;  %v7555_v26 = vsub.f32 %v136_v1, %v169_v24  ;;  %v6789_v0 = vld [vmem:[#allocation7 + $0x20] ss:$12 sps:$4 sm:$0xff]  }
 0x103   :  { %v153_v27 = vpop.xlane.xlu0 %152  ;;  %v157_v28 = vpop.xlane.xlu1 %156  ;;  %v6787_v1 = vld [vmem:[#allocation7 + $0x34] ss:$12 sps:$4 sm:$0xff]   ;;  %6171 = vmatprep.subr.bf16.mxu1 %v6789_v0 }
 0x104   :  { %v168_v29 = vmul.f32 0.0078125, %v153_v27  ;;  %v183_v30 = vmul.f32 %v7553_v25, %v7553_v25  ;;  %v170_v31 = vmul.f32 0.0078125, %v157_v28  ;;  %v185_v32 = vmul.f32 %v7555_v26, %v7555_v26  ;;  %576 = vmatprep.subr.bf16.mxu0 %v6787_v1  ;;  %6172 = vmatpush3.bf16.msra.mxu1 %v6789_v0  ;;  %v6797_v28 = vld [vmem:[#allocation7 + $0x50] ss:$12 sps:$4 sm:$0xff]  }
 0x105   :  { %6173 = vmatprep.subr.bf16.mxu1 %v6793_v17 }
 0x106   :  { %191 = vadd.xlane.f32.xlu0 %v183_v30  ;;  %v7561_v33 = vsub.f32 %v135_v2, %v168_v29  ;;  %v7563_v34 = vsub.f32 %v137_v3, %v170_v31  ;;  %v6795_v30 = vld [vmem:[#allocation7 + $0x64] ss:$12 sps:$4 sm:$0xff]   ;;  %v6798_v31 = vld [vmem:[#allocation7 + $0x60] ss:$12 sps:$4 sm:$0xff]  }
 0x107   :  { %v159_v35 = vpop.xlane.xlu0 %158  ;;  %v161_v36 = vpop.xlane.xlu1 %160 }
 0x108   :  { %v171_v37 = vmul.f32 0.0078125, %v159_v35  ;;  %v184_v38 = vmul.f32 %v7561_v33, %v7561_v33  ;;  %v172_v39 = vmul.f32 0.0078125, %v161_v36  ;;  %v186_v40 = vmul.f32 %v7563_v34, %v7563_v34  ;;  %6174 = vmatpush3.bf16.msra.mxu1 %v6793_v17  ;;  %v6801_v35 = vld [vmem:[#allocation7 + $0x68] ss:$12 sps:$4 sm:$0xff]  }
 0x109   :  { %6175 = vmatprep.subr.bf16.mxu1 %v6797_v28 }
 0x10a   :  { %195 = vadd.xlane.f32.xlu0 %v185_v32  ;;  %193 = vadd.xlane.f32.xlu1 %v184_v38  ;;  %v7569_v41 = vsub.f32 %v138_v4, %v171_v37  ;;  %v7571_v42 = vsub.f32 %v139_v5, %v172_v39  ;;  %v6790_v5 = vld [vmem:[#allocation7 + $0x30] ss:$12 sps:$4 sm:$0xff]   ;;  %v6802_v37 = vld [vmem:[#allocation7 + $0x78] ss:$12 sps:$4 sm:$0xff]   ;;  %v6803_v38 = vld [vmem:[#allocation7 + $0x94] ss:$12 sps:$4 sm:$0xff]  }
 0x10b   :  { %v163_v43 = vpop.xlane.xlu0 %162  ;;  %v165_v44 = vpop.xlane.xlu1 %164  ;;  %577 = vmatpush1.bf16.msra.mxu0 %v6790_v5  ;;  %v6806_v39 = vld [vmem:[#allocation7 + $0x90] ss:$12 sps:$4 sm:$0xff]  }
 0x10c   :  { %v173_v45 = vmul.f32 0.0078125, %v163_v43  ;;  %v187_v46 = vmul.f32 %v7569_v41, %v7569_v41  ;;  %v174_v47 = vmul.f32 0.0078125, %v165_v44  ;;  %v188_v48 = vmul.f32 %v7571_v42, %v7571_v42  ;;  %578 = vmatprep.subr.bf16.mxu0 %v6791_v19  ;;  %6176 = vmatpush3.bf16.msra.mxu1 %v6797_v28  ;;  %v6807_v43 = vld [vmem:[#allocation7 + $0xac] ss:$12 sps:$4 sm:$0xff]   ;;  %v6810_v44 = vld [vmem:[#allocation7 + $0xa8] ss:$12 sps:$4 sm:$0xff]  }
 0x10d   :  { %6177 = vmatprep.subr.bf16.mxu1 %v6801_v35 }
 0x10e   :  { %197 = vadd.xlane.f32.xlu1 %v186_v40  ;;  %199 = vadd.xlane.f32.xlu0 %v187_v46  ;;  %v7578_v49 = vsub.f32 %v7523_v6, %v173_v45  ;;  %v7581_v50 = vsub.f32 %v7525_v7, %v174_v47  ;;  %v6809_v40 = vld [vmem:[#allocation7 + $0x98] ss:$12 sps:$4 sm:$0xff]   ;;  %v6811_v45 = vld [vmem:[#allocation7 + $0xb0] ss:$12 sps:$4 sm:$0xff]   ;;  %v7348_v47 = vmov 0  }
 0x10f   :  { %v274_v51 = vpop.xlane.xlu0 %273  ;;  %v276_v52 = vpop.xlane.xlu1 %275  ;;  %579 = vmatpush1.bf16.msra.mxu0 %v6794_v22  ;;  %v6814_v46 = vld [vmem:[#allocation8 + $0x4] ss:$12 sps:$4 sm:$0xff]   ;;  %604 = vmatprep.mubr.bf16.mxu0 %v7348_v47 }
 0x110   :  { %v289_v53 = vmul.f32 0.0078125, %v274_v51  ;;  %v189_v54 = vmul.f32 %v7578_v49, %v7578_v49  ;;  %v290_v55 = vmul.f32 0.0078125, %v276_v52  ;;  %v190_v56 = vmul.f32 %v7581_v50, %v7581_v50  ;;  %580 = vmatprep.subr.bf16.mxu0 %v6795_v30  ;;  %6178 = vmatpush3.bf16.msra.mxu1 %v6801_v35 }
 0x112   :  { %201 = vadd.xlane.f32.xlu1 %v188_v48  ;;  %203 = vadd.xlane.f32.xlu0 %v189_v54  ;;  %v7588_v57 = vsub.f32 %v7527_v8, %v289_v53  ;;  %v7591_v58 = vsub.f32 %v7529_v9, %v290_v55  ;;  %v7628_v48 = vld [vmem:[#allocation8 + $0x8] ss:$12 sps:$4 sm:$0xff]  }
 0x113   :  { %v278_v59 = vpop.xlane.xlu0 %277  ;;  %v280_v60 = vpop.xlane.xlu1 %279  ;;  %581 = vmatpush1.bf16.msra.mxu0 %v6798_v31 }
 0x114   :  { %v291_v61 = vmul.f32 0.0078125, %v278_v59  ;;  %v305_v62 = vmul.f32 %v7588_v57, %v7588_v57  ;;  %v292_v63 = vmul.f32 0.0078125, %v280_v60  ;;  %v306_v2 = vmul.f32 %v7591_v58, %v7591_v58 }
 0x116   :  { %205 = vadd.xlane.f32.xlu1 %v190_v56  ;;  %313 = vadd.xlane.f32.xlu0 %v305_v62  ;;  %v7598_v3 = vsub.f32 %v7533_v10, %v291_v61  ;;  %v7601_v4 = vsub.f32 %v7535_v11, %v292_v63 }
 0x117   :  { %v282_v6 = vpop.xlane.xlu0 %281  ;;  %v284_v7 = vpop.xlane.xlu1 %283 }
 0x118   :  { %v293_v8 = vmul.f32 0.0078125, %v282_v6  ;;  %v307_v9 = vmul.f32 %v7598_v3, %v7598_v3  ;;  %v294_v16 = vmul.f32 0.0078125, %v284_v7  ;;  %v308_v10 = vmul.f32 %v7601_v4, %v7601_v4 }
 0x11a   :  { %315 = vadd.xlane.f32.xlu1 %v306_v2  ;;  %317 = vadd.xlane.f32.xlu0 %v307_v9  ;;  %v7608_v11 = vsub.f32 %v7539_v12, %v293_v8  ;;  %v7611_v18 = vsub.f32 %v7541_v13, %v294_v16 }
 0x11b   :  { %v286_v20 = vpop.xlane.xlu0 %285  ;;  %v288_v21 = vpop.xlane.xlu1 %287 }
 0x11c   :  { %v295_v23 = vmul.f32 0.0078125, %v286_v20  ;;  %v309_v24 = vmul.f32 %v7608_v11, %v7608_v11  ;;  %v296_v27 = vmul.f32 0.0078125, %v288_v21  ;;  %v310_v12 = vmul.f32 %v7611_v18, %v7611_v18 }
 0x11e   :  { %319 = vadd.xlane.f32.xlu1 %v308_v10  ;;  %321 = vadd.xlane.f32.xlu0 %v309_v24  ;;  %v7618_v13 = vsub.f32 %v7545_v14, %v295_v23  ;;  %v7621_v29 = vsub.f32 %v7547_v15, %v296_v27  ;;  %v6799_v14 = vld [vmem:[#allocation7 + $0x7c] ss:$12 sps:$4 sm:$0xff]   ;;  %v6805_v15 = vld [vmem:[#allocation7 + $0x80] ss:$12 sps:$4 sm:$0xff]  }
 0x11f   :  { %582 = vmatprep.subr.bf16.mxu0 %v6799_v14  ;;  %6179 = vmatprep.subr.bf16.mxu1 %v6805_v15  ;;  %v7635_v24 = vld [vmem:[%s9060_s2] ss:$0 sm:$0xff] }
 0x120   :  { %v311_v32 = vmul.f32 %v7618_v13, %v7618_v13  ;;  %v312_v36 = vmul.f32 %v7621_v29, %v7621_v29  ;;  %583 = vmatpush1.bf16.msra.mxu0 %v6802_v37  ;;  %6180 = vmatpush3.bf16.msra.mxu1 %v6805_v15 }
 0x121   :  { %584 = vmatprep.subr.bf16.mxu0 %v6803_v38  ;;  %6181 = vmatprep.subr.bf16.mxu1 %v6809_v40 }
 0x122   :  { %323 = vadd.xlane.f32.xlu1 %v310_v12  ;;  %325 = vadd.xlane.f32.xlu0 %v311_v32 }
 0x124   :  { %585 = vmatpush1.bf16.msra.mxu0 %v6806_v39  ;;  %6182 = vmatpush3.bf16.msra.mxu1 %v6809_v40 }
 0x125   :  { %586 = vmatprep.subr.bf16.mxu0 %v6807_v43  ;;  %6183 = vmatprep.subr.bf16.mxu1 %v6811_v45 }
 0x126   :  { %327 = vadd.xlane.f32.xlu1 %v312_v36  ;;  %v7642_v36 = vld [vmem:[%s9061_s3] ss:$0 sm:$0xff] }
 0x128   :  { %587 = vmatpush1.bf16.msra.mxu0 %v6810_v44  ;;  %6184 = vmatpush3.bf16.msra.mxu1 %v6811_v45 }
 0x129   :  { %899 = vmatprep.subr.bf16.mxu0 %v6814_v46  ;;  %6193 = vmatprep.subr.bf16.mxu1 %v7628_v48 }
 0x193   :  { %v192_v51 = vpop.xlane.xlu0 %191 }
 0x194   :  { %v207_v52 = vmul.f32 0.0078125, %v192_v51  ;;  %v6812_v51 = vld [vmem:[#allocation8] ss:$12 sps:$4 sm:$0xff]  }
 0x196   :  { %v215_v53 = vadd.f32 1e-05, %v207_v52 }
 0x197   :  { %v194_v54 = vpop.xlane.xlu1 %193  ;;  %v196_v55 = vpop.xlane.xlu0 %195 }
 0x198   :  { %6860 = vrsqrt.f32 %v215_v53  ;;  %v208_v56 = vmul.f32 0.0078125, %v194_v54  ;;  %v209_v59 = vmul.f32 0.0078125, %v196_v55 }
 0x19a   :  { %v216_v60 = vadd.f32 1e-05, %v208_v56  ;;  %v217_v61 = vadd.f32 1e-05, %v209_v59 }
 0x19b   :  { %v198_v62 = vpop.xlane.xlu1 %197  ;;  %v200_v63 = vpop.xlane.xlu0 %199 }
 0x19c   :  { %6862 = vrsqrt.f32 %v216_v60  ;;  %v210_v0 = vmul.f32 0.0078125, %v198_v62  ;;  %v211_v1 = vmul.f32 0.0078125, %v200_v63 }
 0x19d   :  { %6864 = vrsqrt.f32 %v217_v61 }
 0x19e   :  { %v218_v2 = vadd.f32 1e-05, %v210_v0  ;;  %v219_v5 = vadd.f32 1e-05, %v211_v1  ;;  %v6815_v1 = vld [vmem:[#allocation8 + $0x18] ss:$12 sps:$4 sm:$0xff]  }
 0x19f   :  { %v202_v6 = vpop.xlane.xlu1 %201  ;;  %v204_v7 = vpop.xlane.xlu0 %203 }
 0x1a0   :  { %6866 = vrsqrt.f32 %v218_v2  ;;  %v212_v8 = vmul.f32 0.0078125, %v202_v6  ;;  %v213_v9 = vmul.f32 0.0078125, %v204_v7  ;;  %v6821_v6 = vld [vmem:[#allocation8 + $0x34] ss:$12 sps:$4 sm:$0xff]  }
 0x1a1   :  { %6868 = vrsqrt.f32 %v219_v5  ;;  %v6822_v7 = vld [vmem:[#allocation8 + $0x20] ss:$12 sps:$4 sm:$0xff]  }
 0x1a2   :  { %v6861_v16 = vpop.eup %6860  ;;  %v220_v17 = vadd.f32 1e-05, %v212_v8  ;;  %v221_v10 = vadd.f32 1e-05, %v213_v9 }
 0x1a3   :  { %v206_v19 = vpop.xlane.xlu1 %205  ;;  %v314_v20 = vpop.xlane.xlu0 %313  ;;  %v231_v21 = vmul.f32 %v6861_v16, %v7553_v25 }
 0x1a4   :  { %6870 = vrsqrt.f32 %v220_v17  ;;  %v214_v22 = vmul.f32 0.0078125, %v206_v19  ;;  %v329_v23 = vmul.f32 0.0078125, %v314_v20 }
 0x1a5   :  { %6872 = vrsqrt.f32 %v221_v10  ;;  %v246_v35 = vmul.f32 %v7635_v24, %v231_v21  ;;  %v7666_v21 = vld [vmem:[%s9062_s4] ss:$0 sm:$0xff] }
 0x1a6   :  { %v6863_v27 = vpop.eup %6862  ;;  %v222_v28 = vadd.f32 1e-05, %v214_v22  ;;  %v337_v12 = vadd.f32 1e-05, %v329_v23  ;;  %v6819_v23 = vld [vmem:[#allocation8 + $0x30] ss:$12 sps:$4 sm:$0xff]  }
 0x1a7   :  { %v6865_v30 = vpop.eup %6864  ;;  %v316_v31 = vpop.xlane.xlu1 %315  ;;  %v232_v32 = vmul.f32 %v6863_v27, %v7561_v33  ;;  %v261_v44 = vadd.f32 %v7642_v36, %v246_v35 }
 0x1a8   :  { %6874 = vrsqrt.f32 %v222_v28  ;;  %v330_v25 = vmul.f32 0.0078125, %v316_v31  ;;  %v233_v14 = vmul.f32 %v6865_v30, %v7555_v26  ;;  %v318_v39 = vpop.xlane.xlu0 %317  ;;  %v6817_v26 = vld [vmem:[#allocation8 + $0x1c] ss:$12 sps:$4 sm:$0xff]   ;;  %v6825_v31 = vld [vmem:[#allocation8 + $0x4c] ss:$12 sps:$4 sm:$0xff]  }
 0x1a9   :  { %6876 = vrsqrt.f32 %v337_v12  ;;  %v247_v37 = vmul.f32 %v7635_v24, %v232_v32  ;;  %v331_v16 = vmul.f32 0.0078125, %v318_v39  ;;  %v6826_v32 = vld [vmem:[#allocation8 + $0x38] ss:$12 sps:$4 sm:$0xff]  }
 0x1aa   :  { %v6867_v15 = vpop.eup %6866  ;;  %v338_v38 = vadd.f32 1e-05, %v330_v25  ;;  %v248_v40 = vmul.f32 %v7635_v24, %v233_v14 }
 0x1ab   :  { %v6869_v33 = vpop.eup %6868  ;;  %v320_v43 = vpop.xlane.xlu1 %319  ;;  %v262_v45 = vadd.f32 %v7642_v36, %v247_v37  ;;  %v234_v46 = vmul.f32 %v6867_v15, %v7563_v34  ;;  %v339_v25 = vadd.f32 1e-05, %v331_v16  ;;  %v6843_v16 = vld [vmem:[#allocation8 + $0xb0] ss:$12 sps:$4 sm:$0xff]  }
 0x1ac   :  { %6878 = vrsqrt.f32 %v338_v38  ;;  %v235_v54 = vmul.f32 %v6869_v33, %v7569_v41  ;;  %v263_v56 = vadd.f32 %v7642_v36, %v248_v40  ;;  %v332_v63 = vmul.f32 0.0078125, %v320_v43  ;;  %v322_v0 = vpop.xlane.xlu0 %321  ;;  %v6823_v40 = vld [vmem:[#allocation8 + $0x48] ss:$12 sps:$4 sm:$0xff]   ;;  %v6829_v43 = vld [vmem:[#allocation8 + $0x64] ss:$12 sps:$4 sm:$0xff]  }
 0x1ad   :  { %v269_v52 = vpack.c.bf16 %v262_v45, %v261_v44  ;;  %v249_v53 = vmul.f32 %v7635_v24, %v234_v46  ;;  %v333_v10 = vmul.f32 0.0078125, %v322_v0 }
 0x1ae   :  { %v6871_v55 = vpop.eup %6870  ;;  %v250_v34 = vmul.f32 %v7635_v24, %v235_v54  ;;  %v340_v22 = vadd.f32 1e-05, %v332_v63  ;;  %v6834_v54 = vld [vmem:[#allocation8 + $0x68] ss:$12 sps:$4 sm:$0xff]   ;;  %v6835_v63 = vld [vmem:[#allocation8 + $0x90] ss:$12 sps:$4 sm:$0xff]  }
 0x1af   :  { %v6873_v59 = vpop.eup %6872  ;;  %v324_v60 = vpop.xlane.xlu1 %323  ;;  %605 = vmatmul.mubr.bf16.vlgmr.msra.gmra.mrb[0].mxu0 %v269_v52  ;;  %6185 = vmatprep.mubr.bf16.mxu1 %v269_v52  ;;  %v264_v61 = vadd.f32 %v7642_v36, %v249_v53  ;;  %v236_v62 = vmul.f32 %v6871_v55, %v7571_v42  ;;  %v341_v37 = vadd.f32 1e-05, %v333_v10  ;;  %v6827_v52 = vld [vmem:[#allocation8 + $0x60] ss:$12 sps:$4 sm:$0xff]   ;;  %v6833_v53 = vld [vmem:[#allocation8 + $0x7c] ss:$12 sps:$4 sm:$0xff]  }
 0x1b0   :  { %900 = vmatpush1.bf16.msra.mxu0 %v6812_v51  ;;  %614 = vmatprep.mubr.bf16.mxu0 %v7348_v47  ;;  %v237_v41 = vmul.f32 %v6873_v59, %v7578_v49  ;;  %v334_v2 = vmul.f32 0.0078125, %v324_v60  ;;  %v265_v19 = vadd.f32 %v7642_v36, %v250_v34  ;;  %v326_v15 = vpop.xlane.xlu0 %325  ;;  %6880 = vrsqrt.f32 %v340_v22  ;;  %v6837_v59 = vld [vmem:[#allocation8 + $0x94] ss:$12 sps:$4 sm:$0xff]  }
 0x1b1   :  { %901 = vmatprep.subr.bf16.mxu0 %v6817_v26  ;;  %v270_v5 = vpack.c.bf16 %v264_v61, %v263_v56  ;;  %v251_v8 = vmul.f32 %v7635_v24, %v236_v62  ;;  %v335_v44 = vmul.f32 0.0078125, %v326_v15  ;;  %v6831_v56 = vld [vmem:[#allocation8 + $0x78] ss:$12 sps:$4 sm:$0xff]   ;;  %v6838_v60 = vld [vmem:[#allocation8 + $0x80] ss:$12 sps:$4 sm:$0xff]  }
 0x1b2   :  { %v6875_v9 = vpop.eup %6874  ;;  %v252_v42 = vmul.f32 %v7635_v24, %v237_v41  ;;  %v342_v28 = vadd.f32 1e-05, %v334_v2  ;;  %v6841_v41 = vld [vmem:[#allocation8 + $0xac] ss:$12 sps:$4 sm:$0xff]  }
 0x1b3   :  { %v6877_v17 = vpop.eup %6876  ;;  %6186 = vmatmul.mubr.bf16.vlgmr.msra.gmra.mrb[0].mxu1 %v270_v5  ;;  %v266_v20 = vadd.f32 %v7642_v36, %v251_v8  ;;  %v238_v49 = vmul.f32 %v6875_v9, %v7581_v50  ;;  %v328_v12 = vpop.xlane.xlu1 %327  ;;  %v343_v55 = vadd.f32 1e-05, %v335_v44  ;;  %v6842_v2 = vld [vmem:[#allocation8 + $0x98] ss:$12 sps:$4 sm:$0xff]  }
 0x1b4   :  { %902 = vmatpush1.bf16.msra.mxu0 %v6815_v1  ;;  %6194 = vmatpush3.bf16.msra.mxu1 %v7628_v48  ;;  %v353_v27 = vmul.f32 %v6877_v17, %v7588_v57  ;;  %v267_v14 = vadd.f32 %v7642_v36, %v252_v42  ;;  %v336_v39 = vmul.f32 0.0078125, %v328_v12  ;;  %6882 = vrsqrt.f32 %v342_v28 }
 0x1b5   :  { %903 = vmatprep.subr.bf16.mxu0 %v6821_v6  ;;  %6195 = vmatprep.subr.bf16.mxu1 %v6822_v7  ;;  %v271_v30 = vpack.c.bf16 %v266_v20, %v265_v19  ;;  %v253_v50 = vmul.f32 %v7635_v24, %v238_v49  ;;  %v7678_v24 = vld [vmem:[%s9063_s5] ss:$0 sm:$0xff]  ;;  %6884 = vrsqrt.f32 %v339_v25 }
 0x1b6   :  { %v6879_v35 = vpop.eup %6878  ;;  %v368_v38 = vmul.f32 %v7666_v21, %v353_v27  ;;  %6886 = vrsqrt.f32 %v341_v37  ;;  %v344_v51 = vadd.f32 1e-05, %v336_v39 }
 0x1b7   :  { %615 = vmatmul.mubr.bf16.gmra.mrb[4].mxu0 %v270_v5  ;;  %6189 = vmatprep.mubr.bf16.mxu1 %v271_v30  ;;  %v268_v48 = vadd.f32 %v7642_v36, %v253_v50  ;;  %v354_v57 = vmul.f32 %v6879_v35, %v7591_v58  ;;  %v6830_v36 = vld [vmem:[#allocation8 + $0x50] ss:$12 sps:$4 sm:$0xff]  }
 0x1b8   :  { %904 = vmatpush1.bf16.msra.mxu0 %v6819_v23  ;;  %6196 = vmatpush3.bf16.msra.mxu1 %v6822_v7  ;;  %v383_v45 = vadd.f32 %v7678_v24, %v368_v38  ;;  %6888 = vrsqrt.f32 %v344_v51  ;;  %v6839_v7 = vld [vmem:[#allocation8 + $0xa8] ss:$12 sps:$4 sm:$0xff]  }
 0x1b9   :  { %905 = vmatprep.subr.bf16.mxu0 %v6825_v31  ;;  %6197 = vmatprep.subr.bf16.mxu1 %v6826_v32  ;;  %v272_v33 = vpack.c.bf16 %v268_v48, %v267_v14  ;;  %v369_v58 = vmul.f32 %v7666_v21, %v354_v57  ;;  %6890 = vrsqrt.f32 %v343_v55  ;;  %v9075_v31 = vmov 0.0  }
 0x1ba   :  { %624 = vmatprep.mubr.bf16.mxu0 %v7348_v47  ;;  %v6881_v61 = vpop.eup %6880 }
 0x1bb   :  { %6190 = vmatmul.mubr.bf16.gmra.mrb[4].mxu1 %v272_v33  ;;  %v384_v46 = vadd.f32 %v7678_v24, %v369_v58  ;;  %v356_v1 = vmul.f32 %v6881_v61, %v7601_v4 }
 0x1bc   :  { %906 = vmatpush1.bf16.msra.mxu0 %v6823_v40  ;;  %6198 = vmatpush3.bf16.msra.mxu1 %v6826_v32 }
 0x1bd   :  { %907 = vmatprep.subr.bf16.mxu0 %v6829_v43  ;;  %6199 = vmatprep.subr.bf16.mxu1 %v6830_v36  ;;  %v391_v26 = vpack.c.bf16 %v384_v46, %v383_v45  ;;  %v371_v9 = vmul.f32 %v7666_v21, %v356_v1 }
 0x1be   :  { %v6883_v62 = vpop.eup %6882 }
 0x1bf   :  { %625 = vmatmul.mubr.bf16.gmra.mrb[8].mxu0 %v271_v30  ;;  %6209 = vmatprep.mubr.bf16.mxu1 %v391_v26  ;;  %v6885_v34 = vpop.eup %6884  ;;  %v358_v5 = vmul.f32 %v6883_v62, %v7611_v18 }
 0x1c0   :  { %908 = vmatpush1.bf16.msra.mxu0 %v6827_v52  ;;  %6200 = vmatpush3.bf16.msra.mxu1 %v6830_v36  ;;  %v6887_v0 = vpop.eup %6886  ;;  %v355_v6 = vmul.f32 %v6885_v34, %v7598_v3 }
 0x1c1   :  { %909 = vmatprep.subr.bf16.mxu0 %v6833_v53  ;;  %6201 = vmatprep.subr.bf16.mxu1 %v6834_v54  ;;  %v357_v8 = vmul.f32 %v6887_v0, %v7608_v11  ;;  %v373_v42 = vmul.f32 %v7666_v21, %v358_v5  ;;  %v386_v11 = vadd.f32 %v7678_v24, %v371_v9 }
 0x1c2   :  { %634 = vmatprep.mubr.bf16.mxu0 %v7348_v47  ;;  %v6889_v4 = vpop.eup %6888  ;;  %v370_v18 = vmul.f32 %v7666_v21, %v355_v6 }
 0x1c3   :  { %v6891_v17 = vpop.eup %6890  ;;  %v372_v3 = vmul.f32 %v7666_v21, %v357_v8  ;;  %v360_v10 = vmul.f32 %v6889_v4, %v7621_v29  ;;  %v388_v19 = vadd.f32 %v7678_v24, %v373_v42 }
 0x1c4   :  { %910 = vmatpush1.bf16.msra.mxu0 %v6831_v56  ;;  %6202 = vmatpush3.bf16.msra.mxu1 %v6834_v54  ;;  %v385_v20 = vadd.f32 %v7678_v24, %v370_v18  ;;  %v359_v49 = vmul.f32 %v6891_v17, %v7618_v13 }
 0x1c5   :  { %911 = vmatprep.subr.bf16.mxu0 %v6837_v59  ;;  %6203 = vmatprep.subr.bf16.mxu1 %v6838_v60  ;;  %v387_v22 = vadd.f32 %v7678_v24, %v372_v3  ;;  %v375_v27 = vmul.f32 %v7666_v21, %v360_v10 }
 0x1c6   :  { %v392_v23 = vpack.c.bf16 %v386_v11, %v385_v20  ;;  %v374_v12 = vmul.f32 %v7666_v21, %v359_v49  ;;  %v429_v21 = vlaneseq }
 0x1c7   :  { %635 = vmatmul.mubr.bf16.gmra.mrb[12].mxu0 %v272_v33  ;;  %v393_v28 = vpack.c.bf16 %v388_v19, %v387_v22  ;;  %v390_v29 = vadd.f32 %v7678_v24, %v375_v27 }
 0x1c8   :  { %912 = vmatpush1.bf16.msra.mxu0 %v6835_v63  ;;  %6204 = vmatpush3.bf16.msra.mxu1 %v6838_v60  ;;  %v389_v30 = vadd.f32 %v7678_v24, %v374_v12  ;;  %v7713_v32 = vshrl.u32 %v429_v21, 7 }
 0x1c9   :  { %913 = vmatprep.subr.bf16.mxu0 %v6841_v41  ;;  %6205 = vmatprep.subr.bf16.mxu1 %v6842_v2 }
 0x1ca   :  { %931 = vmatprep.mubr.bf16.mxu0 %v7348_v47  ;;  %v394_v13 = vpack.c.bf16 %v390_v29, %v389_v30  ;;  %v431_v50 = vsub.s32 0, %v7713_v32  ;;  %v435_v35 = vsub.s32 1, %v7713_v32  ;;  %v439_v14 = vsub.s32 2, %v7713_v32 }
 0x1cc   :  { %914 = vmatpush1.bf16.msra.mxu0 %v6839_v7  ;;  %6206 = vmatpush3.bf16.msra.mxu1 %v6842_v2 }
 0x1cd   :  { %6207 = vmatprep.subr.bf16.mxu1 %v6843_v16  ;;  %6229 = vmatprep.subr.bf16.mxu0 %v9075_v31 }
 0x1cf   :  { %932 = vmatmul.mubr.bf16.vlgmr.msra.gmra.mrb[16].mxu0 %v391_v26 }
 0x1d0   :  { %6208 = vmatpush3.bf16.msra.mxu1 %v6843_v16  ;;  %941 = vmatprep.mubr.bf16.mxu0 %v7348_v47 }
 0x1d1   :  { %6217 = vmatprep.subr.bf16.mxu1 %v9075_v31 }
 0x1d3   :  { %6210 = vmatmul.mubr.bf16.vlgmr.msra.gmra.mrb[8].mxu1 %v392_v23 }
 0x1d4   :  { %6213 = vmatprep.mubr.bf16.mxu1 %v393_v28 }
 0x1d7   :  { %942 = vmatmul.mubr.bf16.gmra.mrb[20].mxu0 %v392_v23 }
 0x1d8   :  { %951 = vmatprep.mubr.bf16.mxu0 %v7348_v47 }
 0x1db   :  { %6214 = vmatmul.mubr.bf16.gmra.mrb[12].mxu1 %v394_v13 }
 0x1dc   :  { %6219 = vmatprep.mubr.msk.bf16.mxu1 %vm7350_vm0, %v9075_v31 }
 0x1df   :  { %952 = vmatmul.mubr.bf16.gmra.mrb[24].mxu0 %v393_v28 }
 0x1e0   :  { %961 = vmatprep.mubr.bf16.mxu0 %v7348_v47  ;;  %v427_v47 = vld [vmem:[%s9065_s7] sm:$0x7]  ;;  %s7351_s7 = smov 96  }
 0x1e1   :  { %v7722_v25 = vrot.slane %v427_v47, %v431_v50  ;;  %v7727_v15 = vrot.slane %v427_v47, %v435_v35  ;;  %v440_v24 = vrot.slane %v427_v47, %v439_v14 }
 0x1e7   :  { %962 = vmatmul.mubr.bf16.gmra.mrb[28].mxu0 %v394_v13 }
 0x1e8   :  { %6231 = vmatprep.mubr.msk.bf16.mxu0 %vm7350_vm0, %v9075_v31 }
 0x282   :  { %v606_v37 = vpop.f32.mrb[0].mxu0 }
 0x283   :  { %v608_v48 = vpop.f32.mrb[1].mxu0  ;;  %v607_v38 = vadd.f32 %v606_v37, %v7722_v25 }
 0x284   :  { %v610_v57 = vpop.f32.mrb[2].mxu0  ;;  %v609_v33 = vadd.f32 %v608_v48, %v7727_v15 }
 0x285   :  { %v611_v39 = vadd.f32 %v610_v57, %v7722_v25  ;;  %v612_v40 = vpop.f32.mrb[3].mxu0 }
 0x286   :  { %v613_v43 = vadd.f32 %v612_v40, %v7727_v15  ;;  %v6187_v36 = vpop.f32.mrb[0].mxu1 }
 0x287   :  { %v7735_v58 = vpack.c.bf16 %v611_v39, %v607_v38  ;;  %v679_v44 = vpop.f32.mrb[1].mxu1  ;;  %v688_v51 = vadd.f32 %v6187_v36, %v440_v24  ;;  %v754_v39 = vld [vmem:[%s9067_s9] sm:$0x7]  ;;  %s7352_s9 = smov 32  }
 0x288   :  { %v7737_v45 = vpack.c.bf16 %v613_v43, %v609_v33  ;;  %v6188_v46 = vpop.f32.mrb[2].mxu1  ;;  %v680_v53 = vadd.f32 %v679_v44, %v440_v24  ;;  %v7788_v33 = vrot.slane %v754_v39, %v431_v50 }
 0x289   :  { %v691_v52 = vadd.f32 %v6188_v46, %v440_v24  ;;  %v682_v26 = vpop.f32.mrb[3].mxu1 }
 0x28a   :  { %v683_v54 = vadd.f32 %v682_v26, %v440_v24  ;;  %1113 = vrot.lane.b32.xlu0 %v7737_v45, %s7351_s7  ;;  %v616_v55 = vpop.f32.mrb[4].mxu0  ;;  %v1246_v56 = vsel %vm1241_vm1, %v7737_v45, 0 }
 0x28b   :  { %v7743_v59 = vpack.c.bf16 %v691_v52, %v688_v51  ;;  %v618_v60 = vpop.f32.mrb[5].mxu0  ;;  %6218 = vmatpush3.bf16.xpose.msra.mxu1 %v1246_v56  ;;  %v617_v34 = vadd.f32 %v616_v55, %v7722_v25 }
 0x28c   :  { %v7745_v61 = vpack.c.bf16 %v683_v54, %v680_v53  ;;  %v620_v62 = vpop.f32.mrb[6].mxu0  ;;  %6223 = vmatprep.subr.bf16.mxu1 %v9075_v31  ;;  %v619_v1 = vadd.f32 %v618_v60, %v7727_v15 }
 0x28d   :  { %v621_v63 = vadd.f32 %v620_v62, %v7722_v25  ;;  %v622_v0 = vpop.f32.mrb[7].mxu0 }
 0x28e   :  { %v623_v41 = vadd.f32 %v622_v0, %v7727_v15  ;;  %v6191_v2 = vpop.f32.mrb[4].mxu1 }
 0x28f   :  { %v7752_v5 = vpack.c.bf16 %v621_v63, %v617_v34  ;;  %v695_v6 = vpop.f32.mrb[5].mxu1  ;;  %v704_v9 = vadd.f32 %v6191_v2, %v440_v24 }
 0x290   :  { %v7754_v7 = vpack.c.bf16 %v623_v41, %v619_v1  ;;  %v6192_v8 = vpop.f32.mrb[6].mxu1  ;;  %v696_v42 = vadd.f32 %v695_v6, %v440_v24 }
 0x291   :  { %v707_v16 = vadd.f32 %v6192_v8, %v440_v24  ;;  %v698_v4 = vpop.f32.mrb[7].mxu1 }
 0x292   :  { %v699_v18 = vadd.f32 %v698_v4, %v440_v24  ;;  %1115 = vrot.lane.b32.xlu1 %v7754_v7, %s7351_s7  ;;  %v626_v17 = vpop.f32.mrb[8].mxu0  ;;  %v1293_v34 = vsel %vm1241_vm1, %v7754_v7, 0 }
 0x293   :  { %v7758_v3 = vpack.c.bf16 %v707_v16, %v704_v9  ;;  %v628_v11 = vpop.f32.mrb[9].mxu0  ;;  %v627_v20 = vadd.f32 %v626_v17, %v7722_v25 }
 0x294   :  { %v7760_v10 = vpack.c.bf16 %v699_v18, %v696_v42  ;;  %v630_v19 = vpop.f32.mrb[10].mxu0  ;;  %v629_v23 = vadd.f32 %v628_v11, %v7727_v15 }
 0x295   :  { %v631_v49 = vadd.f32 %v630_v19, %v7722_v25  ;;  %v632_v22 = vpop.f32.mrb[11].mxu0 }
 0x296   :  { %v633_v27 = vadd.f32 %v632_v22, %v7727_v15 }
 0x297   :  { %v7766_v28 = vpack.c.bf16 %v631_v49, %v627_v20 }
 0x298   :  { %v7768_v12 = vpack.c.bf16 %v633_v27, %v629_v23 }
 0x29a   :  { %1117 = vrot.lane.b32.xlu1 %v7768_v12, %s7351_s7  ;;  %v636_v29 = vpop.f32.mrb[12].mxu0  ;;  %v1340_v30 = vsel %vm1241_vm1, %v7768_v12, 0 }
 0x29b   :  { %v638_v13 = vpop.f32.mrb[13].mxu0  ;;  %6230 = vmatpush3.bf16.xpose.msra.mxu0 %v1340_v30  ;;  %v637_v47 = vadd.f32 %v636_v29, %v7722_v25 }
 0x29c   :  { %v640_v21 = vpop.f32.mrb[14].mxu0  ;;  %6241 = vmatprep.subr.bf16.mxu0 %v9075_v31  ;;  %v639_v57 = vadd.f32 %v638_v13, %v7727_v15 }
 0x29d   :  { %v641_v37 = vadd.f32 %v640_v21, %v7722_v25  ;;  %v642_v48 = vpop.f32.mrb[15].mxu0  ;;  %v7792_v25 = vrot.slane %v754_v39, %v435_v35 }
 0x29e   :  { %v643_v38 = vadd.f32 %v642_v48, %v7727_v15  ;;  %v767_v15 = vrot.slane %v754_v39, %v439_v14 }
 0x29f   :  { %v7782_v40 = vpack.c.bf16 %v641_v37, %v637_v47 }
 0x2a0   :  { %v7784_v24 = vpack.c.bf16 %v643_v38, %v639_v57 }
 0x2a2   :  { %v933_v43 = vpop.f32.mrb[16].mxu0  ;;  %v1387_v30 = vsel %vm1241_vm1, %v7784_v24, 0 }
 0x2a3   :  { %v935_v36 = vpop.f32.mrb[17].mxu0  ;;  %v934_v46 = vadd.f32 %v933_v43, %v7788_v33 }
 0x2a4   :  { %v937_v44 = vpop.f32.mrb[18].mxu0  ;;  %v936_v26 = vadd.f32 %v935_v36, %v7792_v25 }
 0x2a5   :  { %v938_v51 = vadd.f32 %v937_v44, %v7788_v33  ;;  %v939_v52 = vpop.f32.mrb[19].mxu0 }
 0x2a6   :  { %v940_v50 = vadd.f32 %v939_v52, %v7792_v25  ;;  %v6211_v53 = vpop.f32.mrb[8].mxu1 }
 0x2a7   :  { %v7800_v54 = vpack.c.bf16 %v938_v51, %v934_v46  ;;  %v1015_v55 = vadd.f32 %v6211_v53, %v767_v15  ;;  %v1006_v35 = vpop.f32.mrb[9].mxu1 }
 0x2a8   :  { %v7802_v56 = vpack.c.bf16 %v940_v50, %v936_v26  ;;  %v1007_v60 = vadd.f32 %v1006_v35, %v767_v15  ;;  %v6212_v32 = vpop.f32.mrb[10].mxu1 }
 0x2a9   :  { %v1018_v14 = vadd.f32 %v6212_v32, %v767_v15  ;;  %v1009_v62 = vpop.f32.mrb[11].mxu1  ;;  %1057 = vrot.lane.b32.xlu1 %v7800_v54, %s7351_s7  ;;  %6220 = vmatmul.mubr.msk.bf16.vlgmr.msra.gmra.mrb[16].mxu1 %vm1241_vm1, %v7800_v54 }
 0x2aa   :  { %v1010_v63 = vadd.f32 %v1009_v62, %v767_v15  ;;  %6224 = vmatpush3.bf16.xpose.msra.mxu1 %v1293_v34  ;;  %v943_v0 = vpop.f32.mrb[20].mxu0  ;;  %6225 = vmatprep.mubr.msk.bf16.mxu1 %vm7350_vm0, %v9075_v31  ;;  %v1434_v46 = vsel %vm1241_vm1, %v7802_v56, 0 }
 0x2ab   :  { %v7812_v1 = vpack.c.bf16 %v1018_v14, %v1015_v55  ;;  %v945_v41 = vpop.f32.mrb[21].mxu0  ;;  %6235 = vmatprep.subr.bf16.mxu1 %v9075_v31  ;;  %v944_v8 = vadd.f32 %v943_v0, %v7788_v33 }
 0x2ac   :  { %v7815_v2 = vpack.c.bf16 %v1010_v63, %v1007_v60  ;;  %v947_v6 = vpop.f32.mrb[22].mxu0  ;;  %v946_v4 = vadd.f32 %v945_v41, %v7792_v25 }
 0x2ad   :  { %9100 = vst [vmem:[#allocation22_spill] sm:$0xff] %v7812_v1  ;;  %v948_v9 = vadd.f32 %v947_v6, %v7788_v33  ;;  %1119 = vrot.lane.b32.xlu1 %v7784_v24, %s7351_s7  ;;  %v949_v16 = vpop.f32.mrb[23].mxu0 }
 0x2ae   :  { %9101 = vst [vmem:[#allocation23_spill] sm:$0xff] %v7815_v2  ;;  %v950_v42 = vadd.f32 %v949_v16, %v7792_v25  ;;  %v6215_v18 = vpop.f32.mrb[12].mxu1 }
 0x2af   :  { %v7823_v17 = vpack.c.bf16 %v948_v9, %v944_v8  ;;  %v1031_v11 = vadd.f32 %v6215_v18, %v767_v15  ;;  %v1022_v19 = vpop.f32.mrb[13].mxu1 }
 0x2b0   :  { %v7825_v20 = vpack.c.bf16 %v950_v42, %v946_v4  ;;  %v1023_v49 = vadd.f32 %v1022_v19, %v767_v15  ;;  %v6216_v22 = vpop.f32.mrb[14].mxu1 }
 0x2b1   :  { %v1034_v23 = vadd.f32 %v6216_v22, %v767_v15  ;;  %v1025_v27 = vpop.f32.mrb[15].mxu1  ;;  %1121 = vrot.lane.b32.xlu1 %v7802_v56, %s7351_s7  ;;  %1059 = vrot.lane.b32.xlu0 %v7823_v17, %s7351_s7 }
 0x2b2   :  { %v1026_v29 = vadd.f32 %v1025_v27, %v767_v15  ;;  %6226 = vmatmul.mubr.msk.bf16.vlgmr.msra.gmra.mrb[20].mxu1 %vm1241_vm1, %v7823_v17  ;;  %v953_v13 = vpop.f32.mrb[24].mxu0 }
 0x2b3   :  { %v7835_v21 = vpack.c.bf16 %v1034_v23, %v1031_v11  ;;  %6236 = vmatpush3.bf16.xpose.msra.mxu1 %v1387_v30  ;;  %v955_v47 = vpop.f32.mrb[25].mxu0  ;;  %6237 = vmatprep.mubr.msk.bf16.mxu1 %vm7350_vm0, %v9075_v31  ;;  %v954_v57 = vadd.f32 %v953_v13, %v7788_v33 }
 0x2b4   :  { %v7839_v37 = vpack.c.bf16 %v1026_v29, %v1023_v49  ;;  %v957_v48 = vpop.f32.mrb[26].mxu0  ;;  %6247 = vmatprep.subr.bf16.mxu1 %v9075_v31  ;;  %v956_v43 = vadd.f32 %v955_v47, %v7792_v25 }
 0x2b5   :  { %9102 = vst [vmem:[#allocation24_spill] sm:$0xff] %v7835_v21  ;;  %v958_v38 = vadd.f32 %v957_v48, %v7788_v33  ;;  %1123 = vrot.lane.b32.xlu1 %v7825_v20, %s7351_s7  ;;  %v959_v39 = vpop.f32.mrb[27].mxu0 }
 0x2b6   :  { %9103 = vst [vmem:[#allocation25_spill] sm:$0xff] %v7839_v37  ;;  %v960_v36 = vadd.f32 %v959_v39, %v7792_v25 }
 0x2b7   :  { %v7848_v15 = vpack.c.bf16 %v958_v38, %v954_v57 }
 0x2b8   :  { %v7850_v44 = vpack.c.bf16 %v960_v36, %v956_v43 }
 0x2b9   :  { %1061 = vrot.lane.b32.xlu0 %v7848_v15, %s7351_s7  ;;  %6232 = vmatmul.mubr.msk.bf16.vlgmr.msra.gmra.mrb[32].mxu0 %vm1241_vm1, %v7848_v15 }
 0x2ba   :  { %6242 = vmatpush3.bf16.xpose.msra.mxu0 %v1434_v46  ;;  %1125 = vrot.lane.b32.xlu1 %v7850_v44, %s7351_s7  ;;  %v963_v51 = vpop.f32.mrb[28].mxu0  ;;  %v1528_v62 = vsel %vm1241_vm1, %v7850_v44, 0 }
 0x2bb   :  { %v965_v52 = vpop.f32.mrb[29].mxu0  ;;  %6243 = vmatprep.mubr.msk.bf16.mxu0 %vm7350_vm0, %v9075_v31  ;;  %6253 = vmatprep.subr.bf16.mxu0 %v9075_v31  ;;  %v964_v50 = vadd.f32 %v963_v51, %v7788_v33 }
 0x2bc   :  { %v967_v26 = vpop.f32.mrb[30].mxu0  ;;  %v966_v35 = vadd.f32 %v965_v52, %v7792_v25 }
 0x2bd   :  { %v968_v53 = vadd.f32 %v967_v26, %v7788_v33  ;;  %v969_v55 = vpop.f32.mrb[31].mxu0  ;;  %v1481_v33 = vsel %vm1241_vm1, %v7825_v20, 0 }
 0x2be   :  { %v970_v60 = vadd.f32 %v969_v55, %v7792_v25 }
 0x2bf   :  { %v1046_v32 = vpack.c.bf16 %v968_v53, %v964_v50 }
 0x2c0   :  { %v1047_v14 = vpack.c.bf16 %v970_v60, %v966_v35 }
 0x2c1   :  { %6244 = vmatmul.mubr.msk.bf16.vlgmr.msra.gmra.mrb[36].mxu0 %vm1241_vm1, %v7735_v58  ;;  %1063 = vrot.lane.b32.xlu0 %v1046_v32, %s7351_s7 }
 0x2c2   :  { %6254 = vmatpush3.bf16.xpose.msra.mxu0 %v1528_v62  ;;  %6238 = vmatmul.mubr.msk.bf16.vlgmr.msra.gmra.mrb[24].mxu1 %vm1241_vm1, %v1046_v32  ;;  %v1575_v25 = vsel %vm1241_vm1, %v1047_v14, 0 }
 0x2c3   :  { %6248 = vmatpush3.bf16.xpose.msra.mxu1 %v1481_v33  ;;  %1127 = vrot.lane.b32.xlu1 %v1047_v14, %s7351_s7 }
 0x2c4   :  { %6249 = vmatprep.mubr.msk.bf16.mxu1 %vm7350_vm0, %v9075_v31  ;;  %6255 = vmatprep.mubr.msk.bf16.mxu0 %vm7350_vm0, %v9075_v31 }
 0x2c5   :  { %1065 = vrot.lane.b32.xlu0 %v7735_v58, %s7351_s7  ;;  %6259 = vmatprep.subr.bf16.mxu1 %v9075_v31 }
 0x2c6   :  { %6265 = vmatprep.subr.bf16.mxu0 %v9075_v31 }
 0x2c7   :  { %1129 = vrot.lane.b32.xlu1 %v7737_v45, %s7345_s6 }
 0x2c9   :  { %6256 = vmatmul.mubr.msk.bf16.vlgmr.msra.gmra.mrb[40].mxu0 %vm1241_vm1, %v7766_v28  ;;  %1067 = vrot.lane.b32.xlu0 %v7752_v5, %s7351_s7 }
 0x2ca   :  { %6250 = vmatmul.mubr.msk.bf16.vlgmr.msra.gmra.mrb[28].mxu1 %vm1241_vm1, %v7752_v5  ;;  %6267 = vmatprep.mubr.msk.bf16.mxu0 %vm7350_vm0, %v9075_v31 }
 0x2cb   :  { %6260 = vmatpush3.bf16.xpose.msra.mxu1 %v1575_v25  ;;  %1131 = vrot.lane.b32.xlu1 %v7754_v7, %s7345_s6 }
 0x2cc   :  { %6261 = vmatprep.mubr.msk.bf16.mxu1 %vm7350_vm0, %v9075_v31  ;;  %6271 = vmatprep.subr.bf16.mxu1 %v9075_v31 }
 0x2cd   :  { %1069 = vrot.lane.b32.xlu0 %v7766_v28, %s7351_s7 }
 0x2cf   :  { %1133 = vrot.lane.b32.xlu1 %v7768_v12, %s7345_s6 }
 0x2d1   :  { %1071 = vrot.lane.b32.xlu0 %v7782_v40, %s7351_s7 }
 0x2d2   :  { %6262 = vmatmul.mubr.msk.bf16.vlgmr.msra.gmra.mrb[32].mxu1 %vm1241_vm1, %v7782_v40 }
 0x2d3   :  { %1135 = vrot.lane.b32.xlu1 %v7784_v24, %s7345_s6  ;;  %6273 = vmatprep.mubr.msk.bf16.mxu1 %vm7350_vm0, %v9075_v31 }
 0x2d5   :  { %1073 = vrot.lane.b32.xlu0 %v7800_v54, %s7345_s6 }
 0x2d7   :  { %1137 = vrot.lane.b32.xlu1 %v7802_v56, %s7345_s6 }
 0x2d9   :  { %1075 = vrot.lane.b32.xlu0 %v7823_v17, %s7345_s6 }
 0x2db   :  { %1139 = vrot.lane.b32.xlu1 %v7825_v20, %s7345_s6 }
 0x2dd   :  { %1077 = vrot.lane.b32.xlu0 %v7848_v15, %s7345_s6 }
 0x2df   :  { %1141 = vrot.lane.b32.xlu1 %v7850_v44, %s7345_s6 }
 0x2e1   :  { %1079 = vrot.lane.b32.xlu0 %v1046_v32, %s7345_s6 }
 0x2e3   :  { %1143 = vrot.lane.b32.xlu1 %v1047_v14, %s7345_s6 }
 0x2e5   :  { %1081 = vrot.lane.b32.xlu0 %v7735_v58, %s7345_s6 }
 0x2e7   :  { %1145 = vrot.lane.b32.xlu1 %v7737_v45, %s7352_s9 }
 0x2e9   :  { %1083 = vrot.lane.b32.xlu0 %v7752_v5, %s7345_s6 }
 0x2eb   :  { %1147 = vrot.lane.b32.xlu1 %v7754_v7, %s7352_s9 }
 0x2ed   :  { %1085 = vrot.lane.b32.xlu0 %v7766_v28, %s7345_s6 }
 0x2ef   :  { %1149 = vrot.lane.b32.xlu1 %v7768_v12, %s7352_s9 }
 0x2f1   :  { %1087 = vrot.lane.b32.xlu0 %v7782_v40, %s7345_s6 }
 0x2f3   :  { %1151 = vrot.lane.b32.xlu1 %v7784_v24, %s7352_s9 }
 0x2f5   :  { %1089 = vrot.lane.b32.xlu0 %v7800_v54, %s7352_s9 }
 0x2f7   :  { %1153 = vrot.lane.b32.xlu1 %v7802_v56, %s7352_s9 }
 0x2f9   :  { %1091 = vrot.lane.b32.xlu0 %v7823_v17, %s7352_s9 }
 0x2fb   :  { %1155 = vrot.lane.b32.xlu1 %v7825_v20, %s7352_s9 }
 0x2fc   :  { %v1114_v45 = vpop.permute.xlu0 %1113 }
 0x2fd   :  { %v1622_v7 = vsel %vm1241_vm1, %v1114_v45, 0  ;;  %1093 = vrot.lane.b32.xlu0 %v7848_v15, %s7352_s9 }
 0x2fe   :  { %6266 = vmatpush3.bf16.xpose.msra.mxu0 %v1622_v7 }
 0x2ff   :  { %1157 = vrot.lane.b32.xlu1 %v7850_v44, %s7352_s9  ;;  %6277 = vmatprep.subr.bf16.mxu0 %v9075_v31 }
 0x301   :  { %1095 = vrot.lane.b32.xlu0 %v1046_v32, %s7352_s9 }
 0x303   :  { %1159 = vrot.lane.b32.xlu1 %v1047_v14, %s7352_s9 }
 0x304   :  { %v1116_v12 = vpop.permute.xlu1 %1115 }
 0x305   :  { %v1669_v24 = vsel %vm1241_vm1, %v1116_v12, 0  ;;  %1097 = vrot.lane.b32.xlu0 %v7735_v58, %s7352_s9 }
 0x306   :  { %6272 = vmatpush3.bf16.xpose.msra.mxu1 %v1669_v24 }
 0x307   :  { %1103 = vrot.lane.b32.xlu1 %v7782_v40, %s7352_s9  ;;  %6283 = vmatprep.subr.bf16.mxu1 %v9075_v31 }
 0x309   :  { %1099 = vrot.lane.b32.xlu0 %v7752_v5, %s7352_s9 }
 0x30b   :  { %1171 = vrot.lane.b32.xlu1 %v7743_v59, %s7351_s7 }
 0x30c   :  { %v1118_v58 = vpop.permute.xlu1 %1117 }
 0x30d   :  { %1101 = vrot.lane.b32.xlu0 %v7766_v28, %s7352_s9  ;;  %v1716_v28 = vsel %vm1241_vm1, %v1118_v58, 0 }
 0x30f   :  { %1175 = vrot.lane.b32.xlu1 %v7758_v3, %s7351_s7 }
 0x311   :  { %1169 = vrot.lane.b32.xlu0 %v7745_v61, %s7351_s7 }
 0x313   :  { %1179 = vrot.lane.b32.xlu1 %v7812_v1, %s7351_s7 }
 0x315   :  { %1173 = vrot.lane.b32.xlu0 %v7760_v10, %s7351_s7 }
 0x317   :  { %1183 = vrot.lane.b32.xlu1 %v7835_v21, %s7351_s7 }
 0x319   :  { %1177 = vrot.lane.b32.xlu0 %v7815_v2, %s7351_s7 }
 0x31b   :  { %1195 = vrot.lane.b32.xlu1 %v7743_v59, %s7345_s6  ;;  %v1058_v5 = vpop.permute.xlu1 %1057 }
 0x31c   :  { %6268 = vmatmul.mubr.msk.bf16.vlgmr.msra.gmra.mrb[44].mxu0 %vm1241_vm1, %v1058_v5 }
 0x31d   :  { %6278 = vmatpush3.bf16.xpose.msra.mxu0 %v1716_v28  ;;  %1181 = vrot.lane.b32.xlu0 %v7839_v37, %s7351_s7 }
 0x31e   :  { %6279 = vmatprep.mubr.msk.bf16.mxu0 %vm7350_vm0, %v9075_v31  ;;  %6289 = vmatprep.subr.bf16.mxu0 %v9075_v31 }
 0x31f   :  { %1199 = vrot.lane.b32.xlu1 %v7758_v3, %s7345_s6  ;;  %v1120_v40 = vpop.permute.xlu1 %1119 }
 0x320   :  { %v1763_v56 = vsel %vm1241_vm1, %v1120_v40, 0 }
 0x321   :  { %1193 = vrot.lane.b32.xlu0 %v7745_v61, %s7345_s6 }
 0x323   :  { %1203 = vrot.lane.b32.xlu1 %v7812_v1, %s7345_s6  ;;  %v1060_v54 = vpop.permute.xlu0 %1059  ;;  %v1122_v34 = vpop.permute.xlu1 %1121 }
 0x324   :  { %6274 = vmatmul.mubr.msk.bf16.vlgmr.msra.gmra.mrb[36].mxu1 %vm1241_vm1, %v1060_v54  ;;  %v1810_v41 = vsel %vm1241_vm1, %v1122_v34, 0 }
 0x325   :  { %6284 = vmatpush3.bf16.xpose.msra.mxu1 %v1763_v56  ;;  %1197 = vrot.lane.b32.xlu0 %v7760_v10, %s7345_s6 }
 0x326   :  { %6285 = vmatprep.mubr.msk.bf16.mxu1 %vm7350_vm0, %v9075_v31  ;;  %6295 = vmatprep.subr.bf16.mxu1 %v9075_v31 }
 0x327   :  { %1207 = vrot.lane.b32.xlu1 %v7835_v21, %s7345_s6  ;;  %v1124_v63 = vpop.permute.xlu1 %1123 }
 0x328   :  { %v1857_v9 = vsel %vm1241_vm1, %v1124_v63, 0 }
 0x329   :  { %1201 = vrot.lane.b32.xlu0 %v7815_v2, %s7345_s6 }
 0x32b   :  { %1219 = vrot.lane.b32.xlu1 %v7743_v59, %s7352_s9  ;;  %v1062_v0 = vpop.permute.xlu0 %1061 }
 0x32c   :  { %6280 = vmatmul.mubr.msk.bf16.vlgmr.msra.gmra.mrb[48].mxu0 %vm1241_vm1, %v1062_v0  ;;  %v1126_v6 = vpop.permute.xlu1 %1125 }
 0x32d   :  { %6290 = vmatpush3.bf16.xpose.msra.mxu0 %v1810_v41  ;;  %1205 = vrot.lane.b32.xlu0 %v7839_v37, %s7345_s6  ;;  %v1904_v42 = vsel %vm1241_vm1, %v1126_v6, 0 }
 0x32e   :  { %6291 = vmatprep.mubr.msk.bf16.mxu0 %vm7350_vm0, %v9075_v31  ;;  %6301 = vmatprep.subr.bf16.mxu0 %v9075_v31 }
 0x32f   :  { %1221 = vrot.lane.b32.xlu1 %v7760_v10, %s7352_s9 }
 0x331   :  { %1217 = vrot.lane.b32.xlu0 %v7745_v61, %s7352_s9 }
 0x333   :  { %1223 = vrot.lane.b32.xlu1 %v7758_v3, %s7352_s9  ;;  %v1064_v8 = vpop.permute.xlu0 %1063 }
 0x334   :  { %6286 = vmatmul.mubr.msk.bf16.vlgmr.msra.gmra.mrb[40].mxu1 %vm1241_vm1, %v1064_v8 }
 0x335   :  { %v1128_v16 = vpop.permute.xlu1 %1127  ;;  %6296 = vmatpush3.bf16.xpose.msra.mxu1 %v1857_v9  ;;  %1225 = vrot.lane.b32.xlu0 %v7815_v2, %s7352_s9 }
 0x336   :  { %6297 = vmatprep.mubr.msk.bf16.mxu1 %vm7350_vm0, %v9075_v31  ;;  %6307 = vmatprep.subr.bf16.mxu1 %v9075_v31  ;;  %v1951_v11 = vsel %vm1241_vm1, %v1128_v16, 0 }
 0x337   :  { %1227 = vrot.lane.b32.xlu1 %v7812_v1, %s7352_s9  ;;  %v1066_v4 = vpop.permute.xlu0 %1065 }
 0x338   :  { %6292 = vmatmul.mubr.msk.bf16.vlgmr.msra.gmra.mrb[52].mxu0 %vm1241_vm1, %v1066_v4 }
 0x339   :  { %v1130_v18 = vpop.permute.xlu1 %1129  ;;  %6302 = vmatpush3.bf16.xpose.msra.mxu0 %v1904_v42  ;;  %6303 = vmatprep.mubr.msk.bf16.mxu0 %vm7350_vm0, %v9075_v31 }
 0x33a   :  { %6313 = vmatprep.subr.bf16.mxu0 %v9075_v31  ;;  %v1998_v49 = vsel %vm1241_vm1, %v1130_v18, 0 }
 0x33b   :  { %v1068_v17 = vpop.permute.xlu0 %1067 }
 0x33c   :  { %6298 = vmatmul.mubr.msk.bf16.vlgmr.msra.gmra.mrb[44].mxu1 %vm1241_vm1, %v1068_v17 }
 0x33d   :  { %v1132_v19 = vpop.permute.xlu1 %1131  ;;  %6308 = vmatpush3.bf16.xpose.msra.mxu1 %v1951_v11  ;;  %6309 = vmatprep.mubr.msk.bf16.mxu1 %vm7350_vm0, %v9075_v31 }
 0x33e   :  { %6319 = vmatprep.subr.bf16.mxu1 %v9075_v31  ;;  %v2045_v27 = vsel %vm1241_vm1, %v1132_v19, 0 }
 0x33f   :  { %v1070_v20 = vpop.permute.xlu0 %1069 }
 0x340   :  { %6304 = vmatmul.mubr.msk.bf16.vlgmr.msra.gmra.mrb[56].mxu0 %vm1241_vm1, %v1070_v20 }
 0x341   :  { %v1134_v22 = vpop.permute.xlu1 %1133  ;;  %6314 = vmatpush3.bf16.xpose.msra.mxu0 %v1998_v49  ;;  %6315 = vmatprep.mubr.msk.bf16.mxu0 %vm7350_vm0, %v9075_v31 }
 0x342   :  { %6325 = vmatprep.subr.bf16.mxu0 %v9075_v31  ;;  %v2092_v13 = vsel %vm1241_vm1, %v1134_v22, 0 }
 0x343   :  { %v1072_v23 = vpop.permute.xlu0 %1071 }
 0x344   :  { %6310 = vmatmul.mubr.msk.bf16.vlgmr.msra.gmra.mrb[48].mxu1 %vm1241_vm1, %v1072_v23 }
 0x345   :  { %v1136_v29 = vpop.permute.xlu1 %1135  ;;  %6320 = vmatpush3.bf16.xpose.msra.mxu1 %v2045_v27  ;;  %6321 = vmatprep.mubr.msk.bf16.mxu1 %vm7350_vm0, %v9075_v31 }
 0x346   :  { %6331 = vmatprep.subr.bf16.mxu1 %v9075_v31  ;;  %v2139_v57 = vsel %vm1241_vm1, %v1136_v29, 0 }
 0x347   :  { %v1074_v30 = vpop.permute.xlu0 %1073 }
 0x348   :  { %6316 = vmatmul.mubr.msk.bf16.vlgmr.msra.gmra.mrb[60].mxu0 %vm1241_vm1, %v1074_v30 }
 0x349   :  { %v1138_v47 = vpop.permute.xlu1 %1137  ;;  %6326 = vmatpush3.bf16.xpose.msra.mxu0 %v2092_v13  ;;  %6327 = vmatprep.mubr.msk.bf16.mxu0 %vm7350_vm0, %v9075_v31 }
 0x34a   :  { %6337 = vmatprep.subr.bf16.mxu0 %v9075_v31  ;;  %v2186_v43 = vsel %vm1241_vm1, %v1138_v47, 0 }
 0x34b   :  { %v1076_v48 = vpop.permute.xlu0 %1075 }
 0x34c   :  { %6322 = vmatmul.mubr.msk.bf16.vlgmr.msra.gmra.mrb[52].mxu1 %vm1241_vm1, %v1076_v48 }
 0x34d   :  { %v1140_v38 = vpop.permute.xlu1 %1139  ;;  %6332 = vmatpush3.bf16.xpose.msra.mxu1 %v2139_v57  ;;  %6333 = vmatprep.mubr.msk.bf16.mxu1 %vm7350_vm0, %v9075_v31 }
 0x34e   :  { %6343 = vmatprep.subr.bf16.mxu1 %v9075_v31  ;;  %v2233_v44 = vsel %vm1241_vm1, %v1140_v38, 0 }
 0x34f   :  { %v1078_v39 = vpop.permute.xlu0 %1077 }
 0x350   :  { %6328 = vmatmul.mubr.msk.bf16.vlgmr.msra.gmra.mrb[64].mxu0 %vm1241_vm1, %v1078_v39 }
 0x351   :  { %v1142_v36 = vpop.permute.xlu1 %1141  ;;  %6338 = vmatpush3.bf16.xpose.msra.mxu0 %v2186_v43  ;;  %6339 = vmatprep.mubr.msk.bf16.mxu0 %vm7350_vm0, %v9075_v31 }
 0x352   :  { %6349 = vmatprep.subr.bf16.mxu0 %v9075_v31  ;;  %v2280_v52 = vsel %vm1241_vm1, %v1142_v36, 0 }
 0x353   :  { %v1080_v15 = vpop.permute.xlu0 %1079 }
 0x354   :  { %6334 = vmatmul.mubr.msk.bf16.vlgmr.msra.gmra.mrb[56].mxu1 %vm1241_vm1, %v1080_v15 }
 0x355   :  { %v1144_v46 = vpop.permute.xlu1 %1143  ;;  %6344 = vmatpush3.bf16.xpose.msra.mxu1 %v2233_v44  ;;  %6345 = vmatprep.mubr.msk.bf16.mxu1 %vm7350_vm0, %v9075_v31 }
 0x356   :  { %6355 = vmatprep.subr.bf16.mxu1 %v9075_v31  ;;  %v2327_v53 = vsel %vm1241_vm1, %v1144_v46, 0 }
 0x357   :  { %v1082_v51 = vpop.permute.xlu0 %1081 }
 0x358   :  { %6340 = vmatmul.mubr.msk.bf16.vlgmr.msra.gmra.mrb[68].mxu0 %vm1241_vm1, %v1082_v51 }
 0x359   :  { %v1146_v26 = vpop.permute.xlu1 %1145  ;;  %6350 = vmatpush3.bf16.xpose.msra.mxu0 %v2280_v52  ;;  %6351 = vmatprep.mubr.msk.bf16.mxu0 %vm7350_vm0, %v9075_v31 }
 0x35a   :  { %6361 = vmatprep.subr.bf16.mxu0 %v9075_v31  ;;  %v2374_v60 = vsel %vm1241_vm1, %v1146_v26, 0 }
 0x35b   :  { %v1084_v50 = vpop.permute.xlu0 %1083 }
 0x35c   :  { %6346 = vmatmul.mubr.msk.bf16.vlgmr.msra.gmra.mrb[60].mxu1 %vm1241_vm1, %v1084_v50 }
 0x35d   :  { %v1148_v55 = vpop.permute.xlu1 %1147  ;;  %6356 = vmatpush3.bf16.xpose.msra.mxu1 %v2327_v53  ;;  %6357 = vmatprep.mubr.msk.bf16.mxu1 %vm7350_vm0, %v9075_v31 }
 0x35e   :  { %6367 = vmatprep.subr.bf16.mxu1 %v9075_v31  ;;  %v2421_v62 = vsel %vm1241_vm1, %v1148_v55, 0 }
 0x35f   :  { %v1086_v35 = vpop.permute.xlu0 %1085 }
 0x360   :  { %6352 = vmatmul.mubr.msk.bf16.vlgmr.msra.gmra.mrb[72].mxu0 %vm1241_vm1, %v1086_v35 }
 0x361   :  { %v1150_v32 = vpop.permute.xlu1 %1149  ;;  %6362 = vmatpush3.bf16.xpose.msra.mxu0 %v2374_v60  ;;  %6363 = vmatprep.mubr.msk.bf16.mxu0 %vm7350_vm0, %v9075_v31 }
 0x362   :  { %6373 = vmatprep.subr.bf16.mxu0 %v9075_v31  ;;  %v2468_v45 = vsel %vm1241_vm1, %v1150_v32, 0 }
 0x363   :  { %v1088_v14 = vpop.permute.xlu0 %1087 }
 0x364   :  { %6358 = vmatmul.mubr.msk.bf16.vlgmr.msra.gmra.mrb[64].mxu1 %vm1241_vm1, %v1088_v14 }
 0x365   :  { %v1152_v33 = vpop.permute.xlu1 %1151  ;;  %6368 = vmatpush3.bf16.xpose.msra.mxu1 %v2421_v62  ;;  %6369 = vmatprep.mubr.msk.bf16.mxu1 %vm7350_vm0, %v9075_v31 }
 0x366   :  { %6379 = vmatprep.subr.bf16.mxu1 %v9075_v31  ;;  %v2515_v24 = vsel %vm1241_vm1, %v1152_v33, 0 }
 0x367   :  { %v1090_v25 = vpop.permute.xlu0 %1089 }
 0x368   :  { %6364 = vmatmul.mubr.msk.bf16.vlgmr.msra.gmra.mrb[76].mxu0 %vm1241_vm1, %v1090_v25 }
 0x369   :  { %v1154_v7 = vpop.permute.xlu1 %1153  ;;  %6374 = vmatpush3.bf16.xpose.msra.mxu0 %v2468_v45  ;;  %6375 = vmatprep.mubr.msk.bf16.mxu0 %vm7350_vm0, %v9075_v31 }
 0x36a   :  { %6385 = vmatprep.subr.bf16.mxu0 %v9075_v31  ;;  %v2562_v28 = vsel %vm1241_vm1, %v1154_v7, 0 }
 0x36b   :  { %v1092_v12 = vpop.permute.xlu0 %1091 }
 0x36c   :  { %6370 = vmatmul.mubr.msk.bf16.vlgmr.msra.gmra.mrb[68].mxu1 %vm1241_vm1, %v1092_v12 }
 0x36d   :  { %v1156_v58 = vpop.permute.xlu1 %1155  ;;  %6380 = vmatpush3.bf16.xpose.msra.mxu1 %v2515_v24  ;;  %6381 = vmatprep.mubr.msk.bf16.mxu1 %vm7350_vm0, %v9075_v31 }
 0x36e   :  { %6391 = vmatprep.subr.bf16.mxu1 %v9075_v31  ;;  %v2609_v56 = vsel %vm1241_vm1, %v1156_v58, 0 }
 0x36f   :  { %v1094_v5 = vpop.permute.xlu0 %1093 }
 0x370   :  { %6376 = vmatmul.mubr.msk.bf16.vlgmr.msra.gmra.mrb[80].mxu0 %vm1241_vm1, %v1094_v5 }
 0x371   :  { %6386 = vmatpush3.bf16.xpose.msra.mxu0 %v2562_v28  ;;  %6387 = vmatprep.mubr.msk.bf16.mxu0 %vm7350_vm0, %v9075_v31  ;;  %v1158_v40 = vpop.permute.xlu1 %1157 }
 0x372   :  { %6397 = vmatprep.subr.bf16.mxu0 %v9075_v31  ;;  %v2656_v63 = vsel %vm1241_vm1, %v1158_v40, 0 }
 0x373   :  { %v1096_v54 = vpop.permute.xlu0 %1095 }
 0x374   :  { %6382 = vmatmul.mubr.msk.bf16.vlgmr.msra.gmra.mrb[72].mxu1 %vm1241_vm1, %v1096_v54 }
 0x375   :  { %6392 = vmatpush3.bf16.xpose.msra.mxu1 %v2609_v56  ;;  %6393 = vmatprep.mubr.msk.bf16.mxu1 %vm7350_vm0, %v9075_v31  ;;  %v1160_v0 = vpop.permute.xlu1 %1159 }
 0x376   :  { %6403 = vmatprep.subr.bf16.mxu1 %v9075_v31  ;;  %v2703_v6 = vsel %vm1241_vm1, %v1160_v0, 0 }
 0x377   :  { %v1098_v34 = vpop.permute.xlu0 %1097 }
 0x378   :  { %6388 = vmatmul.mubr.msk.bf16.vlgmr.msra.gmra.mrb[84].mxu0 %vm1241_vm1, %v1098_v34 }
 0x379   :  { %6398 = vmatpush3.bf16.xpose.msra.mxu0 %v2656_v63  ;;  %6399 = vmatprep.mubr.msk.bf16.mxu0 %vm7350_vm0, %v9075_v31  ;;  %v1104_v11 = vpop.permute.xlu1 %1103 }
 0x37a   :  { %6409 = vmatprep.subr.bf16.mxu0 %v9075_v31 }
 0x37b   :  { %v1100_v41 = vpop.permute.xlu0 %1099 }
 0x37c   :  { %v8118_v8 = vpop.f32.mrb[16].mxu1  ;;  %6394 = vmatmul.mubr.msk.bf16.vlgmr.msra.gmra.mrb[76].mxu1 %vm1241_vm1, %v1100_v41 }
 0x37d   :  { %6404 = vmatpush3.bf16.xpose.msra.mxu1 %v2703_v6  ;;  %v6221_v9 = vpop.f32.mrb[17].mxu1  ;;  %v2747_v16 = vsel %vm2746_vm2, %v8118_v8, -inf  ;;  %6405 = vmatprep.mubr.msk.bf16.mxu1 %vm7350_vm0, %v9075_v31  ;;  %v8196_v54 = vpop.permute.xlu1 %1171 }
 0x37e   :  { %v8125_v4 = vpop.f32.mrb[18].mxu1  ;;  %2748 = vmax.xlane.f32.xlu0 %v2747_v16  ;;  %6415 = vmatprep.subr.bf16.mxu1 %v9075_v31  ;;  %9104 = vst [vmem:[#allocation26_spill] sm:$0xff] %v8196_v54 }
 0x37f   :  { %v6222_v42 = vpop.f32.mrb[19].mxu1  ;;  %v1102_v18 = vpop.permute.xlu0 %1101  ;;  %v2750_v17 = vsel %vm2746_vm2, %v8125_v4, -inf }
 0x380   :  { %2751 = vmax.xlane.f32.xlu1 %v2750_v17  ;;  %6400 = vmatmul.mubr.msk.bf16.vlgmr.msra.gmra.mrb[88].mxu0 %vm1241_vm1, %v1102_v18 }
 0x381   :  { %6410 = vmatpush3.bf16.msra.mxu0 %v7745_v61  ;;  %6411 = vmatprep.mubr.msk.bf16.mxu0 %vm7350_vm0, %v9075_v31  ;;  %v8198_v56 = vpop.permute.xlu1 %1175 }
 0x382   :  { %6421 = vmatprep.subr.bf16.mxu0 %v9075_v31  ;;  %9105 = vst [vmem:[#allocation27_spill] sm:$0xff] %v8198_v56 }
 0x383   :  { %v8200_v34 = vpop.permute.xlu0 %1169 }
 0x384   :  { %6406 = vmatmul.mubr.msk.bf16.vlgmr.msra.gmra.mrb[80].mxu1 %vm1241_vm1, %v1104_v11  ;;  %9106 = vst [vmem:[#allocation28_spill] sm:$0xff] %v8200_v34 }
 0x385   :  { %v8136_v19 = vpop.f32.mrb[20].mxu1  ;;  %6416 = vmatpush3.bf16.msra.mxu1 %v7743_v59  ;;  %6417 = vmatprep.mubr.msk.bf16.mxu1 %vm7350_vm0, %v9075_v31  ;;  %v8202_v63 = vpop.permute.xlu1 %1179 }
 0x386   :  { %v6227_v20 = vpop.f32.mrb[21].mxu1  ;;  %v2753_v49 = vsel %vm2746_vm2, %v8136_v19, -inf  ;;  %6427 = vmatprep.subr.bf16.mxu1 %v9075_v31  ;;  %9107 = vst [vmem:[#allocation29_spill] sm:$0xff] %v8202_v63 }
 0x387   :  { %v8144_v61 = vpop.f32.mrb[22].mxu1  ;;  %2754 = vmax.xlane.f32.xlu0 %v2753_v49  ;;  %v8204_v0 = vpop.permute.xlu0 %1173 }
 0x388   :  { %v6228_v22 = vpop.f32.mrb[23].mxu1  ;;  %v2756_v23 = vsel %vm2746_vm2, %v8144_v61, -inf  ;;  %9108 = vst [vmem:[#allocation30_spill] sm:$0xff] %v8204_v0 }
 0x389   :  { %v8206_v41 = vpop.permute.xlu1 %1183 }
 0x38a   :  { %9109 = vst [vmem:[#allocation31_spill] sm:$0xff] %v8206_v41 }
 0x38b   :  { %2757 = vmax.xlane.f32.xlu0 %v2756_v23  ;;  %v8208_v6 = vpop.permute.xlu0 %1177 }
 0x38c   :  { %v8148_v27 = vpop.f32.mrb[32].mxu0  ;;  %9110 = vst [vmem:[#allocation32_spill] sm:$0xff] %v8208_v6 }
 0x38d   :  { %v6233_v59 = vpop.f32.mrb[33].mxu0  ;;  %v2759_v29 = vsel %vm2746_vm2, %v8148_v27, -inf  ;;  %v8210_v9 = vpop.permute.xlu1 %1195 }
 0x38e   :  { %v8152_v30 = vpop.f32.mrb[34].mxu0  ;;  %9111 = vst [vmem:[#allocation33_spill] sm:$0xff] %v8210_v9 }
 0x38f   :  { %2760 = vmax.xlane.f32.xlu0 %v2759_v29  ;;  %v6234_v13 = vpop.f32.mrb[35].mxu0  ;;  %v2762_v47 = vsel %vm2746_vm2, %v8152_v30, -inf  ;;  %v8212_v16 = vpop.permute.xlu0 %1181 }
 0x390   :  { %2763 = vmax.xlane.f32.xlu1 %v2762_v47  ;;  %9112 = vst [vmem:[#allocation34_spill] sm:$0xff] %v8212_v16 }
 0x391   :  { %v8214_v42 = vpop.permute.xlu1 %1199 }
 0x392   :  { %9113 = vst [vmem:[#allocation35_spill] sm:$0xff] %v8214_v42 }
 0x393   :  { %v8216_v18 = vpop.permute.xlu0 %1193 }
 0x394   :  { %v8156_v48 = vpop.f32.mrb[36].mxu0  ;;  %9114 = vst [vmem:[#allocation36_spill] sm:$0xff] %v8216_v18 }
 0x395   :  { %v8158_v57 = vpop.f32.mrb[24].mxu1  ;;  %v6245_v39 = vpop.f32.mrb[37].mxu0  ;;  %v2771_v52 = vsel %vm2746_vm2, %v8156_v48, -inf }
 0x396   :  { %v6239_v38 = vpop.f32.mrb[25].mxu1  ;;  %v2765_v43 = vsel %vm2746_vm2, %v8158_v57, -inf  ;;  %v8162_v36 = vpop.f32.mrb[38].mxu0 }
 0x397   :  { %2766 = vmax.xlane.f32.xlu0 %v2765_v43  ;;  %v8164_v15 = vpop.f32.mrb[26].mxu1  ;;  %v6246_v46 = vpop.f32.mrb[39].mxu0  ;;  %v2774_v50 = vsel %vm2746_vm2, %v8162_v36, -inf }
 0x398   :  { %v6240_v44 = vpop.f32.mrb[27].mxu1  ;;  %v2768_v51 = vsel %vm2746_vm2, %v8164_v15, -inf  ;;  %v8218_v17 = vpop.permute.xlu1 %1203 }
 0x399   :  { %2769 = vmax.xlane.f32.xlu1 %v2768_v51  ;;  %9115 = vst [vmem:[#allocation37_spill] sm:$0xff] %v8218_v17  ;;  %v8220_v11 = vpop.permute.xlu0 %1197 }
 0x39a   :  { %9116 = vst [vmem:[#allocation38_spill] sm:$0xff] %v8220_v11 }
 0x39b   :  { %2772 = vmax.xlane.f32.xlu0 %v2771_v52 }
 0x39c   :  { %v8170_v26 = vpop.f32.mrb[40].mxu0  ;;  %v8226_v23 = vpop.permute.xlu1 %1207 }
 0x39d   :  { %2775 = vmax.xlane.f32.xlu1 %v2774_v50  ;;  %v8174_v53 = vpop.f32.mrb[28].mxu1  ;;  %v6257_v55 = vpop.f32.mrb[41].mxu0  ;;  %v2783_v45 = vsel %vm2746_vm2, %v8170_v26, -inf  ;;  %9117 = vst [vmem:[#allocation39_spill] sm:$0xff] %v8226_v23 }
 0x39e   :  { %v6251_v35 = vpop.f32.mrb[29].mxu1  ;;  %v8176_v60 = vpop.f32.mrb[42].mxu0  ;;  %v2777_v32 = vsel %vm2746_vm2, %v8174_v53, -inf }
 0x39f   :  { %2778 = vmax.xlane.f32.xlu0 %v2777_v32  ;;  %v8180_v14 = vpop.f32.mrb[30].mxu1  ;;  %v6258_v62 = vpop.f32.mrb[43].mxu0  ;;  %v2786_v7 = vsel %vm2746_vm2, %v8176_v60, -inf }
 0x3a0   :  { %v6252_v33 = vpop.f32.mrb[31].mxu1  ;;  %v2780_v25 = vsel %vm2746_vm2, %v8180_v14, -inf  ;;  %v8232_v47 = vpop.permute.xlu0 %1201 }
 0x3a1   :  { %2781 = vmax.xlane.f32.xlu1 %v2780_v25  ;;  %9118 = vst [vmem:[#allocation40_spill] sm:$0xff] %v8232_v47  ;;  %v8234_v38 = vpop.permute.xlu1 %1219 }
 0x3a2   :  { %9119 = vst [vmem:[#allocation41_spill] sm:$0xff] %v8234_v38 }
 0x3a3   :  { %2784 = vmax.xlane.f32.xlu0 %v2783_v45 }
 0x3a4   :  { %v8244_v50 = vpop.permute.xlu0 %1205 }
 0x3a5   :  { %v8188_v12 = vpop.f32.mrb[32].mxu1  ;;  %2787 = vmax.xlane.f32.xlu1 %v2786_v7  ;;  %9120 = vst [vmem:[#allocation42_spill] sm:$0xff] %v8244_v50  ;;  %v8246_v55 = vpop.permute.xlu1 %1221 }
 0x3a6   :  { %v6263_v24 = vpop.f32.mrb[33].mxu1  ;;  %v2789_v58 = vsel %vm2746_vm2, %v8188_v12, -inf  ;;  %9121 = vst [vmem:[#allocation43_spill] sm:$0xff] %v8246_v55 }
 0x3a7   :  { %v8192_v5 = vpop.f32.mrb[34].mxu1  ;;  %2790 = vmax.xlane.f32.xlu0 %v2789_v58 }
 0x3a8   :  { %v6264_v28 = vpop.f32.mrb[35].mxu1  ;;  %v2792_v40 = vsel %vm2746_vm2, %v8192_v5, -inf  ;;  %v8252_v33 = vpop.permute.xlu0 %1217 }
 0x3a9   :  { %2793 = vmax.xlane.f32.xlu1 %v2792_v40  ;;  %9122 = vst [vmem:[#allocation44_spill] sm:$0xff] %v8252_v33  ;;  %v8258_v24 = vpop.permute.xlu1 %1223 }
 0x3aa   :  { %9123 = vst [vmem:[#allocation45_spill] sm:$0xff] %v8258_v24 }
 0x3ac   :  { %v8260_v58 = vpop.permute.xlu0 %1225 }
 0x3ad   :  { %9124 = vst [vmem:[#allocation46_spill] sm:$0xff] %v8260_v58 }
 0x3ef   :  { %v8222_v20 = vpop.f32.mrb[44].mxu0 }
 0x3f0   :  { %v6269_v49 = vpop.f32.mrb[45].mxu0  ;;  %v2795_v22 = vsel %vm2746_vm2, %v8222_v20, -inf }
 0x3f1   :  { %2796 = vmax.xlane.f32.xlu0 %v2795_v22  ;;  %v8228_v59 = vpop.f32.mrb[46].mxu0  ;;  %v8266_v22 = vpop.permute.xlu1 %1227 }
 0x3f2   :  { %v6270_v29 = vpop.f32.mrb[47].mxu0  ;;  %v2798_v13 = vsel %vm2746_vm2, %v8228_v59, -inf  ;;  %9125 = vst [vmem:[#allocation47_spill] sm:$0xff] %v8266_v22 }
 0x3f3   :  { %2799 = vmax.xlane.f32.xlu1 %v2798_v13 }
 0x3f7   :  { %v8236_v39 = vpop.f32.mrb[36].mxu1 }
 0x3f8   :  { %v6275_v43 = vpop.f32.mrb[37].mxu1  ;;  %v2801_v44 = vsel %vm2746_vm2, %v8236_v39, -inf }
 0x3f9   :  { %2802 = vmax.xlane.f32.xlu0 %v2801_v44  ;;  %v8240_v46 = vpop.f32.mrb[38].mxu1 }
 0x3fa   :  { %v6276_v51 = vpop.f32.mrb[39].mxu1  ;;  %v2804_v52 = vsel %vm2746_vm2, %v8240_v46, -inf }
 0x3fb   :  { %2805 = vmax.xlane.f32.xlu1 %v2804_v52 }
 0x3ff   :  { %v8248_v35 = vpop.f32.mrb[48].mxu0 }
 0x400   :  { %v6281_v32 = vpop.f32.mrb[49].mxu0  ;;  %v2807_v62 = vsel %vm2746_vm2, %v8248_v35, -inf }
 0x401   :  { %2808 = vmax.xlane.f32.xlu0 %v2807_v62  ;;  %v8254_v25 = vpop.f32.mrb[50].mxu0 }
 0x402   :  { %v6282_v45 = vpop.f32.mrb[51].mxu0  ;;  %v2810_v7 = vsel %vm2746_vm2, %v8254_v25, -inf }
 0x403   :  { %2811 = vmax.xlane.f32.xlu1 %v2810_v7 }
 0x407   :  { %v8262_v28 = vpop.f32.mrb[40].mxu1 }
 0x408   :  { %v6287_v40 = vpop.f32.mrb[41].mxu1  ;;  %v2813_v49 = vsel %vm2746_vm2, %v8262_v28, -inf }
 0x409   :  { %2814 = vmax.xlane.f32.xlu0 %v2813_v49  ;;  %v8268_v29 = vpop.f32.mrb[42].mxu1 }
 0x40a   :  { %v6288_v13 = vpop.f32.mrb[43].mxu1  ;;  %v2816_v43 = vsel %vm2746_vm2, %v8268_v29, -inf }
 0x40b   :  { %2817 = vmax.xlane.f32.xlu1 %v2816_v43  ;;  %v8272_v44 = vpop.f32.mrb[52].mxu0  ;;  %v2749_v51 = vpop.xlane.xlu0 %2748 }
 0x40c   :  { %v2939_v52 = vsub.f32 %v8118_v8, %v2749_v51  ;;  %v6293_v32 = vpop.f32.mrb[53].mxu0  ;;  %v2819_v62 = vsel %vm2746_vm2, %v8272_v44, -inf }
 0x40d   :  { %v2752_v45 = vpop.xlane.xlu1 %2751  ;;  %2820 = vmax.xlane.f32.xlu0 %v2819_v62  ;;  %v8277_v7 = vpop.f32.mrb[54].mxu0 }
 0x40e   :  { %v2940_v40 = vsub.f32 %v8125_v4, %v2752_v45  ;;  %v6294_v49 = vpop.f32.mrb[55].mxu0  ;;  %v2822_v13 = vsel %vm2746_vm2, %v8277_v7, -inf  ;;  %v3003_v43 = vmul.f32 1.442695, %v2939_v52 }
 0x40f   :  { %2823 = vmax.xlane.f32.xlu1 %v2822_v13  ;;  %v8282_v31 = vpop.f32.mrb[44].mxu1 }
 0x410   :  { %v6299_v22 = vpop.f32.mrb[45].mxu1  ;;  %v2825_v8 = vsel %vm2746_vm2, %v8282_v31, -inf  ;;  %v3005_v51 = vmul.f32 1.442695, %v2940_v40  ;;  %6892 = vpow2.f32 %v3003_v43 }
 0x411   :  { %2826 = vmax.xlane.f32.xlu0 %v2825_v8  ;;  %v8286_v32 = vpop.f32.mrb[46].mxu1 }
 0x412   :  { %v6300_v62 = vpop.f32.mrb[47].mxu1  ;;  %v2828_v4 = vsel %vm2746_vm2, %v8286_v32, -inf  ;;  %6894 = vpow2.f32 %v3005_v51 }
 0x413   :  { %2829 = vmax.xlane.f32.xlu1 %v2828_v4  ;;  %v8290_v45 = vpop.f32.mrb[56].mxu0 }
 0x414   :  { %v2755_v52 = vpop.xlane.xlu0 %2754  ;;  %v6305_v49 = vpop.f32.mrb[57].mxu0  ;;  %v2831_v22 = vsel %vm2746_vm2, %v8290_v45, -inf }
 0x415   :  { %2832 = vmax.xlane.f32.xlu0 %v2831_v22  ;;  %v8294_v13 = vpop.f32.mrb[58].mxu0  ;;  %v2941_v62 = vsub.f32 %v8136_v19, %v2755_v52 }
 0x416   :  { %v6306_v40 = vpop.f32.mrb[59].mxu0  ;;  %v2834_v8 = vsel %vm2746_vm2, %v8294_v13, -inf }
 0x417   :  { %2835 = vmax.xlane.f32.xlu1 %v2834_v8  ;;  %v8299_v43 = vpop.f32.mrb[48].mxu1  ;;  %v3007_v38 = vmul.f32 1.442695, %v2941_v62 }
 0x418   :  { %v2758_v4 = vpop.xlane.xlu0 %2757  ;;  %v6311_v24 = vpop.f32.mrb[49].mxu1  ;;  %v2837_v49 = vsel %vm2746_vm2, %v8299_v43, -inf }
 0x419   :  { %v2942_v58 = vsub.f32 %v8144_v61, %v2758_v4  ;;  %2838 = vmax.xlane.f32.xlu0 %v2837_v49  ;;  %v8304_v51 = vpop.f32.mrb[50].mxu1  ;;  %6896 = vpow2.f32 %v3007_v38 }
 0x41a   :  { %v6312_v22 = vpop.f32.mrb[51].mxu1  ;;  %v2840_v40 = vsel %vm2746_vm2, %v8304_v51, -inf  ;;  %v8312_v8 = vpop.eup %6892 }
 0x41b   :  { %2841 = vmax.xlane.f32.xlu1 %v2840_v40  ;;  %v8308_v19 = vpop.f32.mrb[60].mxu0  ;;  %v3009_v55 = vmul.f32 1.442695, %v2942_v58  ;;  %v3131_v23 = vsel %vm2746_vm2, %v8312_v8, 0.0 }
 0x41c   :  { %v6317_v52 = vpop.f32.mrb[61].mxu0  ;;  %v2843_v24 = vsel %vm2746_vm2, %v8308_v19, -inf  ;;  %v8318_v22 = vpop.eup %6894 }
 0x41d   :  { %2844 = vmax.xlane.f32.xlu0 %v2843_v24  ;;  %v8314_v61 = vpop.f32.mrb[62].mxu0  ;;  %v2761_v40 = vpop.xlane.xlu0 %2760  ;;  %6898 = vpow2.f32 %v3009_v55  ;;  %v3134_v33 = vsel %vm2746_vm2, %v8318_v22, 0.0 }
 0x41e   :  { %v6318_v4 = vpop.f32.mrb[63].mxu0  ;;  %v2846_v49 = vsel %vm2746_vm2, %v8314_v61, -inf  ;;  %v2764_v24 = vpop.xlane.xlu1 %2763  ;;  %v2943_v17 = vsub.f32 %v8148_v27, %v2761_v40 }
 0x41f   :  { %2847 = vmax.xlane.f32.xlu1 %v2846_v49  ;;  %v8320_v62 = vpop.f32.mrb[52].mxu1  ;;  %v2944_v50 = vsub.f32 %v8152_v30, %v2764_v24 }
 0x420   :  { %v6323_v52 = vpop.f32.mrb[53].mxu1  ;;  %v3011_v42 = vmul.f32 1.442695, %v2943_v17 }
 0x421   :  { %v8324_v58 = vpop.f32.mrb[54].mxu1  ;;  %3132 = vadd.xlane.f32.xlu0 %v3131_v23  ;;  %v2849_v52 = vsel %vm2746_vm2, %v8320_v62, -inf }
 0x422   :  { %v6324_v4 = vpop.f32.mrb[55].mxu1  ;;  %6900 = vpow2.f32 %v3011_v42 }
 0x423   :  { %3135 = vadd.xlane.f32.xlu1 %v3134_v33  ;;  %v8329_v38 = vpop.f32.mrb[64].mxu0  ;;  %v2852_v4 = vsel %vm2746_vm2, %v8324_v58, -inf  ;;  %v8342_v40 = vpop.eup %6896 }
 0x424   :  { %v6329_v49 = vpop.f32.mrb[65].mxu0  ;;  %v2855_v33 = vsel %vm2746_vm2, %v8329_v38, -inf  ;;  %v2767_v30 = vpop.xlane.xlu0 %2766  ;;  %v3137_v11 = vsel %vm2746_vm2, %v8342_v40, 0.0 }
 0x425   :  { %v8334_v55 = vpop.f32.mrb[66].mxu0  ;;  %2850 = vmax.xlane.f32.xlu0 %v2849_v52  ;;  %v3013_v49 = vmul.f32 1.442695, %v2944_v50  ;;  %v2945_v18 = vsub.f32 %v8158_v57, %v2767_v30 }
 0x426   :  { %v6330_v23 = vpop.f32.mrb[67].mxu0  ;;  %v2858_v52 = vsel %vm2746_vm2, %v8334_v55, -inf }
 0x427   :  { %2853 = vmax.xlane.f32.xlu1 %v2852_v4  ;;  %v8338_v47 = vpop.f32.mrb[56].mxu1  ;;  %v8348_v23 = vpop.eup %6898  ;;  %6902 = vpow2.f32 %v3013_v49  ;;  %v3015_v6 = vmul.f32 1.442695, %v2945_v18 }
 0x428   :  { %v6335_v27 = vpop.f32.mrb[57].mxu1  ;;  %v2770_v4 = vpop.xlane.xlu1 %2769 }
 0x429   :  { %v8344_v9 = vpop.f32.mrb[58].mxu1  ;;  %2856 = vmax.xlane.f32.xlu0 %v2855_v33  ;;  %v2773_v42 = vpop.xlane.xlu0 %2772  ;;  %v2946_v16 = vsub.f32 %v8164_v15, %v2770_v4  ;;  %6904 = vpow2.f32 %v3015_v6 }
 0x42a   :  { %v6336_v24 = vpop.f32.mrb[59].mxu1  ;;  %v2864_v63 = vsel %vm2746_vm2, %v8344_v9, -inf  ;;  %v2947_v57 = vsub.f32 %v8156_v48, %v2773_v42 }
 0x42b   :  { %2859 = vmax.xlane.f32.xlu1 %v2858_v52  ;;  %v8350_v17 = vpop.f32.mrb[68].mxu0  ;;  %v3140_v24 = vsel %vm2746_vm2, %v8348_v23, 0.0  ;;  %v3017_v15 = vmul.f32 1.442695, %v2946_v16 }
 0x42c   :  { %v6341_v27 = vpop.f32.mrb[69].mxu0  ;;  %v8373_v56 = vpop.eup %6900 }
 0x42d   :  { %v8354_v50 = vpop.f32.mrb[70].mxu0  ;;  %3138 = vadd.xlane.f32.xlu0 %v3137_v11  ;;  %v2861_v27 = vsel %vm2746_vm2, %v8338_v47, -inf  ;;  %v2776_v11 = vpop.xlane.xlu1 %2775  ;;  %v3143_v16 = vsel %vm2746_vm2, %v8373_v56, 0.0  ;;  %6906 = vpow2.f32 %v3017_v15 }
 0x42e   :  { %v6342_v33 = vpop.f32.mrb[71].mxu0  ;;  %v2948_v4 = vsub.f32 %v8162_v36, %v2776_v11  ;;  %v2870_v18 = vsel %vm2746_vm2, %v8354_v50, -inf }
 0x42f   :  { %v8359_v41 = vpop.f32.mrb[60].mxu1  ;;  %3141 = vadd.xlane.f32.xlu1 %v3140_v24 }
 0x430   :  { %v6347_v52 = vpop.f32.mrb[61].mxu1  ;;  %v3021_v36 = vmul.f32 1.442695, %v2948_v4 }
 0x431   :  { %v8364_v49 = vpop.f32.mrb[62].mxu1  ;;  %2862 = vmax.xlane.f32.xlu0 %v2861_v27  ;;  %v2867_v52 = vsel %vm2746_vm2, %v8350_v17, -inf  ;;  %v8380_v48 = vpop.eup %6902 }
 0x432   :  { %v6348_v33 = vpop.f32.mrb[63].mxu1  ;;  %9126 = vst [vmem:[#allocation48_spill] sm:$0xff] %v8380_v48  ;;  %v3146_v0 = vsel %vm2746_vm2, %v8380_v48, 0.0 }
 0x433   :  { %v8369_v30 = vpop.f32.mrb[72].mxu0  ;;  %2865 = vmax.xlane.f32.xlu1 %v2864_v63  ;;  %v3019_v63 = vmul.f32 1.442695, %v2947_v57  ;;  %v2782_v57 = vpop.xlane.xlu1 %2781 }
 0x434   :  { %v6353_v24 = vpop.f32.mrb[73].mxu0  ;;  %v8403_v34 = vpop.eup %6904 }
 0x435   :  { %v8376_v27 = vpop.f32.mrb[74].mxu0  ;;  %2868 = vmax.xlane.f32.xlu0 %v2867_v52  ;;  %v2779_v52 = vpop.xlane.xlu0 %2778  ;;  %6908 = vpow2.f32 %v3019_v63  ;;  %9129 = vst [vmem:[#allocation51_spill] sm:$0xff] %v8403_v34 }
 0x436   :  { %v6354_v33 = vpop.f32.mrb[75].mxu0  ;;  %6910 = vpow2.f32 %v3021_v36  ;;  %v2950_v36 = vsub.f32 %v8180_v14, %v2782_v57  ;;  %v3149_v14 = vsel %vm2746_vm2, %v8403_v34, 0.0 }
 0x437   :  { %v8382_v42 = vpop.f32.mrb[64].mxu1  ;;  %2871 = vmax.xlane.f32.xlu1 %v2870_v18 }
 0x438   :  { %v6359_v24 = vpop.f32.mrb[65].mxu1 }
 0x439   :  { %v8386_v11 = vpop.f32.mrb[66].mxu1  ;;  %3144 = vadd.xlane.f32.xlu0 %v3143_v16  ;;  %v2873_v24 = vsel %vm2746_vm2, %v8359_v41, -inf  ;;  %v2876_v16 = vsel %vm2746_vm2, %v8364_v49, -inf  ;;  %v2785_v63 = vpop.xlane.xlu0 %2784 }
 0x43a   :  { %v6360_v33 = vpop.f32.mrb[67].mxu1 }
 0x43b   :  { %v8390_v6 = vpop.f32.mrb[76].mxu0  ;;  %3147 = vadd.xlane.f32.xlu1 %v3146_v0  ;;  %v2949_v33 = vsub.f32 %v8174_v53, %v2779_v52  ;;  %v2882_v53 = vsel %vm2746_vm2, %v8376_v27, -inf  ;;  %v8410_v52 = vpop.eup %6906 }
 0x43c   :  { %9127 = vst [vmem:[#allocation49_spill] sm:$0xff] %v8390_v6  ;;  %v6365_v18 = vpop.f32.mrb[77].mxu0  ;;  %9130 = vst [vmem:[#allocation52_spill] sm:$0xff] %v8410_v52 }
 0x43d   :  { %v8394_v15 = vpop.f32.mrb[78].mxu0  ;;  %2874 = vmax.xlane.f32.xlu0 %v2873_v24  ;;  %v2879_v18 = vsel %vm2746_vm2, %v8369_v30, -inf  ;;  %v2788_v24 = vpop.xlane.xlu1 %2787 }
 0x43e   :  { %9128 = vst [vmem:[#allocation50_spill] sm:$0xff] %v8394_v15  ;;  %v6366_v4 = vpop.f32.mrb[79].mxu0 }
 0x43f   :  { %v8399_v54 = vpop.f32.mrb[68].mxu1  ;;  %2877 = vmax.xlane.f32.xlu1 %v2876_v16  ;;  %v3023_v16 = vmul.f32 1.442695, %v2949_v33  ;;  %v8417_v57 = vpop.eup %6908  ;;  %v3152_v33 = vsel %vm2746_vm2, %v8410_v52, 0.0 }
 0x440   :  { %v6371_v0 = vpop.f32.mrb[69].mxu1  ;;  %9131 = vst [vmem:[#allocation53_spill] sm:$0xff] %v8417_v57 }
 0x441   :  { %v8406_v21 = vpop.f32.mrb[70].mxu1  ;;  %2880 = vmax.xlane.f32.xlu0 %v2879_v18  ;;  %v2951_v0 = vsub.f32 %v8170_v26, %v2785_v63  ;;  %v3025_v18 = vmul.f32 1.442695, %v2950_v36  ;;  %v8424_v26 = vpop.eup %6910  ;;  %6912 = vpow2.f32 %v3023_v16  ;;  %v3155_v36 = vsel %vm2746_vm2, %v8417_v57, 0.0 }
 0x442   :  { %v6372_v4 = vpop.f32.mrb[71].mxu1  ;;  %9132 = vst [vmem:[#allocation54_spill] sm:$0xff] %v8424_v26  ;;  %v2791_v16 = vpop.xlane.xlu0 %2790 }
 0x443   :  { %v8413_v37 = vpop.f32.mrb[80].mxu0  ;;  %2883 = vmax.xlane.f32.xlu1 %v2882_v53  ;;  %v2952_v4 = vsub.f32 %v8176_v60, %v2788_v24  ;;  %v3027_v63 = vmul.f32 1.442695, %v2951_v0  ;;  %6914 = vpow2.f32 %v3025_v18  ;;  %v2794_v18 = vpop.xlane.xlu1 %2793 }
 0x444   :  { %v6377_v1 = vpop.f32.mrb[81].mxu0 }
 0x445   :  { %v8420_v2 = vpop.f32.mrb[82].mxu0  ;;  %3150 = vadd.xlane.f32.xlu0 %v3149_v14  ;;  %v3029_v60 = vmul.f32 1.442695, %v2952_v4  ;;  %v3158_v14 = vsel %vm2746_vm2, %v8424_v26, 0.0  ;;  %6916 = vpow2.f32 %v3027_v63 }
 0x446   :  { %v6378_v48 = vpop.f32.mrb[83].mxu0 }
 0x447   :  { %v8426_v1 = vpop.f32.mrb[72].mxu1  ;;  %3153 = vadd.xlane.f32.xlu1 %v3152_v33  ;;  %v2885_v33 = vsel %vm2746_vm2, %v8382_v42, -inf  ;;  %6918 = vpow2.f32 %v3029_v60  ;;  %v2954_v60 = vsub.f32 %v8192_v5, %v2794_v18 }
 0x448   :  { %v6383_v53 = vpop.f32.mrb[73].mxu1 }
 0x449   :  { %v8430_v24 = vpop.f32.mrb[74].mxu1  ;;  %3156 = vadd.xlane.f32.xlu0 %v3155_v36  ;;  %v2888_v36 = vsel %vm2746_vm2, %v8386_v11, -inf  ;;  %v3033_v5 = vmul.f32 1.442695, %v2954_v60 }
 0x44a   :  { %v6384_v48 = vpop.f32.mrb[75].mxu1 }
 0x44b   :  { %v8434_v52 = vpop.f32.mrb[84].mxu0  ;;  %3159 = vadd.xlane.f32.xlu1 %v3158_v14  ;;  %v2953_v48 = vsub.f32 %v8188_v12, %v2791_v16  ;;  %v8447_v26 = vpop.eup %6912 }
 0x44c   :  { %v6389_v0 = vpop.f32.mrb[85].mxu0  ;;  %9133 = vst [vmem:[#allocation55_spill] sm:$0xff] %v8447_v26 }
 0x44d   :  { %v8438_v53 = vpop.f32.mrb[86].mxu0  ;;  %2886 = vmax.xlane.f32.xlu0 %v2885_v33  ;;  %v2891_v0 = vsel %vm2746_vm2, %v8390_v6, -inf  ;;  %v8454_v34 = vpop.eup %6914  ;;  %v3031_v12 = vmul.f32 1.442695, %v2953_v48 }
 0x44e   :  { %v6390_v4 = vpop.f32.mrb[87].mxu0 }
 0x44f   :  { %v8443_v63 = vpop.f32.mrb[76].mxu1  ;;  %2889 = vmax.xlane.f32.xlu1 %v2888_v36  ;;  %v2894_v4 = vsel %vm2746_vm2, %v8394_v15, -inf  ;;  %v8460_v6 = vpop.eup %6916  ;;  %6920 = vpow2.f32 %v3031_v12  ;;  %v2900_v12 = vsel %vm2746_vm2, %v8406_v21, -inf }
 0x450   :  { %v6395_v14 = vpop.f32.mrb[77].mxu1  ;;  %6922 = vpow2.f32 %v3033_v5 }
 0x451   :  { %v8450_v57 = vpop.f32.mrb[78].mxu1  ;;  %2892 = vmax.xlane.f32.xlu0 %v2891_v0  ;;  %v3161_v14 = vsel %vm2746_vm2, %v8447_v26, 0.0  ;;  %v8466_v15 = vpop.eup %6918 }
 0x452   :  { %9134 = vst [vmem:[#allocation56_spill] sm:$0xff] %v8450_v57  ;;  %v6396_v33 = vpop.f32.mrb[79].mxu1 }
 0x453   :  { %v8456_v16 = vpop.f32.mrb[88].mxu0  ;;  %2895 = vmax.xlane.f32.xlu1 %v2894_v4  ;;  %v3164_v33 = vsel %vm2746_vm2, %v8454_v34, 0.0 }
 0x454   :  { %9135 = vst [vmem:[#allocation57_spill] sm:$0xff] %v8456_v16  ;;  %v6401_v36 = vpop.f32.mrb[89].mxu0 }
 0x455   :  { %v8462_v18 = vpop.f32.mrb[90].mxu0  ;;  %3162 = vadd.xlane.f32.xlu0 %v3161_v14  ;;  %v3167_v36 = vsel %vm2746_vm2, %v8460_v6, 0.0  ;;  %v3170_v14 = vsel %vm2746_vm2, %v8466_v15, 0.0 }
 0x456   :  { %9136 = vst [vmem:[#allocation58_spill] sm:$0xff] %v8462_v18  ;;  %v6402_v0 = vpop.f32.mrb[91].mxu0 }
 0x457   :  { %v8468_v48 = vpop.f32.mrb[80].mxu1  ;;  %3165 = vadd.xlane.f32.xlu1 %v3164_v33  ;;  %v2897_v0 = vsel %vm2746_vm2, %v8399_v54, -inf  ;;  %v2903_v33 = vsel %vm2746_vm2, %v8413_v37, -inf }
 0x458   :  { %9137 = vst [vmem:[#allocation59_spill] sm:$0xff] %v8468_v48  ;;  %v6407_v4 = vpop.f32.mrb[81].mxu1 }
 0x459   :  { %v8472_v26 = vpop.f32.mrb[82].mxu1  ;;  %3168 = vadd.xlane.f32.xlu0 %v3167_v36  ;;  %v8482_v5 = vpop.eup %6920  ;;  %v2906_v4 = vsel %vm2746_vm2, %v8420_v2, -inf }
 0x45a   :  { %9138 = vst [vmem:[#allocation60_spill] sm:$0xff] %v8472_v26  ;;  %v6408_v60 = vpop.f32.mrb[83].mxu1  ;;  %9139 = vst [vmem:[#allocation61_spill] sm:$0xff] %v8482_v5  ;;  %v8486_v36 = vpop.eup %6922 }
 0x45b   :  { %3171 = vadd.xlane.f32.xlu1 %v3170_v14  ;;  %9140 = vst [vmem:[#allocation62_spill] sm:$0xff] %v8486_v36  ;;  %v3173_v60 = vsel %vm2746_vm2, %v8482_v5, 0.0  ;;  %v3176_v14 = vsel %vm2746_vm2, %v8486_v36, 0.0 }
 0x45d   :  { %2898 = vmax.xlane.f32.xlu0 %v2897_v0  ;;  %v2909_v0 = vsel %vm2746_vm2, %v8426_v1, -inf }
 0x45f   :  { %2901 = vmax.xlane.f32.xlu1 %v2900_v12  ;;  %v2912_v12 = vsel %vm2746_vm2, %v8430_v24, -inf }
 0x461   :  { %2904 = vmax.xlane.f32.xlu0 %v2903_v33  ;;  %v2915_v33 = vsel %vm2746_vm2, %v8434_v52, -inf }
 0x463   :  { %2907 = vmax.xlane.f32.xlu1 %v2906_v4  ;;  %v2918_v4 = vsel %vm2746_vm2, %v8438_v53, -inf }
 0x465   :  { %3174 = vadd.xlane.f32.xlu0 %v3173_v60  ;;  %v2921_v60 = vsel %vm2746_vm2, %v8443_v63, -inf }
 0x467   :  { %3177 = vadd.xlane.f32.xlu1 %v3176_v14  ;;  %v2924_v14 = vsel %vm2746_vm2, %v8450_v57, -inf }
 0x469   :  { %2910 = vmax.xlane.f32.xlu0 %v2909_v0  ;;  %v2927_v0 = vsel %vm2746_vm2, %v8456_v16, -inf }
 0x46b   :  { %2913 = vmax.xlane.f32.xlu1 %v2912_v12  ;;  %v2930_v12 = vsel %vm2746_vm2, %v8462_v18, -inf }
 0x46d   :  { %2916 = vmax.xlane.f32.xlu0 %v2915_v33  ;;  %v2933_v33 = vsel %vm2746_vm2, %v8468_v48, -inf }
 0x46f   :  { %2919 = vmax.xlane.f32.xlu1 %v2918_v4  ;;  %v2936_v4 = vsel %vm2746_vm2, %v8472_v26, -inf }
 0x471   :  { %2922 = vmax.xlane.f32.xlu0 %v2921_v60 }
 0x473   :  { %2925 = vmax.xlane.f32.xlu1 %v2924_v14 }
 0x475   :  { %2928 = vmax.xlane.f32.xlu0 %v2927_v0 }
 0x477   :  { %2931 = vmax.xlane.f32.xlu1 %v2930_v12 }
 0x479   :  { %2934 = vmax.xlane.f32.xlu0 %v2933_v33 }
 0x47b   :  { %2937 = vmax.xlane.f32.xlu1 %v2936_v4 }
 0x47e   :  { %v2797_v60 = vpop.xlane.xlu0 %2796 }
 0x47f   :  { %v2955_v57 = vsub.f32 %v8222_v20, %v2797_v60 }
 0x480   :  { %v2800_v14 = vpop.xlane.xlu1 %2799 }
 0x481   :  { %v3035_v36 = vmul.f32 1.442695, %v2955_v57  ;;  %v2956_v16 = vsub.f32 %v8228_v59, %v2800_v14 }
 0x483   :  { %6924 = vpow2.f32 %v3035_v36  ;;  %v3037_v0 = vmul.f32 1.442695, %v2956_v16 }
 0x485   :  { %6926 = vpow2.f32 %v3037_v0 }
 0x486   :  { %v2803_v18 = vpop.xlane.xlu0 %2802 }
 0x487   :  { %v2957_v12 = vsub.f32 %v8236_v39, %v2803_v18 }
 0x488   :  { %v2806_v5 = vpop.xlane.xlu1 %2805 }
 0x489   :  { %v3039_v48 = vmul.f32 1.442695, %v2957_v12  ;;  %v2958_v33 = vsub.f32 %v8240_v46, %v2806_v5 }
 0x48b   :  { %6928 = vpow2.f32 %v3039_v48  ;;  %v3041_v26 = vmul.f32 1.442695, %v2958_v33 }
 0x48d   :  { %v8516_v4 = vpop.eup %6924  ;;  %6930 = vpow2.f32 %v3041_v26 }
 0x48e   :  { %v2809_v20 = vpop.xlane.xlu0 %2808  ;;  %v3179_v57 = vsel %vm2746_vm2, %v8516_v4, 0.0 }
 0x48f   :  { %v8520_v59 = vpop.eup %6926  ;;  %v2959_v16 = vsub.f32 %v8248_v35, %v2809_v20  ;;  %3180 = vadd.xlane.f32.xlu0 %v3179_v57 }
 0x490   :  { %v2812_v36 = vpop.xlane.xlu1 %2811  ;;  %v3182_v39 = vsel %vm2746_vm2, %v8520_v59, 0.0 }
 0x491   :  { %v3043_v18 = vmul.f32 1.442695, %v2959_v16  ;;  %v2960_v46 = vsub.f32 %v8254_v25, %v2812_v36  ;;  %3183 = vadd.xlane.f32.xlu1 %v3182_v39 }
 0x493   :  { %6932 = vpow2.f32 %v3043_v18  ;;  %v3045_v48 = vmul.f32 1.442695, %v2960_v46 }
 0x495   :  { %v8526_v26 = vpop.eup %6928  ;;  %6934 = vpow2.f32 %v3045_v48 }
 0x496   :  { %v2815_v5 = vpop.xlane.xlu0 %2814  ;;  %v3185_v60 = vsel %vm2746_vm2, %v8526_v26, 0.0 }
 0x497   :  { %v8530_v14 = vpop.eup %6930  ;;  %v2961_v35 = vsub.f32 %v8262_v28, %v2815_v5  ;;  %3186 = vadd.xlane.f32.xlu0 %v3185_v60 }
 0x498   :  { %v2818_v0 = vpop.xlane.xlu1 %2817  ;;  %v3188_v12 = vsel %vm2746_vm2, %v8530_v14, 0.0 }
 0x499   :  { %v3047_v25 = vmul.f32 1.442695, %v2961_v35  ;;  %v2962_v33 = vsub.f32 %v8268_v29, %v2818_v0  ;;  %3189 = vadd.xlane.f32.xlu1 %v3188_v12 }
 0x49a   :  { %v2821_v20 = vpop.xlane.xlu0 %2820 }
 0x49b   :  { %6936 = vpow2.f32 %v3047_v25  ;;  %v3049_v57 = vmul.f32 1.442695, %v2962_v33  ;;  %v2963_v16 = vsub.f32 %v8272_v44, %v2821_v20 }
 0x49c   :  { %v2824_v36 = vpop.xlane.xlu1 %2823 }
 0x49d   :  { %v8537_v39 = vpop.eup %6932  ;;  %6938 = vpow2.f32 %v3049_v57  ;;  %v3051_v18 = vmul.f32 1.442695, %v2963_v16  ;;  %v2964_v28 = vsub.f32 %v8277_v7, %v2824_v36 }
 0x49e   :  { %v2827_v46 = vpop.xlane.xlu0 %2826  ;;  %v3191_v48 = vsel %vm2746_vm2, %v8537_v39, 0.0 }
 0x49f   :  { %v8542_v5 = vpop.eup %6934  ;;  %6940 = vpow2.f32 %v3051_v18  ;;  %v3053_v29 = vmul.f32 1.442695, %v2964_v28  ;;  %v2965_v60 = vsub.f32 %v8282_v31, %v2827_v46  ;;  %3192 = vadd.xlane.f32.xlu0 %v3191_v48 }
 0x4a0   :  { %v2830_v35 = vpop.xlane.xlu1 %2829  ;;  %v3194_v44 = vsel %vm2746_vm2, %v8542_v5, 0.0 }
 0x4a1   :  { %6942 = vpow2.f32 %v3053_v29  ;;  %v3055_v0 = vmul.f32 1.442695, %v2965_v60  ;;  %v2966_v12 = vsub.f32 %v8286_v32, %v2830_v35  ;;  %3195 = vadd.xlane.f32.xlu1 %v3194_v44 }
 0x4a2   :  { %v2833_v7 = vpop.xlane.xlu0 %2832 }
 0x4a3   :  { %6944 = vpow2.f32 %v3055_v0  ;;  %v3057_v25 = vmul.f32 1.442695, %v2966_v12  ;;  %v2967_v33 = vsub.f32 %v8290_v45, %v2833_v7 }
 0x4a4   :  { %v2836_v20 = vpop.xlane.xlu1 %2835 }
 0x4a5   :  { %v8549_v57 = vpop.eup %6936  ;;  %6946 = vpow2.f32 %v3057_v25  ;;  %v3059_v31 = vmul.f32 1.442695, %v2967_v33  ;;  %v2968_v16 = vsub.f32 %v8294_v13, %v2836_v20 }
 0x4a6   :  { %v2839_v36 = vpop.xlane.xlu0 %2838  ;;  %v3197_v18 = vsel %vm2746_vm2, %v8549_v57, 0.0 }
 0x4a7   :  { %v8554_v28 = vpop.eup %6938  ;;  %6948 = vpow2.f32 %v3059_v31  ;;  %v3061_v32 = vmul.f32 1.442695, %v2968_v16  ;;  %v2969_v46 = vsub.f32 %v8299_v43, %v2839_v36  ;;  %3198 = vadd.xlane.f32.xlu0 %v3197_v18 }
 0x4a8   :  { %v2842_v48 = vpop.xlane.xlu1 %2841  ;;  %v3200_v45 = vsel %vm2746_vm2, %v8554_v28, 0.0 }
 0x4a9   :  { %v8559_v29 = vpop.eup %6940  ;;  %6950 = vpow2.f32 %v3061_v32  ;;  %v3063_v60 = vmul.f32 1.442695, %v2969_v46  ;;  %v2970_v13 = vsub.f32 %v8304_v51, %v2842_v48  ;;  %3201 = vadd.xlane.f32.xlu1 %v3200_v45 }
 0x4aa   :  { %v2845_v35 = vpop.xlane.xlu0 %2844  ;;  %v3203_v44 = vsel %vm2746_vm2, %v8559_v29, 0.0 }
 0x4ab   :  { %v8564_v0 = vpop.eup %6942  ;;  %6952 = vpow2.f32 %v3063_v60  ;;  %v3065_v43 = vmul.f32 1.442695, %v2970_v13  ;;  %v2971_v12 = vsub.f32 %v8308_v19, %v2845_v35  ;;  %3204 = vadd.xlane.f32.xlu0 %v3203_v44 }
 0x4ac   :  { %v2848_v7 = vpop.xlane.xlu1 %2847  ;;  %v3206_v25 = vsel %vm2746_vm2, %v8564_v0, 0.0 }
 0x4ad   :  { %v8569_v33 = vpop.eup %6944  ;;  %v3067_v20 = vmul.f32 1.442695, %v2971_v12  ;;  %v2972_v51 = vsub.f32 %v8314_v61, %v2848_v7  ;;  %3207 = vadd.xlane.f32.xlu1 %v3206_v25  ;;  %6954 = vpow2.f32 %v3065_v43 }
 0x4ae   :  { %v3133_v31 = vpop.xlane.xlu0 %3132  ;;  %v3209_v16 = vsel %vm2746_vm2, %v8569_v33, 0.0 }
 0x4af   :  { %v8574_v36 = vpop.eup %6946  ;;  %6956 = vpow2.f32 %v3067_v20  ;;  %v3069_v19 = vmul.f32 1.442695, %v2972_v51  ;;  %3210 = vadd.xlane.f32.xlu0 %v3209_v16 }
 0x4b0   :  { %6958 = vrcp.f32 %v3133_v31  ;;  %v3136_v18 = vpop.xlane.xlu1 %3135  ;;  %v3212_v32 = vsel %vm2746_vm2, %v8574_v36, 0.0 }
 0x4b1   :  { %v8578_v46 = vpop.eup %6948  ;;  %6960 = vpow2.f32 %v3069_v19  ;;  %3213 = vadd.xlane.f32.xlu1 %v3212_v32 }
 0x4b2   :  { %6962 = vrcp.f32 %v3136_v18  ;;  %v2851_v61 = vpop.xlane.xlu0 %2850  ;;  %v3215_v48 = vsel %vm2746_vm2, %v8578_v46, 0.0 }
 0x4b3   :  { %v8582_v45 = vpop.eup %6950  ;;  %v2973_v60 = vsub.f32 %v8320_v62, %v2851_v61  ;;  %3216 = vadd.xlane.f32.xlu0 %v3215_v48 }
 0x4b4   :  { %v2854_v13 = vpop.xlane.xlu1 %2853  ;;  %v3218_v35 = vsel %vm2746_vm2, %v8582_v45, 0.0 }
 0x4b5   :  { %v8587_v44 = vpop.eup %6952  ;;  %v3071_v43 = vmul.f32 1.442695, %v2973_v60  ;;  %v2974_v12 = vsub.f32 %v8324_v58, %v2854_v13  ;;  %3219 = vadd.xlane.f32.xlu1 %v3218_v35 }
 0x4b6   :  { %v2857_v7 = vpop.xlane.xlu0 %2856  ;;  %v3221_v25 = vsel %vm2746_vm2, %v8587_v44, 0.0 }
 0x4b7   :  { %6964 = vpow2.f32 %v3071_v43  ;;  %v3073_v20 = vmul.f32 1.442695, %v2974_v12  ;;  %v2975_v51 = vsub.f32 %v8329_v38, %v2857_v7  ;;  %3222 = vadd.xlane.f32.xlu0 %v3221_v25  ;;  %v8593_v62 = vpop.eup %6954 }
 0x4b8   :  { %v2860_v31 = vpop.xlane.xlu1 %2859  ;;  %v3224_v7 = vsel %vm2746_vm2, %v8593_v62, 0.0 }
 0x4b9   :  { %v8595_v16 = vpop.eup %6956  ;;  %v3075_v19 = vmul.f32 1.442695, %v2975_v51  ;;  %v2976_v18 = vsub.f32 %v8334_v55, %v2860_v31  ;;  %6966 = vpow2.f32 %v3073_v20 }
 0x4ba   :  { %v6959_v32 = vpop.eup %6958  ;;  %v3139_v58 = vpop.xlane.xlu0 %3138  ;;  %v3227_v61 = vsel %vm2746_vm2, %v8595_v16, 0.0 }
 0x4bb   :  { %v8600_v48 = vpop.eup %6960  ;;  %6968 = vpow2.f32 %v3075_v19  ;;  %v3077_v60 = vmul.f32 1.442695, %v2976_v18  ;;  %3228 = vadd.xlane.f32.xlu1 %v3227_v61  ;;  %v3387_v43 = vmul.f32 %v6959_v32, %v8312_v8  ;;  %v9141_v32 = vmov 0.0  }
 0x4bc   :  { %v6963_v38 = vpop.eup %6962  ;;  %6970 = vrcp.f32 %v3139_v58  ;;  %v3142_v13 = vpop.xlane.xlu1 %3141  ;;  %v3230_v35 = vsel %vm2746_vm2, %v8600_v48, 0.0 }
 0x4bd   :  { %v3388_v55 = vmul.f32 %v6963_v38, %v8318_v22  ;;  %6972 = vpow2.f32 %v3077_v60  ;;  %3231 = vadd.xlane.f32.xlu0 %v3230_v35 }
 0x4be   :  { %6974 = vrcp.f32 %v3142_v13  ;;  %v2863_v12 = vpop.xlane.xlu0 %2862 }
 0x4bf   :  { %v2977_v25 = vsub.f32 %v8338_v47, %v2863_v12  ;;  %3225 = vadd.xlane.f32.xlu1 %v3224_v7  ;;  %v3451_v20 = vpack.c.bf16 %v3388_v55, %v3387_v43 }
 0x4c0   :  { %v2866_v51 = vpop.xlane.xlu1 %2865 }
 0x4c1   :  { %v8609_v31 = vpop.eup %6964  ;;  %v3079_v19 = vmul.f32 1.442695, %v2977_v25  ;;  %v2978_v18 = vsub.f32 %v8344_v9, %v2866_v51  ;;  %6412 = vmatmul.mubr.msk.bf16.vlgmr.msra.gmra.mrb[92].mxu0 %vm2746_vm2, %v3451_v20 }
 0x4c2   :  { %6422 = vmatpush3.bf16.msra.mxu0 %v7760_v10  ;;  %v2869_v8 = vpop.xlane.xlu0 %2868  ;;  %v3233_v22 = vsel %vm2746_vm2, %v8609_v31, 0.0  ;;  %6423 = vmatprep.mubr.msk.bf16.mxu0 %vm7350_vm0, %v9141_v32 }
 0x4c3   :  { %6976 = vpow2.f32 %v3079_v19  ;;  %v3081_v47 = vmul.f32 1.442695, %v2978_v18  ;;  %v2979_v58 = vsub.f32 %v8350_v17, %v2869_v8  ;;  %3234 = vadd.xlane.f32.xlu0 %v3233_v22  ;;  %6433 = vmatprep.subr.bf16.mxu0 %v9141_v32  ;;  %v8620_v61 = vpop.eup %6966 }
 0x4c4   :  { %v2872_v9 = vpop.xlane.xlu1 %2871  ;;  %v3236_v19 = vsel %vm2746_vm2, %v8620_v61, 0.0 }
 0x4c5   :  { %v8622_v60 = vpop.eup %6968  ;;  %v3083_v10 = vmul.f32 1.442695, %v2979_v58  ;;  %v2980_v38 = vsub.f32 %v8354_v50, %v2872_v9  ;;  %6978 = vpow2.f32 %v3081_v47 }
 0x4c6   :  { %v6971_v13 = vpop.eup %6970  ;;  %v3145_v35 = vpop.xlane.xlu0 %3144  ;;  %v3239_v43 = vsel %vm2746_vm2, %v8622_v60, 0.0 }
 0x4c7   :  { %v8627_v55 = vpop.eup %6972  ;;  %6980 = vpow2.f32 %v3083_v10  ;;  %v3085_v17 = vmul.f32 1.442695, %v2980_v38  ;;  %3240 = vadd.xlane.f32.xlu1 %v3239_v43  ;;  %v3389_v20 = vmul.f32 %v6971_v13, %v8342_v40 }
 0x4c8   :  { %v6975_v12 = vpop.eup %6974  ;;  %6982 = vrcp.f32 %v3145_v35  ;;  %v3148_v7 = vpop.xlane.xlu1 %3147  ;;  %v3242_v25 = vsel %vm2746_vm2, %v8627_v55, 0.0 }
 0x4c9   :  { %v3390_v50 = vmul.f32 %v6975_v12, %v8348_v23  ;;  %6984 = vpow2.f32 %v3085_v17  ;;  %3243 = vadd.xlane.f32.xlu0 %v3242_v25 }
 0x4ca   :  { %6986 = vrcp.f32 %v3148_v7  ;;  %v2875_v51 = vpop.xlane.xlu0 %2874 }
 0x4cb   :  { %v2981_v18 = vsub.f32 %v8359_v41, %v2875_v51  ;;  %3237 = vadd.xlane.f32.xlu1 %v3236_v19  ;;  %v3452_v8 = vpack.c.bf16 %v3390_v50, %v3389_v20 }
 0x4cc   :  { %v2878_v22 = vpop.xlane.xlu1 %2877 }
 0x4cd   :  { %v8636_v47 = vpop.eup %6976  ;;  %v3087_v58 = vmul.f32 1.442695, %v2981_v18  ;;  %v2982_v9 = vsub.f32 %v8364_v49, %v2878_v22  ;;  %6418 = vmatmul.mubr.msk.bf16.vlgmr.msra.gmra.mrb[84].mxu1 %vm2746_vm2, %v3452_v8 }
 0x4ce   :  { %6428 = vmatpush3.bf16.msra.mxu1 %v7758_v3  ;;  %v2881_v40 = vpop.xlane.xlu0 %2880  ;;  %v3245_v23 = vsel %vm2746_vm2, %v8636_v47, 0.0  ;;  %6429 = vmatprep.mubr.msk.bf16.mxu1 %vm7350_vm0, %v9141_v32 }
 0x4cf   :  { %6988 = vpow2.f32 %v3087_v58  ;;  %v3089_v41 = vmul.f32 1.442695, %v2982_v9  ;;  %v2983_v10 = vsub.f32 %v8369_v30, %v2881_v40  ;;  %3246 = vadd.xlane.f32.xlu0 %v3245_v23  ;;  %6439 = vmatprep.subr.bf16.mxu1 %v9141_v32  ;;  %v8647_v38 = vpop.eup %6978  ;;  %v9144_v40 = vld [vmem:[#allocation23_spill] sm:$0xff] }
 0x4d0   :  { %v2884_v49 = vpop.xlane.xlu1 %2883  ;;  %v3248_v8 = vsel %vm2746_vm2, %v8647_v38, 0.0 }
 0x4d1   :  { %v8649_v13 = vpop.eup %6980  ;;  %v3091_v3 = vmul.f32 1.442695, %v2983_v10  ;;  %v2984_v35 = vsub.f32 %v8376_v27, %v2884_v49  ;;  %6990 = vpow2.f32 %v3089_v41  ;;  %v9142_v27 = vld [vmem:[#allocation48_spill] sm:$0xff] }
 0x4d2   :  { %v6983_v43 = vpop.eup %6982  ;;  %v3151_v17 = vpop.xlane.xlu0 %3150  ;;  %v3251_v12 = vsel %vm2746_vm2, %v8649_v13, 0.0 }
 0x4d3   :  { %v8654_v7 = vpop.eup %6984  ;;  %6992 = vpow2.f32 %v3091_v3  ;;  %v3093_v30 = vmul.f32 1.442695, %v2984_v35  ;;  %3252 = vadd.xlane.f32.xlu1 %v3251_v12  ;;  %v3391_v51 = vmul.f32 %v6983_v43, %v8373_v56 }
 0x4d4   :  { %v6987_v25 = vpop.eup %6986  ;;  %6994 = vrcp.f32 %v3151_v17  ;;  %v3154_v20 = vpop.xlane.xlu1 %3153  ;;  %v3254_v50 = vsel %vm2746_vm2, %v8654_v7, 0.0 }
 0x4d5   :  { %v3392_v19 = vmul.f32 %v6987_v25, %v9142_v27  ;;  %6996 = vpow2.f32 %v3093_v30  ;;  %3255 = vadd.xlane.f32.xlu0 %v3254_v50 }
 0x4d6   :  { %6998 = vrcp.f32 %v3154_v20  ;;  %v3157_v18 = vpop.xlane.xlu0 %3156  ;;  %v9145_v20 = vld [vmem:[#allocation49_spill] sm:$0xff] }
 0x4d7   :  { %7000 = vrcp.f32 %v3157_v18  ;;  %3249 = vadd.xlane.f32.xlu1 %v3248_v8  ;;  %v3453_v22 = vpack.c.bf16 %v3392_v19, %v3391_v51  ;;  %v9146_v8 = vld [vmem:[#allocation51_spill] sm:$0xff] }
 0x4d8   :  { %v3160_v58 = vpop.xlane.xlu1 %3159 }
 0x4d9   :  { %v8662_v9 = vpop.eup %6988  ;;  %7002 = vrcp.f32 %v3160_v58  ;;  %6424 = vmatmul.mubr.msk.bf16.vlgmr.msra.gmra.mrb[96].mxu0 %vm2746_vm2, %v3453_v22  ;;  %v9147_v22 = vld [vmem:[#allocation52_spill] sm:$0xff] }
 0x4da   :  { %9143 = vst [vmem:[#allocation48_spill] sm:$0xff] %v8662_v9  ;;  %6434 = vmatpush3.bf16.msra.mxu0 %v9144_v40  ;;  %v2887_v56 = vpop.xlane.xlu0 %2886  ;;  %v3257_v23 = vsel %vm2746_vm2, %v8662_v9, 0.0  ;;  %6435 = vmatprep.mubr.msk.bf16.mxu0 %vm7350_vm0, %v9141_v32  ;;  %v9150_v9 = vld [vmem:[#allocation54_spill] sm:$0xff] }
 0x4db   :  { %v2985_v41 = vsub.f32 %v8382_v42, %v2887_v56  ;;  %3258 = vadd.xlane.f32.xlu0 %v3257_v23  ;;  %6445 = vmatprep.subr.bf16.mxu0 %v9141_v32  ;;  %v8672_v10 = vpop.eup %6990  ;;  %v9148_v56 = vld [vmem:[#allocation50_spill] sm:$0xff] }
 0x4dc   :  { %v2890_v49 = vpop.xlane.xlu1 %2889 }
 0x4dd   :  { %v8674_v3 = vpop.eup %6992  ;;  %v3095_v35 = vmul.f32 1.442695, %v2985_v41  ;;  %v2986_v43 = vsub.f32 %v8386_v11, %v2890_v49  ;;  %v3260_v49 = vsel %vm2746_vm2, %v8672_v10, 0.0 }
 0x4de   :  { %v6995_v17 = vpop.eup %6994  ;;  %v2893_v12 = vpop.xlane.xlu0 %2892  ;;  %v3263_v30 = vsel %vm2746_vm2, %v8674_v3, 0.0 }
 0x4df   :  { %v8679_v25 = vpop.eup %6996  ;;  %7004 = vpow2.f32 %v3095_v35  ;;  %v3097_v42 = vmul.f32 1.442695, %v2986_v43  ;;  %v2987_v50 = vsub.f32 %v9145_v20, %v2893_v12  ;;  %3264 = vadd.xlane.f32.xlu1 %v3263_v30  ;;  %v3393_v11 = vmul.f32 %v6995_v17, %v9146_v8  ;;  %v9149_v30 = vld [vmem:[#allocation53_spill] sm:$0xff] }
 0x4e0   :  { %v6999_v51 = vpop.eup %6998  ;;  %v2896_v27 = vpop.xlane.xlu1 %2895  ;;  %v3266_v19 = vsel %vm2746_vm2, %v8679_v25, 0.0 }
 0x4e1   :  { %v7001_v18 = vpop.eup %7000  ;;  %v3394_v58 = vmul.f32 %v6999_v51, %v9147_v22  ;;  %v3099_v40 = vmul.f32 1.442695, %v2987_v50  ;;  %v2988_v23 = vsub.f32 %v9148_v56, %v2896_v27  ;;  %3267 = vadd.xlane.f32.xlu0 %v3266_v19  ;;  %7006 = vpow2.f32 %v3097_v42  ;;  %v9151_v42 = vld [vmem:[#allocation22_spill] sm:$0xff] }
 0x4e2   :  { %v3163_v41 = vpop.xlane.xlu0 %3162  ;;  %v3395_v20 = vmul.f32 %v7001_v18, %v9149_v30  ;;  %v9152_v18 = vld [vmem:[#allocation25_spill] sm:$0xff] }
 0x4e3   :  { %v7003_v35 = vpop.eup %7002  ;;  %7008 = vpow2.f32 %v3099_v40  ;;  %v3101_v43 = vmul.f32 1.442695, %v2988_v23  ;;  %3261 = vadd.xlane.f32.xlu1 %v3260_v49  ;;  %v3454_v12 = vpack.c.bf16 %v3394_v58, %v3393_v11 }
 0x4e4   :  { %v3396_v17 = vmul.f32 %v7003_v35, %v9150_v9  ;;  %7010 = vrcp.f32 %v3163_v41  ;;  %v3166_v51 = vpop.xlane.xlu1 %3165 }
 0x4e5   :  { %7012 = vpow2.f32 %v3101_v43  ;;  %6430 = vmatmul.mubr.msk.bf16.vlgmr.msra.gmra.mrb[88].mxu1 %vm2746_vm2, %v3454_v12 }
 0x4e6   :  { %7014 = vrcp.f32 %v3166_v51  ;;  %6440 = vmatpush3.bf16.msra.mxu1 %v9151_v42  ;;  %v3169_v50 = vpop.xlane.xlu0 %3168  ;;  %v3455_v27 = vpack.c.bf16 %v3396_v17, %v3395_v20  ;;  %6441 = vmatprep.mubr.msk.bf16.mxu1 %vm7350_vm0, %v9141_v32 }
 0x4e7   :  { %7016 = vrcp.f32 %v3169_v50  ;;  %6451 = vmatprep.subr.bf16.mxu1 %v9141_v32  ;;  %v9153_v50 = vld [vmem:[#allocation55_spill] sm:$0xff] }
 0x4e8   :  { %v3172_v19 = vpop.xlane.xlu1 %3171  ;;  %6436 = vmatmul.mubr.msk.bf16.vlgmr.msra.gmra.mrb[100].mxu0 %vm2746_vm2, %v3455_v27 }
 0x4e9   :  { %v8697_v9 = vpop.eup %7004  ;;  %7018 = vrcp.f32 %v3172_v19  ;;  %6446 = vmatpush3.bf16.msra.mxu0 %v9152_v18  ;;  %6447 = vmatprep.mubr.msk.bf16.mxu0 %vm7350_vm0, %v9141_v32 }
 0x4ea   :  { %v2899_v8 = vpop.xlane.xlu0 %2898  ;;  %v3269_v11 = vsel %vm2746_vm2, %v8697_v9, 0.0  ;;  %6457 = vmatprep.subr.bf16.mxu0 %v9141_v32 }
 0x4eb   :  { %v2989_v22 = vsub.f32 %v8399_v54, %v2899_v8  ;;  %3270 = vadd.xlane.f32.xlu0 %v3269_v11  ;;  %v8706_v58 = vpop.eup %7006 }
 0x4ec   :  { %v2902_v40 = vpop.xlane.xlu1 %2901 }
 0x4ed   :  { %v8708_v56 = vpop.eup %7008  ;;  %v3103_v23 = vmul.f32 1.442695, %v2989_v22  ;;  %v2990_v41 = vsub.f32 %v8406_v21, %v2902_v40 }
 0x4ee   :  { %v7011_v49 = vpop.eup %7010  ;;  %v2905_v35 = vpop.xlane.xlu0 %2904  ;;  %v3275_v43 = vsel %vm2746_vm2, %v8708_v56, 0.0 }
 0x4ef   :  { %v8713_v12 = vpop.eup %7012  ;;  %7020 = vpow2.f32 %v3103_v23  ;;  %v3105_v30 = vmul.f32 1.442695, %v2990_v41  ;;  %v2991_v54 = vsub.f32 %v8413_v37, %v2905_v35  ;;  %3276 = vadd.xlane.f32.xlu1 %v3275_v43  ;;  %v3397_v21 = vmul.f32 %v7011_v49, %v9153_v50 }
 0x4f0   :  { %v7015_v20 = vpop.eup %7014  ;;  %v2908_v17 = vpop.xlane.xlu1 %2907  ;;  %v3278_v51 = vsel %vm2746_vm2, %v8713_v12, 0.0  ;;  %v3272_v37 = vsel %vm2746_vm2, %v8706_v58, 0.0 }
 0x4f1   :  { %v7017_v42 = vpop.eup %7016  ;;  %v3398_v27 = vmul.f32 %v7015_v20, %v8454_v34  ;;  %v3107_v19 = vmul.f32 1.442695, %v2991_v54  ;;  %v2992_v8 = vsub.f32 %v8420_v2, %v2908_v17  ;;  %3279 = vadd.xlane.f32.xlu0 %v3278_v51  ;;  %7022 = vpow2.f32 %v3105_v30  ;;  %v9154_v2 = vld [vmem:[#allocation24_spill] sm:$0xff] }
 0x4f2   :  { %v3175_v11 = vpop.xlane.xlu0 %3174  ;;  %v3399_v41 = vmul.f32 %v7017_v42, %v8460_v6  ;;  %v9155_v17 = vld [vmem:[#allocation28_spill] sm:$0xff] }
 0x4f3   :  { %v7019_v22 = vpop.eup %7018  ;;  %7024 = vpow2.f32 %v3107_v19  ;;  %v3109_v40 = vmul.f32 1.442695, %v2992_v8  ;;  %3273 = vadd.xlane.f32.xlu1 %v3272_v37  ;;  %v3456_v23 = vpack.c.bf16 %v3398_v27, %v3397_v21 }
 0x4f4   :  { %v3400_v49 = vmul.f32 %v7019_v22, %v8466_v15  ;;  %7026 = vrcp.f32 %v3175_v11  ;;  %v3178_v34 = vpop.xlane.xlu1 %3177 }
 0x4f5   :  { %7028 = vpow2.f32 %v3109_v40  ;;  %6442 = vmatmul.mubr.msk.bf16.vlgmr.msra.gmra.mrb[92].mxu1 %vm2746_vm2, %v3456_v23 }
 0x4f6   :  { %7030 = vrcp.f32 %v3178_v34  ;;  %6452 = vmatpush3.bf16.msra.mxu1 %v9154_v2  ;;  %v2911_v35 = vpop.xlane.xlu0 %2910  ;;  %v3457_v43 = vpack.c.bf16 %v3400_v49, %v3399_v41  ;;  %6453 = vmatprep.mubr.msk.bf16.mxu1 %vm7350_vm0, %v9141_v32  ;;  %v9156_v49 = vld [vmem:[#allocation61_spill] sm:$0xff] }
 0x4f7   :  { %v2993_v30 = vsub.f32 %v8426_v1, %v2911_v35  ;;  %6463 = vmatprep.subr.bf16.mxu1 %v9141_v32 }
 0x4f8   :  { %v2914_v6 = vpop.xlane.xlu1 %2913  ;;  %6448 = vmatmul.mubr.msk.bf16.vlgmr.msra.gmra.mrb[104].mxu0 %vm2746_vm2, %v3457_v43  ;;  %v9157_v43 = vld [vmem:[#allocation62_spill] sm:$0xff] }
 0x4f9   :  { %v8732_v15 = vpop.eup %7020  ;;  %v3111_v54 = vmul.f32 1.442695, %v2993_v30  ;;  %v2994_v20 = vsub.f32 %v8430_v24, %v2914_v6  ;;  %6458 = vmatpush3.bf16.msra.mxu0 %v9155_v17  ;;  %6459 = vmatprep.mubr.msk.bf16.mxu0 %vm7350_vm0, %v9141_v32 }
 0x4fa   :  { %v2917_v51 = vpop.xlane.xlu0 %2916  ;;  %v3281_v42 = vsel %vm2746_vm2, %v8732_v15, 0.0  ;;  %6469 = vmatprep.subr.bf16.mxu0 %v9141_v32 }
 0x4fb   :  { %7032 = vpow2.f32 %v3111_v54  ;;  %v2995_v1 = vsub.f32 %v8434_v52, %v2917_v51  ;;  %3282 = vadd.xlane.f32.xlu0 %v3281_v42  ;;  %v8742_v50 = vpop.eup %7022  ;;  %v3113_v21 = vmul.f32 1.442695, %v2994_v20  ;;  %v9158_v54 = vld [vmem:[#allocation56_spill] sm:$0xff]  ;;  %v9159_v51 = vld [vmem:[#allocation57_spill] sm:$0xff] }
 0x4fc   :  { %v2920_v27 = vpop.xlane.xlu1 %2919 }
 0x4fd   :  { %v8744_v24 = vpop.eup %7024  ;;  %v3115_v19 = vmul.f32 1.442695, %v2995_v1  ;;  %v2996_v8 = vsub.f32 %v8438_v53, %v2920_v27 }
 0x4fe   :  { %v7027_v11 = vpop.eup %7026  ;;  %v2923_v37 = vpop.xlane.xlu0 %2922  ;;  %v3287_v22 = vsel %vm2746_vm2, %v8744_v24, 0.0 }
 0x4ff   :  { %v8749_v40 = vpop.eup %7028  ;;  %7034 = vpow2.f32 %v3115_v19  ;;  %v3117_v23 = vmul.f32 1.442695, %v2996_v8  ;;  %v2997_v52 = vsub.f32 %v8443_v63, %v2923_v37  ;;  %3288 = vadd.xlane.f32.xlu1 %v3287_v22  ;;  %v3401_v34 = vmul.f32 %v7027_v11, %v9156_v49  ;;  %v9160_v11 = vld [vmem:[#allocation58_spill] sm:$0xff]  ;;  %v9162_v49 = vld [vmem:[#allocation59_spill] sm:$0xff] }
 0x500   :  { %v7031_v41 = vpop.eup %7030  ;;  %7036 = vpow2.f32 %v3113_v21  ;;  %v2926_v35 = vpop.xlane.xlu1 %2925  ;;  %v3290_v53 = vsel %vm2746_vm2, %v8749_v40, 0.0  ;;  %v3284_v63 = vsel %vm2746_vm2, %v8742_v50, 0.0  ;;  %v9161_v22 = vld [vmem:[#allocation26_spill] sm:$0xff] }
 0x501   :  { %v3402_v30 = vmul.f32 %v7031_v41, %v9157_v43  ;;  %7038 = vpow2.f32 %v3117_v23  ;;  %v3119_v6 = vmul.f32 1.442695, %v2997_v52  ;;  %v2998_v20 = vsub.f32 %v9158_v54, %v2926_v35  ;;  %3291 = vadd.xlane.f32.xlu0 %v3290_v53 }
 0x502   :  { %v2929_v17 = vpop.xlane.xlu0 %2928 }
 0x503   :  { %7040 = vpow2.f32 %v3119_v6  ;;  %v2999_v42 = vsub.f32 %v9159_v51, %v2929_v17  ;;  %3285 = vadd.xlane.f32.xlu1 %v3284_v63  ;;  %v3458_v1 = vpack.c.bf16 %v3402_v30, %v3401_v34  ;;  %v3121_v21 = vmul.f32 1.442695, %v2998_v20  ;;  %v9163_v30 = vld [vmem:[#allocation60_spill] sm:$0xff] }
 0x504   :  { %v2932_v27 = vpop.xlane.xlu1 %2931 }
 0x505   :  { %v8760_v19 = vpop.eup %7032  ;;  %v3123_v8 = vmul.f32 1.442695, %v2999_v42  ;;  %v3000_v37 = vsub.f32 %v9160_v11, %v2932_v27  ;;  %6454 = vmatmul.mubr.msk.bf16.vlgmr.msra.gmra.mrb[96].mxu1 %vm2746_vm2, %v3458_v1 }
 0x506   :  { %6464 = vmatpush3.bf16.msra.mxu1 %v9161_v22  ;;  %v2935_v23 = vpop.xlane.xlu0 %2934  ;;  %v3293_v52 = vsel %vm2746_vm2, %v8760_v19, 0.0  ;;  %6465 = vmatprep.mubr.msk.bf16.mxu1 %vm7350_vm0, %v9141_v32 }
 0x507   :  { %7042 = vpow2.f32 %v3123_v8  ;;  %v3125_v41 = vmul.f32 1.442695, %v3000_v37  ;;  %v3001_v34 = vsub.f32 %v9162_v49, %v2935_v23  ;;  %3294 = vadd.xlane.f32.xlu0 %v3293_v52  ;;  %6475 = vmatprep.subr.bf16.mxu1 %v9141_v32 }
 0x508   :  { %7044 = vpow2.f32 %v3121_v21  ;;  %v2938_v35 = vpop.xlane.xlu1 %2937 }
 0x509   :  { %v8771_v53 = vpop.eup %7034  ;;  %7046 = vpow2.f32 %v3125_v41  ;;  %v3127_v43 = vmul.f32 1.442695, %v3001_v34  ;;  %v3002_v6 = vsub.f32 %v9163_v30, %v2938_v35 }
 0x50a   :  { %v8774_v54 = vpop.eup %7036  ;;  %v3299_v20 = vsel %vm2746_vm2, %v8771_v53, 0.0 }
 0x50b   :  { %v8778_v17 = vpop.eup %7038  ;;  %7048 = vpow2.f32 %v3127_v43  ;;  %v3129_v63 = vmul.f32 1.442695, %v3002_v6  ;;  %3300 = vadd.xlane.f32.xlu1 %v3299_v20  ;;  %v3296_v1 = vsel %vm2746_vm2, %v8774_v54, 0.0 }
 0x50c   :  { %v3302_v51 = vsel %vm2746_vm2, %v8778_v17, 0.0 }
 0x50d   :  { %v8782_v42 = vpop.eup %7040  ;;  %7050 = vpow2.f32 %v3129_v63  ;;  %3303 = vadd.xlane.f32.xlu0 %v3302_v51 }
 0x50e   :  { %v3305_v21 = vsel %vm2746_vm2, %v8782_v42, 0.0 }
 0x50f   :  { %3297 = vadd.xlane.f32.xlu1 %v3296_v1 }
 0x511   :  { %v8788_v27 = vpop.eup %7042  ;;  %3306 = vadd.xlane.f32.xlu0 %v3305_v21 }
 0x512   :  { %v8790_v8 = vpop.eup %7044  ;;  %v3311_v11 = vsel %vm2746_vm2, %v8788_v27, 0.0 }
 0x513   :  { %v8794_v37 = vpop.eup %7046  ;;  %3312 = vadd.xlane.f32.xlu1 %v3311_v11  ;;  %v3308_v52 = vsel %vm2746_vm2, %v8790_v8, 0.0 }
 0x514   :  { %v3314_v22 = vsel %vm2746_vm2, %v8794_v37, 0.0 }
 0x515   :  { %v8798_v23 = vpop.eup %7048  ;;  %3315 = vadd.xlane.f32.xlu0 %v3314_v22 }
 0x516   :  { %v3317_v49 = vsel %vm2746_vm2, %v8798_v23, 0.0 }
 0x517   :  { %v8802_v41 = vpop.eup %7050  ;;  %3309 = vadd.xlane.f32.xlu1 %v3308_v52 }
 0x518   :  { %v3320_v34 = vsel %vm2746_vm2, %v8802_v41, 0.0 }
 0x519   :  { %3318 = vadd.xlane.f32.xlu0 %v3317_v49  ;;  %v9164_v49 = vld [vmem:[#allocation30_spill] sm:$0xff] }
 0x51b   :  { %3321 = vadd.xlane.f32.xlu1 %v3320_v34 }
 0x51c   :  { %v3181_v35 = vpop.xlane.xlu0 %3180 }
 0x51d   :  { %7052 = vrcp.f32 %v3181_v35 }
 0x51e   :  { %v3184_v43 = vpop.xlane.xlu1 %3183 }
 0x51f   :  { %7054 = vrcp.f32 %v3184_v43 }
 0x524   :  { %v3187_v30 = vpop.xlane.xlu0 %3186 }
 0x525   :  { %7056 = vrcp.f32 %v3187_v30 }
 0x526   :  { %v3190_v6 = vpop.xlane.xlu1 %3189 }
 0x527   :  { %v7053_v20 = vpop.eup %7052  ;;  %7058 = vrcp.f32 %v3190_v6  ;;  %v9165_v6 = vld [vmem:[#allocation27_spill] sm:$0xff] }
 0x528   :  { %v3403_v51 = vmul.f32 %v7053_v20, %v8516_v4 }
 0x529   :  { %v7055_v63 = vpop.eup %7054 }
 0x52a   :  { %v3404_v1 = vmul.f32 %v7055_v63, %v8520_v59 }
 0x52c   :  { %1231 = vrot.lane.b32.xlu1 %v9154_v2, %s7352_s9  ;;  %v3193_v21 = vpop.xlane.xlu0 %3192  ;;  %v3459_v11 = vpack.c.bf16 %v3404_v1, %v3403_v51 }
 0x52d   :  { %7060 = vrcp.f32 %v3193_v21 }
 0x52e   :  { %v3196_v22 = vpop.xlane.xlu1 %3195  ;;  %6460 = vmatmul.mubr.msk.bf16.vlgmr.msra.gmra.mrb[108].mxu0 %vm2746_vm2, %v3459_v11 }
 0x52f   :  { %v7057_v52 = vpop.eup %7056  ;;  %7062 = vrcp.f32 %v3196_v22  ;;  %6470 = vmatpush3.bf16.msra.mxu0 %v9164_v49  ;;  %1229 = vrot.lane.b32.xlu0 %v9152_v18, %s7352_s9  ;;  %v9166_v22 = vld [vmem:[#allocation32_spill] sm:$0xff] }
 0x530   :  { %6471 = vmatprep.mubr.msk.bf16.mxu0 %vm7350_vm0, %v9141_v32  ;;  %6481 = vmatprep.subr.bf16.mxu0 %v9141_v32  ;;  %v3405_v59 = vmul.f32 %v7057_v52, %v8526_v26 }
 0x531   :  { %v7059_v4 = vpop.eup %7058 }
 0x532   :  { %v3406_v2 = vmul.f32 %v7059_v4, %v8530_v14 }
 0x534   :  { %v3199_v34 = vpop.xlane.xlu0 %3198  ;;  %v3460_v35 = vpack.c.bf16 %v3406_v2, %v3405_v59 }
 0x535   :  { %7064 = vrcp.f32 %v3199_v34 }
 0x536   :  { %v3202_v43 = vpop.xlane.xlu1 %3201  ;;  %6466 = vmatmul.mubr.msk.bf16.vlgmr.msra.gmra.mrb[100].mxu1 %vm2746_vm2, %v3460_v35 }
 0x537   :  { %v7061_v30 = vpop.eup %7060  ;;  %7066 = vrcp.f32 %v3202_v43  ;;  %6476 = vmatpush3.bf16.msra.mxu1 %v9165_v6  ;;  %6477 = vmatprep.mubr.msk.bf16.mxu1 %vm7350_vm0, %v9141_v32 }
 0x538   :  { %v3205_v18 = vpop.xlane.xlu0 %3204  ;;  %6487 = vmatprep.subr.bf16.mxu1 %v9141_v32  ;;  %v3407_v26 = vmul.f32 %v7061_v30, %v8537_v39 }
 0x539   :  { %v7063_v20 = vpop.eup %7062  ;;  %7068 = vrcp.f32 %v3205_v18  ;;  %v9167_v18 = vld [vmem:[#allocation29_spill] sm:$0xff] }
 0x53a   :  { %v3408_v14 = vmul.f32 %v7063_v20, %v8542_v5  ;;  %v3208_v63 = vpop.xlane.xlu1 %3207 }
 0x53b   :  { %7070 = vrcp.f32 %v3208_v63  ;;  %v9168_v63 = vld [vmem:[#allocation34_spill] sm:$0xff] }
 0x53c   :  { %v3211_v51 = vpop.xlane.xlu0 %3210  ;;  %v3461_v1 = vpack.c.bf16 %v3408_v14, %v3407_v26 }
 0x53d   :  { %7072 = vrcp.f32 %v3211_v51 }
 0x53e   :  { %v3214_v21 = vpop.xlane.xlu1 %3213  ;;  %6472 = vmatmul.mubr.msk.bf16.vlgmr.msra.gmra.mrb[112].mxu0 %vm2746_vm2, %v3461_v1 }
 0x53f   :  { %v7065_v11 = vpop.eup %7064  ;;  %7074 = vrcp.f32 %v3214_v21  ;;  %6482 = vmatpush3.bf16.msra.mxu0 %v9166_v22  ;;  %6483 = vmatprep.mubr.msk.bf16.mxu0 %vm7350_vm0, %v9141_v32 }
 0x540   :  { %v3217_v52 = vpop.xlane.xlu0 %3216  ;;  %6493 = vmatprep.subr.bf16.mxu0 %v9141_v32  ;;  %v3409_v5 = vmul.f32 %v7065_v11, %v8549_v57  ;;  %v9169_v11 = vld [vmem:[#allocation31_spill] sm:$0xff] }
 0x541   :  { %v7067_v39 = vpop.eup %7066  ;;  %7076 = vrcp.f32 %v3217_v52 }
 0x542   :  { %v3410_v49 = vmul.f32 %v7067_v39, %v8554_v28  ;;  %v3220_v4 = vpop.xlane.xlu1 %3219 }
 0x543   :  { %v7069_v59 = vpop.eup %7068  ;;  %7078 = vrcp.f32 %v3220_v4 }
 0x544   :  { %v3462_v2 = vpack.c.bf16 %v3410_v49, %v3409_v5  ;;  %v3411_v35 = vmul.f32 %v7069_v59, %v8559_v29  ;;  %v3223_v30 = vpop.xlane.xlu0 %3222  ;;  %v9170_v5 = vld [vmem:[#allocation36_spill] sm:$0xff] }
 0x545   :  { %v7071_v34 = vpop.eup %7070 }
 0x546   :  { %v3412_v43 = vmul.f32 %v7071_v34, %v8564_v0  ;;  %6478 = vmatmul.mubr.msk.bf16.vlgmr.msra.gmra.mrb[104].mxu1 %vm2746_vm2, %v3462_v2 }
 0x547   :  { %v7073_v6 = vpop.eup %7072  ;;  %6488 = vmatpush3.bf16.msra.mxu1 %v9167_v18  ;;  %6489 = vmatprep.mubr.msk.bf16.mxu1 %vm7350_vm0, %v9141_v32 }
 0x548   :  { %v3229_v57 = vpop.xlane.xlu1 %3228  ;;  %v3463_v28 = vpack.c.bf16 %v3412_v43, %v3411_v35  ;;  %6499 = vmatprep.subr.bf16.mxu1 %v9141_v32  ;;  %v3413_v26 = vmul.f32 %v7073_v6, %v8569_v33 }
 0x549   :  { %v7075_v20 = vpop.eup %7074  ;;  %7080 = vrcp.f32 %v3229_v57  ;;  %v9171_v57 = vld [vmem:[#allocation38_spill] sm:$0xff] }
 0x54a   :  { %v3414_v29 = vmul.f32 %v7075_v20, %v8574_v36  ;;  %7082 = vrcp.f32 %v3223_v30  ;;  %6484 = vmatmul.mubr.msk.bf16.vlgmr.msra.gmra.mrb[116].mxu0 %vm2746_vm2, %v3463_v28  ;;  %v3232_v0 = vpop.xlane.xlu0 %3231 }
 0x54b   :  { %v7077_v14 = vpop.eup %7076  ;;  %6494 = vmatpush3.bf16.msra.mxu0 %v9168_v63  ;;  %7084 = vrcp.f32 %v3232_v0  ;;  %6495 = vmatprep.mubr.msk.bf16.mxu0 %vm7350_vm0, %v9141_v32 }
 0x54c   :  { %v3226_v51 = vpop.xlane.xlu1 %3225  ;;  %v3464_v1 = vpack.c.bf16 %v3414_v29, %v3413_v26  ;;  %6505 = vmatprep.subr.bf16.mxu0 %v9141_v32  ;;  %v3415_v33 = vmul.f32 %v7077_v14, %v8578_v46 }
 0x54d   :  { %v7079_v21 = vpop.eup %7078  ;;  %7086 = vrcp.f32 %v3226_v51 }
 0x54e   :  { %v3416_v36 = vmul.f32 %v7079_v21, %v8582_v45  ;;  %6490 = vmatmul.mubr.msk.bf16.vlgmr.msra.gmra.mrb[108].mxu1 %vm2746_vm2, %v3464_v1 }
 0x54f   :  { %6500 = vmatpush3.bf16.msra.mxu1 %v9169_v11  ;;  %6501 = vmatprep.mubr.msk.bf16.mxu1 %vm7350_vm0, %v9141_v32 }
 0x550   :  { %v3465_v22 = vpack.c.bf16 %v3416_v36, %v3415_v33  ;;  %6511 = vmatprep.subr.bf16.mxu1 %v9141_v32  ;;  %v3235_v52 = vpop.xlane.xlu0 %3234  ;;  %v9173_v36 = vld [vmem:[#allocation40_spill] sm:$0xff] }
 0x552   :  { %6496 = vmatmul.mubr.msk.bf16.vlgmr.msra.gmra.mrb[120].mxu0 %vm2746_vm2, %v3465_v22 }
 0x553   :  { %v7081_v39 = vpop.eup %7080  ;;  %6506 = vmatpush3.bf16.msra.mxu0 %v9170_v5  ;;  %6507 = vmatprep.mubr.msk.bf16.mxu0 %vm7350_vm0, %v9141_v32 }
 0x554   :  { %v7083_v46 = vpop.eup %7082  ;;  %v3241_v45 = vpop.xlane.xlu1 %3240  ;;  %6517 = vmatprep.subr.bf16.mxu0 %v9141_v32  ;;  %v3419_v4 = vmul.f32 %v7081_v39, %v8595_v16  ;;  %v9172_v16 = vld [vmem:[#allocation33_spill] sm:$0xff] }
 0x555   :  { %v7085_v49 = vpop.eup %7084  ;;  %7088 = vrcp.f32 %v3241_v45  ;;  %v3417_v35 = vmul.f32 %v7083_v46, %v8587_v44 }
 0x556   :  { %v3420_v59 = vmul.f32 %v7085_v49, %v8600_v48  ;;  %7090 = vrcp.f32 %v3235_v52  ;;  %v3244_v2 = vpop.xlane.xlu0 %3243 }
 0x557   :  { %v7087_v34 = vpop.eup %7086  ;;  %7092 = vrcp.f32 %v3244_v2 }
 0x558   :  { %v3418_v43 = vmul.f32 %v7087_v34, %v8593_v62  ;;  %v3238_v30 = vpop.xlane.xlu1 %3237  ;;  %v3467_v6 = vpack.c.bf16 %v3420_v59, %v3419_v4  ;;  %v9175_v34 = vld [vmem:[#allocation42_spill] sm:$0xff] }
 0x559   :  { %7094 = vrcp.f32 %v3238_v30 }
 0x55a   :  { %6508 = vmatmul.mubr.msk.bf16.vlgmr.msra.gmra.mrb[124].mxu0 %vm2746_vm2, %v3467_v6  ;;  %v3466_v18 = vpack.c.bf16 %v3418_v43, %v3417_v35 }
 0x55b   :  { %6518 = vmatpush3.bf16.msra.mxu0 %v9171_v57  ;;  %6519 = vmatprep.mubr.msk.bf16.mxu0 %vm7350_vm0, %v9141_v32 }
 0x55c   :  { %6502 = vmatmul.mubr.msk.bf16.vlgmr.msra.gmra.mrb[112].mxu1 %vm2746_vm2, %v3466_v18  ;;  %6529 = vmatprep.subr.bf16.mxu0 %v9141_v32  ;;  %v3247_v44 = vpop.xlane.xlu0 %3246  ;;  %v9177_v18 = vld [vmem:[#allocation48_spill] sm:$0xff] }
 0x55d   :  { %6512 = vmatpush3.bf16.msra.mxu1 %v9172_v16  ;;  %6513 = vmatprep.mubr.msk.bf16.mxu1 %vm7350_vm0, %v9141_v32 }
 0x55e   :  { %6523 = vmatprep.subr.bf16.mxu1 %v9141_v32 }
 0x55f   :  { %v7089_v62 = vpop.eup %7088 }
 0x560   :  { %v7091_v48 = vpop.eup %7090  ;;  %v3253_v28 = vpop.xlane.xlu1 %3252  ;;  %v3423_v26 = vmul.f32 %v7089_v62, %v8622_v60  ;;  %v9174_v60 = vld [vmem:[#allocation35_spill] sm:$0xff] }
 0x561   :  { %v7093_v20 = vpop.eup %7092  ;;  %7096 = vrcp.f32 %v3253_v28  ;;  %v3421_v63 = vmul.f32 %v7091_v48, %v8609_v31 }
 0x562   :  { %v3424_v29 = vmul.f32 %v7093_v20, %v8627_v55  ;;  %7098 = vrcp.f32 %v3247_v44  ;;  %v3256_v0 = vpop.xlane.xlu0 %3255  ;;  %v9178_v20 = vld [vmem:[#allocation44_spill] sm:$0xff] }
 0x563   :  { %v7095_v14 = vpop.eup %7094  ;;  %7100 = vrcp.f32 %v3256_v0 }
 0x564   :  { %v3422_v51 = vmul.f32 %v7095_v14, %v8620_v61  ;;  %v3250_v1 = vpop.xlane.xlu1 %3249  ;;  %v3469_v21 = vpack.c.bf16 %v3424_v29, %v3423_v26 }
 0x565   :  { %7102 = vrcp.f32 %v3250_v1 }
 0x566   :  { %6520 = vmatmul.mubr.msk.bf16.vlgmr.msra.gmra.mrb[128].mxu0 %vm2746_vm2, %v3469_v21  ;;  %v3468_v33 = vpack.c.bf16 %v3422_v51, %v3421_v63 }
 0x567   :  { %6530 = vmatpush3.bf16.msra.mxu0 %v9173_v36  ;;  %6531 = vmatprep.mubr.msk.bf16.mxu0 %vm7350_vm0, %v9141_v32 }
 0x568   :  { %6514 = vmatmul.mubr.msk.bf16.vlgmr.msra.gmra.mrb[116].mxu1 %vm2746_vm2, %v3468_v33  ;;  %6541 = vmatprep.subr.bf16.mxu0 %v9141_v32  ;;  %v3259_v31 = vpop.xlane.xlu0 %3258 }
 0x569   :  { %6524 = vmatpush3.bf16.msra.mxu1 %v9174_v60  ;;  %6525 = vmatprep.mubr.msk.bf16.mxu1 %vm7350_vm0, %v9141_v32 }
 0x56a   :  { %6535 = vmatprep.subr.bf16.mxu1 %v9141_v32 }
 0x56b   :  { %v7097_v61 = vpop.eup %7096 }
 0x56c   :  { %v7099_v55 = vpop.eup %7098  ;;  %v3265_v11 = vpop.xlane.xlu1 %3264  ;;  %v3427_v52 = vmul.f32 %v7097_v61, %v8649_v13  ;;  %v9176_v13 = vld [vmem:[#allocation37_spill] sm:$0xff]  ;;  %v9180_v61 = vld [vmem:[#allocation43_spill] sm:$0xff] }
 0x56d   :  { %v7101_v22 = vpop.eup %7100  ;;  %7104 = vrcp.f32 %v3265_v11  ;;  %v3425_v45 = vmul.f32 %v7099_v55, %v8636_v47 }
 0x56e   :  { %v3428_v39 = vmul.f32 %v7101_v22, %v8654_v7  ;;  %7106 = vrcp.f32 %v3259_v31  ;;  %v3268_v5 = vpop.xlane.xlu0 %3267 }
 0x56f   :  { %v7103_v46 = vpop.eup %7102  ;;  %7108 = vrcp.f32 %v3268_v5 }
 0x570   :  { %v3426_v49 = vmul.f32 %v7103_v46, %v8647_v38  ;;  %v3262_v4 = vpop.xlane.xlu1 %3261  ;;  %v3471_v59 = vpack.c.bf16 %v3428_v39, %v3427_v52 }
 0x571   :  { %7110 = vrcp.f32 %v3262_v4 }
 0x572   :  { %6532 = vmatmul.mubr.msk.bf16.vlgmr.msra.gmra.mrb[132].mxu0 %vm2746_vm2, %v3471_v59  ;;  %v3470_v2 = vpack.c.bf16 %v3426_v49, %v3425_v45 }
 0x573   :  { %6542 = vmatpush3.bf16.msra.mxu0 %v9175_v34  ;;  %6543 = vmatprep.mubr.msk.bf16.mxu0 %vm7350_vm0, %v9141_v32 }
 0x574   :  { %6526 = vmatmul.mubr.msk.bf16.vlgmr.msra.gmra.mrb[120].mxu1 %vm2746_vm2, %v3470_v2  ;;  %6553 = vmatprep.subr.bf16.mxu0 %v9141_v32 }
 0x575   :  { %6536 = vmatpush3.bf16.msra.mxu1 %v9176_v13  ;;  %6537 = vmatprep.mubr.msk.bf16.mxu1 %vm7350_vm0, %v9141_v32 }
 0x576   :  { %6547 = vmatprep.subr.bf16.mxu1 %v9141_v32 }
 0x577   :  { %v7105_v47 = vpop.eup %7104 }
 0x578   :  { %v7107_v38 = vpop.eup %7106  ;;  %v3431_v35 = vmul.f32 %v7105_v47, %v8674_v3  ;;  %v3271_v30 = vpop.xlane.xlu0 %3270 }
 0x579   :  { %v7109_v7 = vpop.eup %7108  ;;  %v3429_v57 = vmul.f32 %v7107_v38, %v9177_v18 }
 0x57a   :  { %v3432_v43 = vmul.f32 %v7109_v7, %v8679_v25 }
 0x57b   :  { %v7111_v6 = vpop.eup %7110 }
 0x57c   :  { %v3430_v16 = vmul.f32 %v7111_v6, %v8672_v10  ;;  %v3277_v44 = vpop.xlane.xlu1 %3276  ;;  %v3473_v62 = vpack.c.bf16 %v3432_v43, %v3431_v35  ;;  %v9179_v10 = vld [vmem:[#allocation39_spill] sm:$0xff]  ;;  %v9182_v43 = vld [vmem:[#allocation46_spill] sm:$0xff] }
 0x57d   :  { %7112 = vrcp.f32 %v3277_v44 }
 0x57e   :  { %7114 = vrcp.f32 %v3271_v30  ;;  %6544 = vmatmul.mubr.msk.bf16.vlgmr.msra.gmra.mrb[136].mxu0 %vm2746_vm2, %v3473_v62  ;;  %v3280_v48 = vpop.xlane.xlu0 %3279  ;;  %v3472_v28 = vpack.c.bf16 %v3430_v16, %v3429_v57 }
 0x57f   :  { %6554 = vmatpush3.bf16.msra.mxu0 %v9178_v20  ;;  %7116 = vrcp.f32 %v3280_v48  ;;  %6555 = vmatprep.mubr.msk.bf16.mxu0 %vm7350_vm0, %v9141_v32 }
 0x580   :  { %v3274_v3 = vpop.xlane.xlu1 %3273  ;;  %6538 = vmatmul.mubr.msk.bf16.vlgmr.msra.gmra.mrb[124].mxu1 %vm2746_vm2, %v3472_v28  ;;  %6565 = vmatprep.subr.bf16.mxu0 %v9141_v32 }
 0x581   :  { %7118 = vrcp.f32 %v3274_v3  ;;  %6548 = vmatpush3.bf16.msra.mxu1 %v9179_v10  ;;  %6549 = vmatprep.mubr.msk.bf16.mxu1 %vm7350_vm0, %v9141_v32 }
 0x582   :  { %6559 = vmatprep.subr.bf16.mxu1 %v9141_v32 }
 0x587   :  { %v7113_v25 = vpop.eup %7112 }
 0x588   :  { %v7115_v26 = vpop.eup %7114  ;;  %v3435_v0 = vmul.f32 %v7113_v25, %v8708_v56  ;;  %v3283_v63 = vpop.xlane.xlu0 %3282 }
 0x589   :  { %v7117_v29 = vpop.eup %7116  ;;  %v3433_v1 = vmul.f32 %v7115_v26, %v8697_v9  ;;  %v9181_v9 = vld [vmem:[#allocation41_spill] sm:$0xff] }
 0x58a   :  { %v3436_v14 = vmul.f32 %v7117_v29, %v8713_v12 }
 0x58b   :  { %v7119_v51 = vpop.eup %7118 }
 0x58c   :  { %v3434_v21 = vmul.f32 %v7119_v51, %v8706_v58  ;;  %v3289_v33 = vpop.xlane.xlu1 %3288  ;;  %v3475_v36 = vpack.c.bf16 %v3436_v14, %v3435_v0  ;;  %v6844_v14 = vld [vmem:[#allocation10] sm:$0xff]  }
 0x58d   :  { %7120 = vrcp.f32 %v3289_v33 }
 0x58e   :  { %7122 = vrcp.f32 %v3283_v63  ;;  %6556 = vmatmul.mubr.msk.bf16.vlgmr.msra.gmra.mrb[140].mxu0 %vm2746_vm2, %v3475_v36  ;;  %v3292_v60 = vpop.xlane.xlu0 %3291  ;;  %v3474_v31 = vpack.c.bf16 %v3434_v21, %v3433_v1  ;;  %v9184_v21 = vld [vmem:[#allocation47_spill] sm:$0xff] }
 0x58f   :  { %6566 = vmatpush3.bf16.msra.mxu0 %v9180_v61  ;;  %7124 = vrcp.f32 %v3292_v60  ;;  %6567 = vmatprep.mubr.msk.bf16.mxu0 %vm7350_vm0, %v9141_v32 }
 0x590   :  { %v3286_v56 = vpop.xlane.xlu1 %3285  ;;  %6550 = vmatmul.mubr.msk.bf16.vlgmr.msra.gmra.mrb[128].mxu1 %vm2746_vm2, %v3474_v31  ;;  %6577 = vmatprep.subr.bf16.mxu0 %v9141_v32 }
 0x591   :  { %7126 = vrcp.f32 %v3286_v56  ;;  %6560 = vmatpush3.bf16.msra.mxu1 %v9181_v9  ;;  %6561 = vmatprep.mubr.msk.bf16.mxu1 %vm7350_vm0, %v9141_v32 }
 0x592   :  { %6571 = vmatprep.subr.bf16.mxu1 %v9141_v32 }
 0x594   :  { %v8931_v58 = vpop.f32.mrb[92].mxu0  ;;  %v3295_v55 = vpop.xlane.xlu0 %3294 }
 0x595   :  { %v6413_v12 = vpop.f32.mrb[93].mxu0 }
 0x596   :  { %v8933_v11 = vpop.f32.mrb[94].mxu0 }
 0x597   :  { %v7121_v22 = vpop.eup %7120  ;;  %v4891_v52 = vpack.c.bf16 %v8933_v11, %v8931_v58  ;;  %v6414_v39 = vpop.f32.mrb[95].mxu0  ;;  %v6849_v58 = vld [vmem:[#allocation10 + $0x18] sm:$0xff]  }
 0x598   :  { %v7123_v5 = vpop.eup %7122  ;;  %v3301_v46 = vpop.xlane.xlu1 %3300  ;;  %v3439_v49 = vmul.f32 %v7121_v22, %v8744_v24  ;;  %v6845_v22 = vld [vmem:[#allocation10 + $0x8] sm:$0xff]  }
 0x599   :  { %v7125_v45 = vpop.eup %7124  ;;  %7128 = vrcp.f32 %v3301_v46  ;;  %v3437_v34 = vmul.f32 %v7123_v5, %v8732_v15  ;;  %v6846_v5 = vld [vmem:[#allocation11] sm:$0xff]  }
 0x59a   :  { %v3440_v4 = vmul.f32 %v7125_v45, %v8749_v40  ;;  %7130 = vrcp.f32 %v3295_v55  ;;  %v3304_v59 = vpop.xlane.xlu0 %3303 }
 0x59b   :  { %v7127_v2 = vpop.eup %7126  ;;  %7132 = vrcp.f32 %v3304_v59  ;;  %v6847_v59 = vld [vmem:[#allocation11 + $0x8] sm:$0xff]  }
 0x59c   :  { %v3438_v13 = vmul.f32 %v7127_v2, %v8742_v50  ;;  %v3298_v47 = vpop.xlane.xlu1 %3297  ;;  %v3477_v38 = vpack.c.bf16 %v3440_v4, %v3439_v49  ;;  %v9183_v50 = vld [vmem:[#allocation45_spill] sm:$0xff] }
 0x59d   :  { %7134 = vrcp.f32 %v3298_v47 }
 0x59e   :  { %6568 = vmatmul.mubr.msk.bf16.vlgmr.msra.gmra.mrb[144].mxu0 %vm2746_vm2, %v3477_v38  ;;  %v3307_v7 = vpop.xlane.xlu0 %3306  ;;  %v3476_v35 = vpack.c.bf16 %v3438_v13, %v3437_v34 }
 0x59f   :  { %6578 = vmatpush3.bf16.msra.mxu0 %v9182_v43  ;;  %6579 = vmatprep.mubr.msk.bf16.mxu0 %vm7350_vm0, %v9141_v32 }
 0x5a0   :  { %v8945_v24 = vpop.f32.mrb[84].mxu1  ;;  %v3313_v40 = vpop.xlane.xlu1 %3312  ;;  %6562 = vmatmul.mubr.msk.bf16.vlgmr.msra.gmra.mrb[132].mxu1 %vm2746_vm2, %v3476_v35  ;;  %6589 = vmatprep.subr.bf16.mxu0 %v9141_v32 }
 0x5a1   :  { %v6419_v15 = vpop.f32.mrb[85].mxu1  ;;  %7136 = vrcp.f32 %v3313_v40  ;;  %6572 = vmatpush3.bf16.msra.mxu1 %v9183_v50  ;;  %6573 = vmatprep.mubr.msk.bf16.mxu1 %vm7350_vm0, %v9141_v32 }
 0x5a2   :  { %7138 = vrcp.f32 %v3307_v7  ;;  %v8952_v30 = vpop.f32.mrb[86].mxu1  ;;  %v3316_v6 = vpop.xlane.xlu0 %3315  ;;  %6583 = vmatprep.subr.bf16.mxu1 %v9141_v32  ;;  %v6850_v7 = vld [vmem:[#allocation11 + $0x10] sm:$0xff]  }
 0x5a3   :  { %v7129_v18 = vpop.eup %7128  ;;  %v4892_v57 = vpack.c.bf16 %v8952_v30, %v8945_v24  ;;  %v6420_v16 = vpop.f32.mrb[87].mxu1  ;;  %7140 = vrcp.f32 %v3316_v6  ;;  %v6851_v30 = vld [vmem:[#allocation11 + $0x18] sm:$0xff]  }
 0x5a4   :  { %v7131_v44 = vpop.eup %7130  ;;  %v3310_v62 = vpop.xlane.xlu1 %3309  ;;  %v3443_v28 = vmul.f32 %v7129_v18, %v8771_v53 }
 0x5a5   :  { %v7133_v48 = vpop.eup %7132  ;;  %7142 = vrcp.f32 %v3310_v62  ;;  %v3441_v25 = vmul.f32 %v7131_v44, %v8760_v19  ;;  %v6854_v44 = vld [vmem:[#allocation11 + $0x20] sm:$0xff]  }
 0x5a6   :  { %v3444_v20 = vmul.f32 %v7133_v48, %v8778_v17  ;;  %v3319_v3 = vpop.xlane.xlu0 %3318 }
 0x5a7   :  { %v7135_v10 = vpop.eup %7134 }
 0x5a8   :  { %v3442_v26 = vmul.f32 %v7135_v10, %v8774_v54  ;;  %v3322_v29 = vpop.xlane.xlu1 %3321  ;;  %v3479_v0 = vpack.c.bf16 %v3444_v20, %v3443_v28 }
 0x5a9   :  { %7144 = vrcp.f32 %v3322_v29 }
 0x5aa   :  { %6580 = vmatmul.mubr.msk.bf16.vlgmr.msra.gmra.mrb[148].mxu0 %vm2746_vm2, %v3479_v0  ;;  %v1230_v63 = vpop.permute.xlu0 %1229  ;;  %v3478_v51 = vpack.c.bf16 %v3442_v26, %v3441_v25  ;;  %7146 = vrcp.f32 %v3319_v3 }
 0x5ab   :  { %v7137_v1 = vpop.eup %7136  ;;  %6590 = vmatpush3.bf16.msra.mxu0 %v1230_v63  ;;  %6591 = vmatprep.mubr.msk.bf16.mxu0 %vm7350_vm0, %v9141_v32 }
 0x5ac   :  { %v7139_v53 = vpop.eup %7138  ;;  %v3608_v17 = vpop.f32.mrb[96].mxu0  ;;  %6574 = vmatmul.mubr.msk.bf16.vlgmr.msra.gmra.mrb[136].mxu1 %vm2746_vm2, %v3478_v51  ;;  %6601 = vmatprep.subr.bf16.mxu0 %v6844_v14  ;;  %v3447_v33 = vmul.f32 %v7137_v1, %v8788_v27 }
 0x5ad   :  { %v7141_v19 = vpop.eup %7140  ;;  %v6425_v54 = vpop.f32.mrb[97].mxu0  ;;  %6584 = vmatpush3.bf16.msra.mxu1 %v9184_v21  ;;  %6585 = vmatprep.mubr.msk.bf16.mxu1 %vm7350_vm0, %v9141_v32  ;;  %v3445_v9 = vmul.f32 %v7139_v53, %v8782_v42  ;;  %v6848_v42 = vld [vmem:[#allocation10 + $0x10] sm:$0xff]  }
 0x5ae   :  { %v3448_v36 = vmul.f32 %v7141_v19, %v8794_v37  ;;  %v3611_v60 = vpop.f32.mrb[98].mxu0  ;;  %6595 = vmatprep.subr.bf16.mxu1 %v9141_v32  ;;  %v1232_v27 = vpop.permute.xlu1 %1231  ;;  %v8996_v19 = vld [vmem:[#allocation10 + $0x30] sm:$0xff]  }
 0x5af   :  { %v7143_v31 = vpop.eup %7142  ;;  %v4893_v61 = vpack.c.bf16 %v3611_v60, %v3608_v17  ;;  %v6426_v56 = vpop.f32.mrb[99].mxu0  ;;  %v6853_v17 = vld [vmem:[#allocation10 + $0x28] sm:$0xff]  }
 0x5b0   :  { %v3446_v12 = vmul.f32 %v7143_v31, %v8790_v8  ;;  %v3481_v55 = vpack.c.bf16 %v3448_v36, %v3447_v33 }
 0x5b2   :  { %6592 = vmatmul.mubr.msk.bf16.vlgmr.msra.gmra.mrb[152].mxu0 %vm2746_vm2, %v3481_v55  ;;  %v3480_v39 = vpack.c.bf16 %v3446_v12, %v3445_v9 }
 0x5b3   :  { %v7145_v46 = vpop.eup %7144  ;;  %6602 = vmatpush3.bf16.msra.mxu0 %v6844_v14  ;;  %6605 = vmatprep.mubr.msk.bf16.mxu0 %vm1241_vm1, %v4891_v52 }
 0x5b4   :  { %6586 = vmatmul.mubr.msk.bf16.vlgmr.msra.gmra.mrb[140].mxu1 %vm2746_vm2, %v3480_v39  ;;  %6603 = vmatprep.subr.bf16.mxu0 %v6845_v22  ;;  %v7147_v37 = vpop.eup %7146  ;;  %v3450_v8 = vmul.f32 %v7145_v46, %v8802_v41 }
 0x5b5   :  { %6596 = vmatpush3.bf16.msra.mxu1 %v1232_v27  ;;  %6597 = vmatprep.mubr.msk.bf16.mxu1 %vm7350_vm0, %v9141_v32  ;;  %v3449_v45 = vmul.f32 %v7147_v37, %v8798_v23  ;;  %v6852_v23 = vld [vmem:[#allocation10 + $0x20] sm:$0xff]  }
 0x5b6   :  { %6613 = vmatprep.subr.bf16.mxu1 %v6846_v5 }
 0x5b7   :  { %6604 = vmatpush3.bf16.msra.mxu0 %v6845_v22  ;;  %v3482_v4 = vpack.c.bf16 %v3450_v8, %v3449_v45 }
 0x5b8   :  { %v3652_v49 = vpop.f32.mrb[88].mxu1  ;;  %6625 = vmatprep.subr.bf16.mxu0 %v6848_v42 }
 0x5b9   :  { %v6431_v11 = vpop.f32.mrb[89].mxu1 }
 0x5ba   :  { %v3655_v52 = vpop.f32.mrb[90].mxu1  ;;  %6606 = vmatmul.mubr.msk.bf16.vlgmr.msra.gmra.mrb[156].mxu0 %vm1241_vm1, %v4892_v57 }
 0x5bb   :  { %v4894_v2 = vpack.c.bf16 %v3655_v52, %v3652_v49  ;;  %v6432_v32 = vpop.f32.mrb[91].mxu1  ;;  %v3696_v34 = vpop.f32.mrb[100].mxu0  ;;  %6609 = vmatprep.mubr.msk.bf16.mxu0 %vm1241_vm1, %v4893_v61  ;;  %6626 = vmatpush3.bf16.msra.mxu0 %v6848_v42  ;;  %v6855_v49 = vld [vmem:[#allocation11 + $0x28] sm:$0xff]  }
 0x5bc   :  { %v6437_v41 = vpop.f32.mrb[101].mxu0  ;;  %6598 = vmatmul.mubr.msk.bf16.vlgmr.msra.gmra.mrb[144].mxu1 %vm2746_vm2, %v3482_v4  ;;  %6627 = vmatprep.subr.bf16.mxu0 %v6849_v58 }
 0x5bd   :  { %v3699_v13 = vpop.f32.mrb[102].mxu0  ;;  %6614 = vmatpush3.bf16.msra.mxu1 %v6846_v5 }
 0x5be   :  { %v4895_v47 = vpack.c.bf16 %v3699_v13, %v3696_v34  ;;  %v6438_v38 = vpop.f32.mrb[103].mxu0  ;;  %6615 = vmatprep.subr.bf16.mxu1 %v6847_v59 }
 0x5bf   :  { %6628 = vmatpush3.bf16.msra.mxu0 %v6849_v58 }
 0x5c0   :  { %6617 = vmatprep.mubr.msk.bf16.mxu1 %vm1241_vm1, %v4895_v47  ;;  %6649 = vmatprep.subr.bf16.mxu0 %v6852_v23 }
 0x5c1   :  { %6616 = vmatpush3.bf16.msra.mxu1 %v6847_v59 }
 0x5c2   :  { %6610 = vmatmul.mubr.msk.bf16.gmra.mrb[160].mxu0 %vm1241_vm1, %v4894_v2  ;;  %6637 = vmatprep.subr.bf16.mxu1 %v6850_v7  ;;  %v6858_v2 = vld [vmem:[#allocation11 + $0x30] sm:$0xff]  }
 0x5c8   :  { %v3740_v35 = vpop.f32.mrb[92].mxu1 }
 0x5c9   :  { %v6443_v43 = vpop.f32.mrb[93].mxu1 }
 0x5ca   :  { %v3743_v24 = vpop.f32.mrb[94].mxu1 }
 0x5cb   :  { %v4896_v40 = vpack.c.bf16 %v3743_v24, %v3740_v35  ;;  %v6444_v15 = vpop.f32.mrb[95].mxu1  ;;  %v3784_v50 = vpop.f32.mrb[104].mxu0 }
 0x5cc   :  { %v6449_v6 = vpop.f32.mrb[105].mxu0 }
 0x5cd   :  { %6618 = vmatmul.mubr.msk.bf16.vlgmr.msra.gmra.mrb[148].mxu1 %vm1241_vm1, %v4896_v40  ;;  %v3787_v18 = vpop.f32.mrb[106].mxu0 }
 0x5ce   :  { %v4897_v57 = vpack.c.bf16 %v3787_v18, %v3784_v50  ;;  %v6450_v16 = vpop.f32.mrb[107].mxu0  ;;  %6638 = vmatpush3.bf16.msra.mxu1 %v6850_v7 }
 0x5cf   :  { %6639 = vmatprep.subr.bf16.mxu1 %v6851_v30 }
 0x5d0   :  { %6621 = vmatprep.mubr.msk.bf16.mxu1 %vm1241_vm1, %v4897_v57 }
 0x5d2   :  { %6640 = vmatpush3.bf16.msra.mxu1 %v6851_v30 }
 0x5d3   :  { %6661 = vmatprep.subr.bf16.mxu1 %v6854_v44 }
 0x5d8   :  { %v3828_v62 = vpop.f32.mrb[96].mxu1 }
 0x5d9   :  { %v6455_v48 = vpop.f32.mrb[97].mxu1 }
 0x5da   :  { %v3831_v28 = vpop.f32.mrb[98].mxu1 }
 0x5db   :  { %v4898_v20 = vpack.c.bf16 %v3831_v28, %v3828_v62  ;;  %v6456_v3 = vpop.f32.mrb[99].mxu1  ;;  %v6857_v62 = vld [vmem:[#allocation10 + $0x38] sm:$0xff]  }
 0x5dd   :  { %6622 = vmatmul.mubr.msk.bf16.gmra.mrb[152].mxu1 %vm1241_vm1, %v4898_v20 }
 0x601   :  { %v3872_v10 = vpop.f32.mrb[108].mxu0 }
 0x602   :  { %v6461_v25 = vpop.f32.mrb[109].mxu0 }
 0x603   :  { %v3875_v26 = vpop.f32.mrb[110].mxu0 }
 0x604   :  { %v4899_v29 = vpack.c.bf16 %v3875_v26, %v3872_v10  ;;  %v6462_v0 = vpop.f32.mrb[111].mxu0 }
 0x606   :  { %6629 = vmatprep.mubr.msk.bf16.mxu0 %vm1241_vm1, %v4899_v29 }
 0x609   :  { %v3916_v14 = vpop.f32.mrb[100].mxu1 }
 0x60a   :  { %v6467_v63 = vpop.f32.mrb[101].mxu1 }
 0x60b   :  { %v3919_v51 = vpop.f32.mrb[102].mxu1 }
 0x60c   :  { %v4900_v1 = vpack.c.bf16 %v3919_v51, %v3916_v14  ;;  %v6468_v53 = vpop.f32.mrb[103].mxu1 }
 0x60e   :  { %6630 = vmatmul.mubr.msk.bf16.vlgmr.msra.gmra.mrb[156].mxu0 %vm1241_vm1, %v4900_v1 }
 0x60f   :  { %6650 = vmatpush3.bf16.msra.mxu0 %v6852_v23 }
 0x610   :  { %6651 = vmatprep.subr.bf16.mxu0 %v6853_v17 }
 0x611   :  { %v3960_v54 = vpop.f32.mrb[112].mxu0 }
 0x612   :  { %v6473_v21 = vpop.f32.mrb[113].mxu0 }
 0x613   :  { %v3963_v33 = vpop.f32.mrb[114].mxu0  ;;  %6652 = vmatpush3.bf16.msra.mxu0 %v6853_v17 }
 0x614   :  { %v4901_v36 = vpack.c.bf16 %v3963_v33, %v3960_v54  ;;  %v6474_v60 = vpop.f32.mrb[115].mxu0  ;;  %6673 = vmatprep.subr.bf16.mxu0 %v8996_v19 }
 0x615   :  { %v6859_v60 = vld [vmem:[#allocation11 + $0x38] sm:$0xff]  }
 0x616   :  { %6633 = vmatprep.mubr.msk.bf16.mxu0 %vm1241_vm1, %v4901_v36 }
 0x619   :  { %v4004_v31 = vpop.f32.mrb[104].mxu1 }
 0x61a   :  { %v6479_v61 = vpop.f32.mrb[105].mxu1 }
 0x61b   :  { %v4007_v56 = vpop.f32.mrb[106].mxu1 }
 0x61c   :  { %v4902_v9 = vpack.c.bf16 %v4007_v56, %v4004_v31  ;;  %v6480_v12 = vpop.f32.mrb[107].mxu1 }
 0x61d   :  { %v4048_v55 = vpop.f32.mrb[116].mxu0 }
 0x61e   :  { %v6485_v22 = vpop.f32.mrb[117].mxu0  ;;  %6634 = vmatmul.mubr.msk.bf16.gmra.mrb[160].mxu0 %vm1241_vm1, %v4902_v9 }
 0x61f   :  { %v4051_v39 = vpop.f32.mrb[118].mxu0 }
 0x620   :  { %v4903_v5 = vpack.c.bf16 %v4051_v39, %v4048_v55  ;;  %v6486_v46 = vpop.f32.mrb[119].mxu0 }
 0x621   :  { %v4092_v27 = vpop.f32.mrb[108].mxu1 }
 0x622   :  { %v6491_v42 = vpop.f32.mrb[109].mxu1  ;;  %6641 = vmatprep.mubr.msk.bf16.mxu1 %vm1241_vm1, %v4903_v5 }
 0x623   :  { %v4095_v37 = vpop.f32.mrb[110].mxu1 }
 0x624   :  { %v4904_v8 = vpack.c.bf16 %v4095_v37, %v4092_v27  ;;  %v6492_v45 = vpop.f32.mrb[111].mxu1 }
 0x625   :  { %v4136_v58 = vpop.f32.mrb[120].mxu0 }
 0x626   :  { %v6497_v11 = vpop.f32.mrb[121].mxu0  ;;  %6642 = vmatmul.mubr.msk.bf16.vlgmr.msra.gmra.mrb[148].mxu1 %vm1241_vm1, %v4904_v8 }
 0x627   :  { %v4139_v52 = vpop.f32.mrb[122].mxu0  ;;  %6662 = vmatpush3.bf16.msra.mxu1 %v6854_v44 }
 0x628   :  { %v4905_v4 = vpack.c.bf16 %v4139_v52, %v4136_v58  ;;  %v6498_v59 = vpop.f32.mrb[123].mxu0  ;;  %6663 = vmatprep.subr.bf16.mxu1 %v6855_v49 }
 0x62a   :  { %6645 = vmatprep.mubr.msk.bf16.mxu1 %vm1241_vm1, %v4905_v4 }
 0x62b   :  { %6664 = vmatpush3.bf16.msra.mxu1 %v6855_v49 }
 0x62c   :  { %6685 = vmatprep.subr.bf16.mxu1 %v6858_v2 }
 0x62d   :  { %v4224_v32 = vpop.f32.mrb[124].mxu0 }
 0x62e   :  { %v6509_v34 = vpop.f32.mrb[125].mxu0 }
 0x62f   :  { %v4180_v41 = vpop.f32.mrb[112].mxu1  ;;  %v4227_v23 = vpop.f32.mrb[126].mxu0 }
 0x630   :  { %v4907_v13 = vpack.c.bf16 %v4227_v23, %v4224_v32  ;;  %v6503_v47 = vpop.f32.mrb[113].mxu1  ;;  %v6510_v38 = vpop.f32.mrb[127].mxu0 }
 0x631   :  { %v4183_v7 = vpop.f32.mrb[114].mxu1 }
 0x632   :  { %v4906_v35 = vpack.c.bf16 %v4183_v7, %v4180_v41  ;;  %v6504_v43 = vpop.f32.mrb[115].mxu1  ;;  %6653 = vmatprep.mubr.msk.bf16.mxu0 %vm1241_vm1, %v4907_v13 }
 0x634   :  { %6646 = vmatmul.mubr.msk.bf16.gmra.mrb[152].mxu1 %vm1241_vm1, %v4906_v35 }
 0x639   :  { %v4312_v24 = vpop.f32.mrb[128].mxu0 }
 0x63a   :  { %v6521_v40 = vpop.f32.mrb[129].mxu0 }
 0x63b   :  { %v4268_v15 = vpop.f32.mrb[116].mxu1  ;;  %v4315_v50 = vpop.f32.mrb[130].mxu0 }
 0x63c   :  { %v4909_v30 = vpack.c.bf16 %v4315_v50, %v4312_v24  ;;  %v6515_v6 = vpop.f32.mrb[117].mxu1  ;;  %v6522_v18 = vpop.f32.mrb[131].mxu0 }
 0x63d   :  { %v4271_v57 = vpop.f32.mrb[118].mxu1 }
 0x63e   :  { %v4908_v16 = vpack.c.bf16 %v4271_v57, %v4268_v15  ;;  %v6516_v44 = vpop.f32.mrb[119].mxu1 }
 0x640   :  { %6654 = vmatmul.mubr.msk.bf16.vlgmr.msra.gmra.mrb[156].mxu0 %vm1241_vm1, %v4908_v16 }
 0x641   :  { %6657 = vmatprep.mubr.msk.bf16.mxu0 %vm1241_vm1, %v4909_v30  ;;  %6674 = vmatpush3.bf16.msra.mxu0 %v8996_v19 }
 0x642   :  { %6675 = vmatprep.subr.bf16.mxu0 %v6857_v62 }
 0x645   :  { %v4400_v48 = vpop.f32.mrb[132].mxu0  ;;  %6676 = vmatpush3.bf16.msra.mxu0 %v6857_v62 }
 0x646   :  { %v6533_v28 = vpop.f32.mrb[133].mxu0 }
 0x647   :  { %v4356_v20 = vpop.f32.mrb[120].mxu1  ;;  %v4403_v3 = vpop.f32.mrb[134].mxu0 }
 0x648   :  { %v4911_v10 = vpack.c.bf16 %v4403_v3, %v4400_v48  ;;  %v6527_v25 = vpop.f32.mrb[121].mxu1  ;;  %v6534_v26 = vpop.f32.mrb[135].mxu0 }
 0x649   :  { %v4359_v29 = vpop.f32.mrb[122].mxu1 }
 0x64a   :  { %v4910_v0 = vpack.c.bf16 %v4359_v29, %v4356_v20  ;;  %v6528_v14 = vpop.f32.mrb[123].mxu1  ;;  %6665 = vmatprep.mubr.msk.bf16.mxu1 %vm1241_vm1, %v4911_v10  ;;  %v5925_v20 = vld [vmem:[%s9069_s11] ss:$0 sm:$0xff] }
 0x64c   :  { %6658 = vmatmul.mubr.msk.bf16.gmra.mrb[160].mxu0 %vm1241_vm1, %v4910_v0 }
 0x651   :  { %v4488_v63 = vpop.f32.mrb[136].mxu0 }
 0x652   :  { %v6545_v51 = vpop.f32.mrb[137].mxu0 }
 0x653   :  { %v4444_v1 = vpop.f32.mrb[124].mxu1  ;;  %v4491_v53 = vpop.f32.mrb[138].mxu0 }
 0x654   :  { %v4913_v17 = vpack.c.bf16 %v4491_v53, %v4488_v63  ;;  %v6539_v19 = vpop.f32.mrb[125].mxu1  ;;  %v6546_v54 = vpop.f32.mrb[139].mxu0 }
 0x655   :  { %v4447_v21 = vpop.f32.mrb[126].mxu1 }
 0x656   :  { %v4912_v33 = vpack.c.bf16 %v4447_v21, %v4444_v1  ;;  %v6540_v36 = vpop.f32.mrb[127].mxu1 }
 0x657   :  { %v5932_v36 = vld [vmem:[%s9071_s13] ss:$0 sm:$0xff] }
 0x658   :  { %6666 = vmatmul.mubr.msk.bf16.vlgmr.msra.gmra.mrb[148].mxu1 %vm1241_vm1, %v4912_v33 }
 0x659   :  { %6669 = vmatprep.mubr.msk.bf16.mxu1 %vm1241_vm1, %v4913_v17  ;;  %6686 = vmatpush3.bf16.msra.mxu1 %v6858_v2 }
 0x65a   :  { %6687 = vmatprep.subr.bf16.mxu1 %v6859_v60 }
 0x65d   :  { %6688 = vmatpush3.bf16.msra.mxu1 %v6859_v60 }
 0x661   :  { %v4576_v31 = vpop.f32.mrb[140].mxu0 }
 0x662   :  { %v6557_v61 = vpop.f32.mrb[141].mxu0 }
 0x663   :  { %v4532_v56 = vpop.f32.mrb[128].mxu1  ;;  %v4579_v9 = vpop.f32.mrb[142].mxu0 }
 0x664   :  { %v4915_v12 = vpack.c.bf16 %v4579_v9, %v4576_v31  ;;  %v6551_v55 = vpop.f32.mrb[129].mxu1  ;;  %v6558_v22 = vpop.f32.mrb[143].mxu0 }
 0x665   :  { %v4535_v39 = vpop.f32.mrb[130].mxu1 }
 0x666   :  { %v4914_v5 = vpack.c.bf16 %v4535_v39, %v4532_v56  ;;  %v6552_v46 = vpop.f32.mrb[131].mxu1  ;;  %6677 = vmatprep.mubr.msk.bf16.mxu0 %vm1241_vm1, %v4915_v12 }
 0x668   :  { %6670 = vmatmul.mubr.msk.bf16.gmra.mrb[152].mxu1 %vm1241_vm1, %v4914_v5 }
 0x671   :  { %v4664_v27 = vpop.f32.mrb[144].mxu0 }
 0x672   :  { %v6569_v42 = vpop.f32.mrb[145].mxu0 }
 0x673   :  { %v4620_v37 = vpop.f32.mrb[132].mxu1  ;;  %v4667_v8 = vpop.f32.mrb[146].mxu0 }
 0x674   :  { %v4917_v45 = vpack.c.bf16 %v4667_v8, %v4664_v27  ;;  %v6563_v49 = vpop.f32.mrb[133].mxu1  ;;  %v6570_v58 = vpop.f32.mrb[147].mxu0 }
 0x675   :  { %v4623_v11 = vpop.f32.mrb[134].mxu1 }
 0x676   :  { %v4916_v52 = vpack.c.bf16 %v4623_v11, %v4620_v37  ;;  %v6564_v4 = vpop.f32.mrb[135].mxu1 }
 0x678   :  { %6678 = vmatmul.mubr.msk.bf16.vlgmr.msra.gmra.mrb[156].mxu0 %vm1241_vm1, %v4916_v52 }
 0x679   :  { %6681 = vmatprep.mubr.msk.bf16.mxu0 %vm1241_vm1, %v4917_v45 }
 0x67d   :  { %v4752_v59 = vpop.f32.mrb[148].mxu0 }
 0x67e   :  { %v6581_v2 = vpop.f32.mrb[149].mxu0 }
 0x67f   :  { %v4708_v32 = vpop.f32.mrb[136].mxu1  ;;  %v4755_v34 = vpop.f32.mrb[150].mxu0 }
 0x680   :  { %v4919_v41 = vpack.c.bf16 %v4755_v34, %v4752_v59  ;;  %v6575_v23 = vpop.f32.mrb[137].mxu1  ;;  %v6582_v13 = vpop.f32.mrb[151].mxu0 }
 0x681   :  { %v4711_v47 = vpop.f32.mrb[138].mxu1 }
 0x682   :  { %v4918_v38 = vpack.c.bf16 %v4711_v47, %v4708_v32  ;;  %v6576_v7 = vpop.f32.mrb[139].mxu1  ;;  %6689 = vmatprep.mubr.msk.bf16.mxu1 %vm1241_vm1, %v4919_v41 }
 0x684   :  { %6682 = vmatmul.mubr.msk.bf16.gmra.mrb[160].mxu0 %vm1241_vm1, %v4918_v38 }
 0x685   :  { %v4840_v35 = vpop.f32.mrb[152].mxu0 }
 0x686   :  { %v6593_v43 = vpop.f32.mrb[153].mxu0 }
 0x687   :  { %v4796_v24 = vpop.f32.mrb[140].mxu1  ;;  %v4843_v40 = vpop.f32.mrb[154].mxu0 }
 0x688   :  { %v4921_v15 = vpack.c.bf16 %v4843_v40, %v4840_v35  ;;  %v6587_v50 = vpop.f32.mrb[141].mxu1  ;;  %v6594_v30 = vpop.f32.mrb[155].mxu0 }
 0x689   :  { %v4799_v6 = vpop.f32.mrb[142].mxu1 }
 0x68a   :  { %v4920_v18 = vpack.c.bf16 %v4799_v6, %v4796_v24  ;;  %v6588_v57 = vpop.f32.mrb[143].mxu1 }
 0x68c   :  { %6690 = vmatmul.mubr.msk.bf16.vlgmr.msra.gmra.mrb[148].mxu1 %vm1241_vm1, %v4920_v18 }
 0x68d   :  { %6693 = vmatprep.mubr.msk.bf16.mxu1 %vm1241_vm1, %v4921_v15 }
 0x68f   :  { %v4884_v16 = vpop.f32.mrb[144].mxu1 }
 0x690   :  { %v6599_v44 = vpop.f32.mrb[145].mxu1 }
 0x691   :  { %v4887_v62 = vpop.f32.mrb[146].mxu1 }
 0x692   :  { %v4922_v48 = vpack.c.bf16 %v4887_v62, %v4884_v16  ;;  %v6600_v28 = vpop.f32.mrb[147].mxu1 }
 0x694   :  { %6694 = vmatmul.mubr.msk.bf16.gmra.mrb[152].mxu1 %vm1241_vm1, %v4922_v48 }
 0x74b   :  { %v6679_v3 = vpop.f32.mrb[156].mxu0 }
 0x74c   :  { %v6697_v10 = vadd.f32 %v6679_v3, %v5925_v20  ;;  %v5610_v25 = vpop.f32.mrb[157].mxu0 }
 0x74d   :  { %v6698_v26 = vadd.f32 %v5925_v20, %v5610_v25  ;;  %v6680_v29 = vpop.f32.mrb[158].mxu0 }
 0x74e   :  { %5753 = vst [vmem:[#allocation13 + $0x10] sm:$0xff] %v6697_v10  ;;  %v6699_v0 = vadd.f32 %v6680_v29, %v5925_v20  ;;  %v5613_v14 = vpop.f32.mrb[159].mxu0 }
 0x74f   :  { %5751 = vst [vmem:[#allocation13] sm:$0xff] %v6698_v26  ;;  %v6700_v63 = vadd.f32 %v5925_v20, %v5613_v14 }
 0x750   :  { %5754 = vst [vmem:[#allocation13 + $0x18] sm:$0xff] %v6699_v0 }
 0x751   :  { %5752 = vst [vmem:[#allocation13 + $0x8] sm:$0xff] %v6700_v63 }
 0x757   :  { %v6683_v51 = vpop.f32.mrb[160].mxu0 }
 0x758   :  { %v6701_v1 = vadd.f32 %v6683_v51, %v5925_v20  ;;  %v5626_v53 = vpop.f32.mrb[161].mxu0 }
 0x759   :  { %v6702_v17 = vadd.f32 %v5925_v20, %v5626_v53  ;;  %v6684_v19 = vpop.f32.mrb[162].mxu0 }
 0x75a   :  { %5757 = vst [vmem:[#allocation13 + $0x30] sm:$0xff] %v6701_v1  ;;  %v6703_v54 = vadd.f32 %v6684_v19, %v5925_v20  ;;  %v5629_v21 = vpop.f32.mrb[163].mxu0 }
 0x75b   :  { %5755 = vst [vmem:[#allocation13 + $0x20] sm:$0xff] %v6702_v17  ;;  %v6704_v33 = vadd.f32 %v5925_v20, %v5629_v21 }
 0x75c   :  { %5758 = vst [vmem:[#allocation13 + $0x38] sm:$0xff] %v6703_v54 }
 0x75d   :  { %5756 = vst [vmem:[#allocation13 + $0x28] sm:$0xff] %v6704_v33 }
 0x75e   :  { %7291 = shalt.err (!%p7288_p10)
}
 0x75f   :  { %s7292_s20 = scalar_lea.hbm %s9072_s14, 1024 }
 0x760   :  { %p7293_p11 = scmp.ne.s32.totalorder %s9072_s14, %s7292_s20  ;;  %p7296_p12 = scmp.lt.u32.totalorder %s7292_s20, %s9072_s14 }
 0x762   :  { %p7298_p13 = pnand %p7296_p12, %p7293_p11 }
 0x764   :  { %7301 = shalt.err (!%p7298_p13)
}
 0x765   :  { %5778 = dma.vmem_to_hbm [thread:$0]  %s5773_s21, 1024, %s9072_s14, [#allocation4], %s7337_s28, %s7337_s28, %s7338_s29   ;;  %v6691_v60 = vpop.f32.mrb[148].mxu1 }
 0x766   :  { %v6705_v31 = vadd.f32 %v6691_v60, %v5932_v36  ;;  %v5712_v61 = vpop.f32.mrb[149].mxu1  ;;  %s7354_s24 = smov [#allocation14]  }
 0x767   :  { %v6706_v56 = vadd.f32 %v5932_v36, %v5712_v61  ;;  %v6692_v9 = vpop.f32.mrb[150].mxu1  ;;  %s5784_s25 = sshll.u32 %s7354_s24, 4  ;;  %s5785_s25 = int_to_ptr.vmem [resolvable:$true] %s5784_s25 }
 0x768   :  { %5761 = vst [vmem:[#allocation14 + $0x10] sm:$0xff] %v6705_v31  ;;  %v6707_v12 = vadd.f32 %v6692_v9, %v5932_v36  ;;  %v5715_v55 = vpop.f32.mrb[151].mxu1  ;;  %s7302_s14 = scalar_lea.vmem %s5785_s25, 1024  ;;  %p7307_p1 = scmp.lt.s32.totalorder %s5785_s25, %s5785_s25 }
 0x769   :  { %5759 = vst [vmem:[#allocation14] sm:$0xff] %v6706_v56  ;;  %v6708_v22 = vadd.f32 %v5932_v36, %v5715_v55  ;;  %v6695_v39 = vpop.f32.mrb[152].mxu1  ;;  %p7303_p0 = scmp.ne.s32.totalorder %s5785_s25, %s7302_s14  ;;  %p7308_p2 = scmp.lt.s32.totalorder %s7302_s14, %s7302_s14 }
 0x76a   :  { %5762 = vst [vmem:[#allocation14 + $0x18] sm:$0xff] %v6707_v12  ;;  %v6709_v5 = vadd.f32 %v6695_v39, %v5932_v36  ;;  %v5728_v46 = vpop.f32.mrb[153].mxu1 }
 0x76b   :  { %5760 = vst [vmem:[#allocation14 + $0x8] sm:$0xff] %v6708_v22  ;;  %v6710_v27 = vadd.f32 %v5932_v36, %v5728_v46  ;;  %v6696_v42 = vpop.f32.mrb[154].mxu1  ;;  %p7309_p3 = por %p7308_p2, %p7307_p1 }
 0x76c   :  { %5765 = vst [vmem:[#allocation14 + $0x30] sm:$0xff] %v6709_v5  ;;  %v6711_v37 = vadd.f32 %v6696_v42, %v5932_v36  ;;  %v5731_v8 = vpop.f32.mrb[155].mxu1 }
 0x76d   :  { %5763 = vst [vmem:[#allocation14 + $0x20] sm:$0xff] %v6710_v27  ;;  %v6712_v45 = vadd.f32 %v5932_v36, %v5731_v8  ;;  %p7310_p4 = pnand %p7309_p3, %p7303_p0 }
 0x76e   :  { %5766 = vst [vmem:[#allocation14 + $0x38] sm:$0xff] %v6711_v37 }
 0x76f   :  { %5764 = vst [vmem:[#allocation14 + $0x28] sm:$0xff] %v6712_v45 }
 0x770   :  { %7313 = shalt.err (!%p7310_p4)
}
 0x771   :  { %s9185_s4 = sld [smem:[#allocation63_spill]] }
 0x777   :  { %s7314_s19 = scalar_lea.hbm %s9185_s4, 1024 }
 0x778   :  { %p7315_p5 = scmp.ne.s32.totalorder %s9185_s4, %s7314_s19  ;;  %p7318_p6 = scmp.lt.u32.totalorder %s7314_s19, %s9185_s4 }
 0x77a   :  { %p7320_p7 = pnand %p7318_p6, %p7315_p5 }
 0x77c   :  { %7323 = shalt.err (!%p7320_p7)
}
 0x77d   :  { %5790 = dma.vmem_to_hbm [thread:$0]  %s5785_s25, 1024, %s9185_s4, [#allocation15], %s7337_s28, %s7337_s28, %s7338_s29  }
 0x77e   :  { %7332 = dma.done.wait [#allocation4], 1024  }
 0x77f   :  { %7333 = vsyncadd [#allocation4], 4294966272 }
 0x780   :  { %7334 = dma.done.wait [#allocation15], 1024  }
 0x781   :  { %7335 = vsyncadd [#allocation15], 4294966272 }
 0x782   :  { %5797 = vsyncpa [#allocation3], 1 }
 0x783   :  { %5798 = vsyncpa [#allocation6], 1 }
 0x784   :  { %5799 = vsyncpa [#allocation9], 1 }
 0x785   :  { %5800 = vsyncpa [#allocation12], 1 }
 0x786   :  { %5801 = vsyncpa [#allocation4], 1 }
 0x787   :  { %5802 = vsyncpa [#allocation15], 1 }

</bundles_post_ra>
